<compile_context>
chip_gen: v7x
topology: tpu7x:2x2x1
jax: 0.10.0
libtpu: 0.0.40
codegen_flags: <defaults>
</compile_context>

<pallas_src>
import numpy as np
import jax
import jax.numpy as jnp
from jax import lax
from jax.experimental import pallas as pl
from jax.experimental.pallas import tpu as pltpu

LANE = 128


def _round_up(v, m):
    return ((v + m - 1) // m) * m


# ---------------------------------------------------------------------------
# Parameter construction (deterministic, synthetic), PyTorch-shaped semantics.
# Weights are rounded through bf16 so kernel (bf16 MXU) and f32 reference use
# exactly the same weight values.
# ---------------------------------------------------------------------------
def _init_conv(key, K, cin, cout):
    kw, kb = jax.random.split(key)
    scale = 1.0 / float(cin * K) ** 0.5
    w = jax.random.normal(kw, (K, cin, cout), jnp.float32) * scale
    w = w.astype(jnp.bfloat16).astype(jnp.float32)      # bf16-representable
    b = jax.random.normal(kb, (cout,), jnp.float32) * scale
    return w, b


def make_decoder_params(key, *, input_dim, output_dim, emb_dim_decoder,
                        upsample, depth_per_res_block, dilation_growth_rate):
    keys = iter(jax.random.split(key, 256))
    params = {}
    params['init'] = _init_conv(next(keys), 3, output_dim, emb_dim_decoder[0])
    stages = []
    for i in range(len(emb_dim_decoder) - 1):
        cin, cout = emb_dim_decoder[i], emb_dim_decoder[i + 1]
        # Resnet1D with reverse_dilation=True
        dilations = [dilation_growth_rate ** d
                     for d in range(depth_per_res_block)][::-1]
        blocks = []
        for dil in dilations:
            w1, b1 = _init_conv(next(keys), 3, cin, cin)   # conv1: k=3, dil
            w2, b2 = _init_conv(next(keys), 1, cin, cin)   # conv2: k=1
            blocks.append(dict(dil=dil, w1=w1, b1=b1, w2=w2, b2=b2))
        stage = dict(blocks=blocks)
        stage['wc'], stage['bc'] = _init_conv(next(keys), 3, cin, cout)
        if upsample[i]:
            stage['wu'], stage['bu'] = _init_conv(next(keys), 4, cout, cout)
        stages.append(stage)
    params['stages'] = stages
    clast = emb_dim_decoder[-1]
    params['post1'] = _init_conv(next(keys), 3, clast, clast)
    params['post2'] = _init_conv(next(keys), 3, clast, input_dim)
    return params


# ---------------------------------------------------------------------------
# Tiny capability probes (run once at build time on the real backend).
# ---------------------------------------------------------------------------
def _probe_roll_mode():
    """'neg': pltpu.roll matches jnp.roll (result[i] = x[i-shift]);
       'pos': opposite direction; 'concat': fall back to slice+concat."""
    def k(x_ref, o_ref):
        o_ref[...] = pltpu.roll(x_ref[...], 1, axis=0)
    x = jnp.broadcast_to(jnp.arange(8, dtype=jnp.float32)[:, None], (8, LANE))
    try:
        out = pl.pallas_call(
            k, out_shape=jax.ShapeDtypeStruct((8, LANE), jnp.float32))(x)
        v = float(out[0, 0])
        if v == 7.0:
            return 'neg'
        if v == 1.0:
            return 'pos'
    except Exception:
        pass
    return 'concat'


def _probe_strided_store():
    """True if stride-2 sublane stores via pl.ds lower and behave correctly."""
    def k(x_ref, o_ref):
        o_ref[...] = jnp.zeros_like(o_ref)
        o_ref[pl.ds(0, 8, 2), :] = x_ref[...]
        o_ref[pl.ds(1, 8, 2), :] = x_ref[...] + 1.0
    x = jnp.ones((8, LANE), jnp.float32)
    try:
        out = pl.pallas_call(
            k, out_shape=jax.ShapeDtypeStruct((16, LANE), jnp.float32))(x)
        return bool(jnp.all(out[0::2, 0] == 1.0)) and \
               bool(jnp.all(out[1::2, 0] == 2.0))
    except Exception:
        return False


# ---------------------------------------------------------------------------
# Fully-fused Pallas forward (one pallas_call, grid parallel over batch).
# ---------------------------------------------------------------------------
def build_fused_decoder(params, *, B, L0):
    roll_mode = _probe_roll_mode()
    strided_ok = _probe_strided_store()

    output_dim = params['init'][0].shape[1]          # decoder input channels
    input_dim = params['post2'][0].shape[2]          # final output channels
    stages = params['stages']
    n_stage = len(stages)
    upsample = tuple('wu' in st for st in stages)

    # ---- flat layer list (slab packing) + static network meta ------------
    layers = []

    def add_layer(w, b):
        layers.append({'w': np.asarray(w, np.float32),
                       'b': np.asarray(b, np.float32)})
        return len(layers) - 1

    meta = {'init': add_layer(*params['init']), 'stages': []}
    for st in stages:
        sm = {'blocks': [], 'up': None}
        for blk in st['blocks']:
            sm['blocks'].append({'dil': int(blk['dil']),
                                 'l1': add_layer(blk['w1'], blk['b1']),
                                 'l2': add_layer(blk['w2'], blk['b2'])})
        sm['conv'] = add_layer(st['wc'], st['bc'])
        if 'wu' in st:
            sm['up'] = add_layer(st['wu'], st['bu'])
        meta['stages'].append(sm)
    meta['post1'] = add_layer(*params['post1'])
    meta['post2'] = add_layer(*params['post2'])

    # ---- pack all weights / biases into two lane-dense slabs -------------
    for l in layers:
        K, cin, cout = l['w'].shape
        l['K'], l['cin'], l['cout'] = K, cin, cout
        l['cin_p'] = _round_up(cin, LANE)
        l['cout_p'] = _round_up(cout, LANE)
    wcols = max(l['cout_p'] for l in layers)
    wrows = sum(l['K'] * l['cin_p'] for l in layers)
    w_np = np.zeros((wrows, wcols), np.float32)
    b_np = np.zeros((_round_up(len(layers), 8), wcols), np.float32)
    off = 0
    for li, l in enumerate(layers):
        l['off'] = off
        l['bidx'] = li
        for k in range(l['K']):
            w_np[off + k * l['cin_p']: off + k * l['cin_p'] + l['cin'],
                 :l['cout']] = l['w'][k]
        b_np[li, :l['cout']] = l['b']
        off += l['K'] * l['cin_p']
    w_slab = jnp.asarray(w_np, jnp.bfloat16)   # exact (weights bf16-rounded)
    b_slab = jnp.asarray(b_np, jnp.float32)

    # ---- sequence lengths per stage ---------------------------------------
    assert L0 % 8 == 0, "toy L0 must be a multiple of 8 (sublane tiling)"
    stage_L, L = [], L0
    for i in range(n_stage):
        stage_L.append(L)
        if upsample[i]:
            L *= 2
    L_out = L
    BL0, BL_out = B * L0, B * L_out

    cin0_p = layers[meta['init']]['cin_p']
    cout_last_p = layers[meta['post2']]['cout_p']

    up_scratch_shapes = [
        pltpu.VMEM((2 * stage_L[i],
                    layers[meta['stages'][i]['up']]['cout_p']), jnp.float32)
        for i in range(n_stage) if upsample[i]]

    # ---- kernel ------------------------------------------------------------
    def kernel(x_ref, w_ref, b_ref, o_ref, *up_refs):

        def shift_rows(x, s, Lc):
            # result[n] = x[n+s] if 0 <= n+s < Lc else 0  (per-sample zero pad)
            if s == 0:
                return x
            if roll_mode == 'concat':
                z = jnp.zeros((abs(s), x.shape[1]), x.dtype)
                return (jnp.concatenate([x[s:], z], axis=0) if s > 0
                        else jnp.concatenate([z, x[:s]], axis=0))
            amt = (-s) % Lc if roll_mode == 'neg' else s % Lc
            rolled = pltpu.roll(x, amt, axis=0)
            rows = lax.broadcasted_iota(jnp.int32, (Lc, 1), 0)
            mask = rows < (Lc - s) if s > 0 else rows >= (-s)
            return jnp.where(mask, rolled, 0.0)

        def tap_matmul(xs, l, k):
            w = w_ref[l['off'] + k * l['cin_p']:
                      l['off'] + (k + 1) * l['cin_p'], :l['cout_p']]
            return jnp.dot(xs.astype(jnp.bfloat16), w,
                           preferred_element_type=jnp.float32)

        def bias_of(l):
            return b_ref[l['bidx']:l['bidx'] + 1, :l['cout_p']]

        def conv(x, lidx, Lc, *, dil=1, pre_relu=False, post_relu=False,
                 residual=None):
            l = layers[lidx]
            xr = jnp.maximum(x, 0.0) if pre_relu else x
            acc = None
            for k in range(l['K']):
                s = (k - (l['K'] - 1) // 2) * dil   # padding == ((K-1)//2)*dil
                t = tap_matmul(shift_rows(xr, s, Lc), l, k)
                acc = t if acc is None else acc + t
            y = acc + bias_of(l)
            if post_relu:
                y = jnp.maximum(y, 0.0)
            if residual is not None:
                y = y + residual
            return y

        def upsample2x(x, lidx, Lc, us_ref):
            # ConvTranspose1d(k=4, s=2, p=1):
            #   out[2m]   = x[m] @ W1 + x[m-1] @ W3 + b
            #   out[2m+1] = x[m] @ W2 + x[m+1] @ W0 + b
            l = layers[lidx]
            b = bias_of(l)
            even = tap_matmul(x, l, 1) + \
                tap_matmul(shift_rows(x, -1, Lc), l, 3) + b
            odd = tap_matmul(x, l, 2) + \
                tap_matmul(shift_rows(x, 1, Lc), l, 0) + b
            if strided_ok:
                us_ref[pl.ds(0, Lc, 2), :] = even     # rows 0,2,4,...
                us_ref[pl.ds(1, Lc, 2), :] = odd      # rows 1,3,5,...
            else:
                # TODO(synk): slow per-row fallback (only if the compiler
                # rejects stride-2 sublane stores).
                for m in range(Lc):
                    us_ref[2 * m:2 * m + 1, :] = even[m:m + 1, :]
                    us_ref[2 * m + 1:2 * m + 2, :] = odd[m:m + 1, :]
            return us_ref[...]

        x = x_ref[...]                                   # (L0, cin0_p) f32
        x = conv(x, meta['init'], L0, post_relu=True)    # init_conv + ReLU
        Lc, up_i = L0, 0
        for i in range(n_stage):
            sm = meta['stages'][i]
            for bm in sm['blocks']:                      # ResConv1DBlock
                h = conv(x, bm['l1'], Lc, dil=bm['dil'], pre_relu=True)
                x = conv(h, bm['l2'], Lc, pre_relu=True, residual=x)
            x = conv(x, sm['conv'], Lc)                  # stage conv (no act)
            if sm['up'] is not None:
                x = upsample2x(x, sm['up'], Lc, up_refs[up_i])
                up_i += 1
                Lc *= 2
        x = conv(x, meta['post1'], Lc, post_relu=True)   # post conv + ReLU
        x = conv(x, meta['post2'], Lc)
        o_ref[...] = x.astype(o_ref.dtype)

    call = pl.pallas_call(
        kernel,
        out_shape=jax.ShapeDtypeStruct((BL_out, cout_last_p), jnp.float32),
        grid=(B,),
        in_specs=[
            pl.BlockSpec((L0, cin0_p), lambda b: (b, 0)),        # activations
            pl.BlockSpec(w_slab.shape, lambda b: (0, 0)),        # resident W
            pl.BlockSpec(b_slab.shape, lambda b: (0, 0)),        # resident b
        ],
        out_specs=pl.BlockSpec((L_out, cout_last_p), lambda b: (b, 0)),
        scratch_shapes=up_scratch_shapes,
        compiler_params=pltpu.CompilerParams(
            dimension_semantics=("parallel",),
            vmem_limit_bytes=64 * 1024 * 1024),
    )

    def forward(x):
        # x: (B, L0, output_dim) channels-last == PyTorch NCL (B, C, L) transposed.
        xp = jnp.pad(x.astype(jnp.float32),
                     ((0, 0), (0, 0), (0, cin0_p - output_dim)))
        y = call(xp.reshape(BL0, cin0_p), w_slab, b_slab)
        return y.reshape(B, L_out, cout_last_p)[:, :, :input_dim]

    return forward


# ---------------------------------------------------------------------------
# Pure-JAX reference (per-layer, host padding) for correctness checking.
# Activations are quantized to bf16 at the same points as the kernel's MXU
# inputs so the comparison isolates the convolution/upsample semantics.
# ---------------------------------------------------------------------------
def _q(x):
    return x.astype(jnp.bfloat16).astype(jnp.float32)


def _conv1d_ref(x, w, b, *, dil=1, pre_relu=False, post_relu=False,
                residual=None):
    B, L, _ = x.shape
    K, _, cout = w.shape
    pad = ((K - 1) // 2) * dil
    if pre_relu:
        x = jnp.maximum(x, 0.0)
    x = _q(x)
    xp = jnp.pad(x, ((0, 0), (pad, pad), (0, 0)))
    acc = jnp.zeros((B, L, cout), jnp.float32) + b
    for k in range(K):
        acc = acc + jnp.einsum('blc,cd->bld',
                               xp[:, k * dil:k * dil + L, :], w[k])
    if post_relu:
        acc = jnp.maximum(acc, 0.0)
    if residual is not None:
        acc = acc + residual
    return acc


def _conv_transpose1d_ref(x, w, b):
    B, L, _ = x.shape
    _, _, cout = w.shape
    x = _q(x)
    xp = jnp.pad(x, ((0, 0), (1, 1), (0, 0)))
    even = (jnp.einsum('blc,cd->bld', xp[:, 1:1 + L], w[1])
            + jnp.einsum('blc,cd->bld', xp[:, 0:L], w[3]) + b)
    odd = (jnp.einsum('blc,cd->bld', xp[:, 1:1 + L], w[2])
           + jnp.einsum('blc,cd->bld', xp[:, 2:2 + L], w[0]) + b)
    return jnp.stack([even, odd], axis=2).reshape(B, 2 * L, cout)


def decoder_forward_ref(params, x):
    w, b = params['init']
    x = _conv1d_ref(x, w, b, post_relu=True)
    for stage in params['stages']:
        for blk in stage['blocks']:
            h = _conv1d_ref(x, blk['w1'], blk['b1'], dil=blk['dil'],
                            pre_relu=True)
            x = _conv1d_ref(h, blk['w2'], blk['b2'], pre_relu=True, residual=x)
        x = _conv1d_ref(x, stage['wc'], stage['bc'])
        if 'wu' in stage:
            x = _conv_transpose1d_ref(x, stage['wu'], stage['bu'])
    w, b = params['post1']
    x = _conv1d_ref(x, w, b, post_relu=True)
    w, b = params['post2']
    x = _conv1d_ref(x, w, b)
    return x


if __name__ == "__main__":
    key = jax.random.PRNGKey(0)
    k_param, k_x = jax.random.split(key)

    # Small config consistent with the Decoder constructor.
    input_dim = 32           # final output feature dim
    output_dim = 16          # decoder input (latent) channels
    emb_dim_decoder = (16, 32, 64)
    upsample = (1, 0)        # len == len(emb_dim_decoder) - 1
    depth_per_res_block = 2
    dilation_growth_rate = 2
    B, L = 2, 8

    params = make_decoder_params(
        k_param, input_dim=input_dim, output_dim=output_dim,
        emb_dim_decoder=emb_dim_decoder, upsample=upsample,
        depth_per_res_block=depth_per_res_block,
        dilation_growth_rate=dilation_growth_rate)

    # (B, L, C) channels-last == PyTorch NCL (B, C, L) transposed.
    x = jax.random.normal(k_x, (B, L, output_dim), jnp.float32)

    fwd = jax.jit(build_fused_decoder(params, B=B, L0=L))
    out = jax.block_until_ready(fwd(x))

    ref = decoder_forward_ref(params, x)

    assert out.shape == (B, 2 * L, input_dim), out.shape   # one upsample stage
    assert bool(jnp.all(jnp.isfinite(out)))
    err = float(jnp.max(jnp.abs(out - ref)))
    assert bool(jnp.allclose(out, ref, atol=2e-3, rtol=2e-3)), err
    print("KERNEL_OK")
</pallas_src>

<mosaic_0001>
module attributes {stable_mosaic.version = 11 : i64} {
  func.func @k(%arg0: memref<8x128xf32, #tpu.memory_space<vmem>>, %arg1: memref<8x128xf32, #tpu.memory_space<vmem>>) attributes {dimension_semantics = [], scalar_prefetch = 0 : i64, scratch_operands = 0 : i64, tpu.core_type = #tpu.core_type<tc>} {
    %c0 = arith.constant 0 : index
    %c0_0 = arith.constant 0 : index
    %0 = vector.load %arg0[%c0, %c0_0] : memref<8x128xf32, #tpu.memory_space<vmem>>, vector<8x128xf32>
    %c1_i32 = arith.constant 1 : i32
    %1 = tpu.dynamic_rotate %0 by %c1_i32 dim 0 : vector<8x128xf32>, i32 -> vector<8x128xf32>
    %c0_1 = arith.constant 0 : index
    %c0_2 = arith.constant 0 : index
    %2 = vector.load %arg1[%c0_1, %c0_2] : memref<8x128xf32, #tpu.memory_space<vmem>>, vector<8x128xf32>
    tpu.vector_store %arg1[%c0_1, %c0_2], %1 {strides = array<i32>} : memref<8x128xf32, #tpu.memory_space<vmem>>, vector<8x128xf32>,
    return
  }
}

module attributes {stable_mosaic.version = 11 : i64} {
  func.func @k(%arg0: memref<8x128xf32, #tpu.memory_space<vmem>>, %arg1: memref<16x128xf32, #tpu.memory_space<vmem>>) attributes {dimension_semantics = [], scalar_prefetch = 0 : i64, scratch_operands = 0 : i64, tpu.core_type = #tpu.core_type<tc>} {
    %cst = arith.constant 0.000000e+00 : f32
    %0 = vector.broadcast %cst : f32 to vector<16x128xf32>
    %c0 = arith.constant 0 : index
    %c0_0 = arith.constant 0 : index
    %1 = vector.load %arg1[%c0, %c0_0] : memref<16x128xf32, #tpu.memory_space<vmem>>, vector<16x128xf32>
    tpu.vector_store %arg1[%c0, %c0_0], %0 {strides = array<i32>} : memref<16x128xf32, #tpu.memory_space<vmem>>, vector<16x128xf32>,
    %c0_1 = arith.constant 0 : index
    %c0_2 = arith.constant 0 : index
    %2 = vector.load %arg0[%c0_1, %c0_2] : memref<8x128xf32, #tpu.memory_space<vmem>>, vector<8x128xf32>
    %c0_3 = arith.constant 0 : index
    %c0_4 = arith.constant 0 : index
    %3 = tpu.strided_load %arg1[%c0_3, %c0_4] {strides = array<i32: 2, 1>} : memref<16x128xf32, #tpu.memory_space<vmem>>, vector<8x128xf32>
    tpu.strided_store %arg1[%c0_3, %c0_4], %2 {strides = array<i32: 2, 1>} : memref<16x128xf32, #tpu.memory_space<vmem>>, vector<8x128xf32>
    %c0_5 = arith.constant 0 : index
    %c0_6 = arith.constant 0 : index
    %4 = vector.load %arg0[%c0_5, %c0_6] : memref<8x128xf32, #tpu.memory_space<vmem>>, vector<8x128xf32>
    %cst_7 = arith.constant 1.000000e+00 : f32
    %5 = vector.broadcast %cst_7 : f32 to vector<8x128xf32>
    %6 = arith.addf %4, %5 : vector<8x128xf32>
    %c1 = arith.constant 1 : index
    %c0_8 = arith.constant 0 : index
    %7 = tpu.strided_load %arg1[%c1, %c0_8] {strides = array<i32: 2, 1>} : memref<16x128xf32, #tpu.memory_space<vmem>>, vector<8x128xf32>
    tpu.strided_store %arg1[%c1, %c0_8], %6 {strides = array<i32: 2, 1>} : memref<16x128xf32, #tpu.memory_space<vmem>>, vector<8x128xf32>
    return
  }
}

module attributes {stable_mosaic.version = 11 : i64} {
  func.func @kernel(%arg0: i32, %arg1: memref<8x128xf32, #tpu.memory_space<vmem>>, %arg2: memref<4480x128xbf16, #tpu.memory_space<vmem>>, %arg3: memref<16x128xf32, #tpu.memory_space<vmem>>, %arg4: memref<16x128xf32, #tpu.memory_space<vmem>>, %arg5: memref<16x128xf32, #tpu.memory_space<vmem>>) attributes {dimension_semantics = [#tpu.dimension_semantics<parallel>], iteration_bounds = array<i64: 2>, scalar_prefetch = 0 : i64, scratch_operands = 1 : i64, tpu.core_type = #tpu.core_type<tc>, window_params = [{transform_indices = @transform_0, window_bounds = array<i64: 8, 128>}, {pipeline_mode = #tpu.pipeline_mode<synchronous>, transform_indices = @transform_1, window_bounds = array<i64: 4480, 128>}, {pipeline_mode = #tpu.pipeline_mode<synchronous>, transform_indices = @transform_2, window_bounds = array<i64: 16, 128>}, {transform_indices = @transform_3, window_bounds = array<i64: 16, 128>}]} {
    %c0 = arith.constant 0 : index
    %c0_0 = arith.constant 0 : index
    %0 = vector.load %arg1[%c0, %c0_0] : memref<8x128xf32, #tpu.memory_space<vmem>>, vector<8x128xf32>
    %cst = arith.constant 0.000000e+00 : f32
    %1 = vector.broadcast %cst : f32 to vector<1x128xf32>
    %2 = vector.extract_strided_slice %0 {offsets = [0, 0], sizes = [7, 128], strides = [1, 1]} : vector<8x128xf32> to vector<7x128xf32>
    %3 = tpu.concatenate %1, %2 in 0 : vector<1x128xf32>, vector<7x128xf32> -> vector<8x128xf32>
    %c0_1 = arith.constant 0 : index
    %c0_2 = arith.constant 0 : index
    %4 = vector.load %arg2[%c0_1, %c0_2] : memref<4480x128xbf16, #tpu.memory_space<vmem>>, vector<128x128xbf16>
    %5 = arith.truncf %3 : vector<8x128xf32> to vector<8x128xbf16>
    %cst_3 = arith.constant dense<0.000000e+00> : vector<8x128xf32>
    %6 = tpu.matmul %5, %4, %cst_3 {dimension_numbers = #tpu.dot_dimension_numbers<[1], [0], [0], [1], [0, 0, 1, 1], [], []>} : vector<8x128xbf16>, vector<128x128xbf16>, vector<8x128xf32> -> vector<8x128xf32>
    %c128 = arith.constant 128 : index
    %c0_4 = arith.constant 0 : index
    %7 = vector.load %arg2[%c128, %c0_4] : memref<4480x128xbf16, #tpu.memory_space<vmem>>, vector<128x128xbf16>
    %8 = arith.truncf %0 : vector<8x128xf32> to vector<8x128xbf16>
    %cst_5 = arith.constant dense<0.000000e+00> : vector<8x128xf32>
    %9 = tpu.matmul %8, %7, %cst_5 {dimension_numbers = #tpu.dot_dimension_numbers<[1], [0], [0], [1], [0, 0, 1, 1], [], []>} : vector<8x128xbf16>, vector<128x128xbf16>, vector<8x128xf32> -> vector<8x128xf32>
    %10 = arith.addf %6, %9 : vector<8x128xf32>
    %cst_6 = arith.constant 0.000000e+00 : f32
    %11 = vector.broadcast %cst_6 : f32 to vector<1x128xf32>
    %12 = vector.extract_strided_slice %0 {offsets = [1, 0], sizes = [7, 128], strides = [1, 1]} : vector<8x128xf32> to vector<7x128xf32>
    %13 = tpu.concatenate %12, %11 in 0 : vector<7x128xf32>, vector<1x128xf32> -> vector<8x128xf32>
    %c256 = arith.constant 256 : index
    %c0_7 = arith.constant 0 : index
    %14 = vector.load %arg2[%c256, %c0_7] : memref<4480x128xbf16, #tpu.memory_space<vmem>>, vector<128x128xbf16>
    %15 = arith.truncf %13 : vector<8x128xf32> to vector<8x128xbf16>
    %cst_8 = arith.constant dense<0.000000e+00> : vector<8x128xf32>
    %16 = tpu.matmul %15, %14, %cst_8 {dimension_numbers = #tpu.dot_dimension_numbers<[1], [0], [0], [1], [0, 0, 1, 1], [], []>} : vector<8x128xbf16>, vector<128x128xbf16>, vector<8x128xf32> -> vector<8x128xf32>
    %17 = arith.addf %10, %16 : vector<8x128xf32>
    %c0_9 = arith.constant 0 : index
    %c0_10 = arith.constant 0 : index
    %18 = vector.load %arg3[%c0_9, %c0_10] : memref<16x128xf32, #tpu.memory_space<vmem>>, vector<1x128xf32>
    %19 = vector.broadcast %18 : vector<1x128xf32> to vector<8x128xf32>
    %20 = arith.addf %17, %19 : vector<8x128xf32>
    %cst_11 = arith.constant 0.000000e+00 : f32
    %21 = vector.broadcast %cst_11 : f32 to vector<8x128xf32>
    %22 = arith.maximumf %20, %21 : vector<8x128xf32>
    %cst_12 = arith.constant 0.000000e+00 : f32
    %23 = vector.broadcast %cst_12 : f32 to vector<8x128xf32>
    %24 = arith.maximumf %22, %23 : vector<8x128xf32>
    %cst_13 = arith.constant 0.000000e+00 : f32
    %25 = vector.broadcast %cst_13 : f32 to vector<2x128xf32>
    %26 = vector.extract_strided_slice %24 {offsets = [0, 0], sizes = [6, 128], strides = [1, 1]} : vector<8x128xf32> to vector<6x128xf32>
    %27 = tpu.concatenate %25, %26 in 0 : vector<2x128xf32>, vector<6x128xf32> -> vector<8x128xf32>
    %c384 = arith.constant 384 : index
    %c0_14 = arith.constant 0 : index
    %28 = vector.load %arg2[%c384, %c0_14] : memref<4480x128xbf16, #tpu.memory_space<vmem>>, vector<128x128xbf16>
    %29 = arith.truncf %27 : vector<8x128xf32> to vector<8x128xbf16>
    %cst_15 = arith.constant dense<0.000000e+00> : vector<8x128xf32>
    %30 = tpu.matmul %29, %28, %cst_15 {dimension_numbers = #tpu.dot_dimension_numbers<[1], [0], [0], [1], [0, 0, 1, 1], [], []>} : vector<8x128xbf16>, vector<128x128xbf16>, vector<8x128xf32> -> vector<8x128xf32>
    %c512 = arith.constant 512 : index
    %c0_16 = arith.constant 0 : index
    %31 = vector.load %arg2[%c512, %c0_16] : memref<4480x128xbf16, #tpu.memory_space<vmem>>, vector<128x128xbf16>
    %32 = arith.truncf %24 : vector<8x128xf32> to vector<8x128xbf16>
    %cst_17 = arith.constant dense<0.000000e+00> : vector<8x128xf32>
    %33 = tpu.matmul %32, %31, %cst_17 {dimension_numbers = #tpu.dot_dimension_numbers<[1], [0], [0], [1], [0, 0, 1, 1], [], []>} : vector<8x128xbf16>, vector<128x128xbf16>, vector<8x128xf32> -> vector<8x128xf32>
    %34 = arith.addf %30, %33 : vector<8x128xf32>
    %cst_18 = arith.constant 0.000000e+00 : f32
    %35 = vector.broadcast %cst_18 : f32 to vector<2x128xf32>
    %36 = vector.extract_strided_slice %24 {offsets = [2, 0], sizes = [6, 128], strides = [1, 1]} : vector<8x128xf32> to vector<6x128xf32>
    %37 = tpu.concatenate %36, %35 in 0 : vector<6x128xf32>, vector<2x128xf32> -> vector<8x128xf32>
    %c640 = arith.constant 640 : index
    %c0_19 = arith.constant 0 : index
    %38 = vector.load %arg2[%c640, %c0_19] : memref<4480x128xbf16, #tpu.memory_space<vmem>>, vector<128x128xbf16>
    %39 = arith.truncf %37 : vector<8x128xf32> to vector<8x128xbf16>
    %cst_20 = arith.constant dense<0.000000e+00> : vector<8x128xf32>
    %40 = tpu.matmul %39, %38, %cst_20 {dimension_numbers = #tpu.dot_dimension_numbers<[1], [0], [0], [1], [0, 0, 1, 1], [], []>} : vector<8x128xbf16>, vector<128x128xbf16>, vector<8x128xf32> -> vector<8x128xf32>
    %41 = arith.addf %34, %40 : vector<8x128xf32>
    %c1 = arith.constant 1 : index
    %c0_21 = arith.constant 0 : index
    %42 = vector.load %arg3[%c1, %c0_21] : memref<16x128xf32, #tpu.memory_space<vmem>>, vector<1x128xf32>
    %43 = vector.broadcast %42 : vector<1x128xf32> to vector<8x128xf32>
    %44 = arith.addf %41, %43 : vector<8x128xf32>
    %cst_22 = arith.constant 0.000000e+00 : f32
    %45 = vector.broadcast %cst_22 : f32 to vector<8x128xf32>
    %46 = arith.maximumf %44, %45 : vector<8x128xf32>
    %c768 = arith.constant 768 : index
    %c0_23 = arith.constant 0 : index
    %47 = vector.load %arg2[%c768, %c0_23] : memref<4480x128xbf16, #tpu.memory_space<vmem>>, vector<128x128xbf16>
    %48 = arith.truncf %46 : vector<8x128xf32> to vector<8x128xbf16>
    %cst_24 = arith.constant dense<0.000000e+00> : vector<8x128xf32>
    %49 = tpu.matmul %48, %47, %cst_24 {dimension_numbers = #tpu.dot_dimension_numbers<[1], [0], [0], [1], [0, 0, 1, 1], [], []>} : vector<8x128xbf16>, vector<128x128xbf16>, vector<8x128xf32> -> vector<8x128xf32>
    %c2 = arith.constant 2 : index
    %c0_25 = arith.constant 0 : index
    %50 = vector.load %arg3[%c2, %c0_25] : memref<16x128xf32, #tpu.memory_space<vmem>>, vector<1x128xf32>
    %51 = vector.broadcast %50 : vector<1x128xf32> to vector<8x128xf32>
    %52 = arith.addf %49, %51 : vector<8x128xf32>
    %53 = arith.addf %52, %22 : vector<8x128xf32>
    %cst_26 = arith.constant 0.000000e+00 : f32
    %54 = vector.broadcast %cst_26 : f32 to vector<8x128xf32>
    %55 = arith.maximumf %53, %54 : vector<8x128xf32>
    %cst_27 = arith.constant 0.000000e+00 : f32
    %56 = vector.broadcast %cst_27 : f32 to vector<1x128xf32>
    %57 = vector.extract_strided_slice %55 {offsets = [0, 0], sizes = [7, 128], strides = [1, 1]} : vector<8x128xf32> to vector<7x128xf32>
    %58 = tpu.concatenate %56, %57 in 0 : vector<1x128xf32>, vector<7x128xf32> -> vector<8x128xf32>
    %c896 = arith.constant 896 : index
    %c0_28 = arith.constant 0 : index
    %59 = vector.load %arg2[%c896, %c0_28] : memref<4480x128xbf16, #tpu.memory_space<vmem>>, vector<128x128xbf16>
    %60 = arith.truncf %58 : vector<8x128xf32> to vector<8x128xbf16>
    %cst_29 = arith.constant dense<0.000000e+00> : vector<8x128xf32>
    %61 = tpu.matmul %60, %59, %cst_29 {dimension_numbers = #tpu.dot_dimension_numbers<[1], [0], [0], [1], [0, 0, 1, 1], [], []>} : vector<8x128xbf16>, vector<128x128xbf16>, vector<8x128xf32> -> vector<8x128xf32>
    %c1024 = arith.constant 1024 : index
    %c0_30 = arith.constant 0 : index
    %62 = vector.load %arg2[%c1024, %c0_30] : memref<4480x128xbf16, #tpu.memory_space<vmem>>, vector<128x128xbf16>
    %63 = arith.truncf %55 : vector<8x128xf32> to vector<8x128xbf16>
    %cst_31 = arith.constant dense<0.000000e+00> : vector<8x128xf32>
    %64 = tpu.matmul %63, %62, %cst_31 {dimension_numbers = #tpu.dot_dimension_numbers<[1], [0], [0], [1], [0, 0, 1, 1], [], []>} : vector<8x128xbf16>, vector<128x128xbf16>, vector<8x128xf32> -> vector<8x128xf32>
    %65 = arith.addf %61, %64 : vector<8x128xf32>
    %cst_32 = arith.constant 0.000000e+00 : f32
    %66 = vector.broadcast %cst_32 : f32 to vector<1x128xf32>
    %67 = vector.extract_strided_slice %55 {offsets = [1, 0], sizes = [7, 128], strides = [1, 1]} : vector<8x128xf32> to vector<7x128xf32>
    %68 = tpu.concatenate %67, %66 in 0 : vector<7x128xf32>, vector<1x128xf32> -> vector<8x128xf32>
    %c1152 = arith.constant 1152 : index
    %c0_33 = arith.constant 0 : index
    %69 = vector.load %arg2[%c1152, %c0_33] : memref<4480x128xbf16, #tpu.memory_space<vmem>>, vector<128x128xbf16>
    %70 = arith.truncf %68 : vector<8x128xf32> to vector<8x128xbf16>
    %cst_34 = arith.constant dense<0.000000e+00> : vector<8x128xf32>
    %71 = tpu.matmul %70, %69, %cst_34 {dimension_numbers = #tpu.dot_dimension_numbers<[1], [0], [0], [1], [0, 0, 1, 1], [], []>} : vector<8x128xbf16>, vector<128x128xbf16>, vector<8x128xf32> -> vector<8x128xf32>
    %72 = arith.addf %65, %71 : vector<8x128xf32>
    %c3 = arith.constant 3 : index
    %c0_35 = arith.constant 0 : index
    %73 = vector.load %arg3[%c3, %c0_35] : memref<16x128xf32, #tpu.memory_space<vmem>>, vector<1x128xf32>
    %74 = vector.broadcast %73 : vector<1x128xf32> to vector<8x128xf32>
    %75 = arith.addf %72, %74 : vector<8x128xf32>
    %cst_36 = arith.constant 0.000000e+00 : f32
    %76 = vector.broadcast %cst_36 : f32 to vector<8x128xf32>
    %77 = arith.maximumf %75, %76 : vector<8x128xf32>
    %c1280 = arith.constant 1280 : index
    %c0_37 = arith.constant 0 : index
    %78 = vector.load %arg2[%c1280, %c0_37] : memref<4480x128xbf16, #tpu.memory_space<vmem>>, vector<128x128xbf16>
    %79 = arith.truncf %77 : vector<8x128xf32> to vector<8x128xbf16>
    %cst_38 = arith.constant dense<0.000000e+00> : vector<8x128xf32>
    %80 = tpu.matmul %79, %78, %cst_38 {dimension_numbers = #tpu.dot_dimension_numbers<[1], [0], [0], [1], [0, 0, 1, 1], [], []>} : vector<8x128xbf16>, vector<128x128xbf16>, vector<8x128xf32> -> vector<8x128xf32>
    %c4 = arith.constant 4 : index
    %c0_39 = arith.constant 0 : index
    %81 = vector.load %arg3[%c4, %c0_39] : memref<16x128xf32, #tpu.memory_space<vmem>>, vector<1x128xf32>
    %82 = vector.broadcast %81 : vector<1x128xf32> to vector<8x128xf32>
    %83 = arith.addf %80, %82 : vector<8x128xf32>
    %84 = arith.addf %83, %53 : vector<8x128xf32>
    %cst_40 = arith.constant 0.000000e+00 : f32
    %85 = vector.broadcast %cst_40 : f32 to vector<1x128xf32>
    %86 = vector.extract_strided_slice %84 {offsets = [0, 0], sizes = [7, 128], strides = [1, 1]} : vector<8x128xf32> to vector<7x128xf32>
    %87 = tpu.concatenate %85, %86 in 0 : vector<1x128xf32>, vector<7x128xf32> -> vector<8x128xf32>
    %c1408 = arith.constant 1408 : index
    %c0_41 = arith.constant 0 : index
    %88 = vector.load %arg2[%c1408, %c0_41] : memref<4480x128xbf16, #tpu.memory_space<vmem>>, vector<128x128xbf16>
    %89 = arith.truncf %87 : vector<8x128xf32> to vector<8x128xbf16>
    %cst_42 = arith.constant dense<0.000000e+00> : vector<8x128xf32>
    %90 = tpu.matmul %89, %88, %cst_42 {dimension_numbers = #tpu.dot_dimension_numbers<[1], [0], [0], [1], [0, 0, 1, 1], [], []>} : vector<8x128xbf16>, vector<128x128xbf16>, vector<8x128xf32> -> vector<8x128xf32>
    %c1536 = arith.constant 1536 : index
    %c0_43 = arith.constant 0 : index
    %91 = vector.load %arg2[%c1536, %c0_43] : memref<4480x128xbf16, #tpu.memory_space<vmem>>, vector<128x128xbf16>
    %92 = arith.truncf %84 : vector<8x128xf32> to vector<8x128xbf16>
    %cst_44 = arith.constant dense<0.000000e+00> : vector<8x128xf32>
    %93 = tpu.matmul %92, %91, %cst_44 {dimension_numbers = #tpu.dot_dimension_numbers<[1], [0], [0], [1], [0, 0, 1, 1], [], []>} : vector<8x128xbf16>, vector<128x128xbf16>, vector<8x128xf32> -> vector<8x128xf32>
    %94 = arith.addf %90, %93 : vector<8x128xf32>
    %cst_45 = arith.constant 0.000000e+00 : f32
    %95 = vector.broadcast %cst_45 : f32 to vector<1x128xf32>
    %96 = vector.extract_strided_slice %84 {offsets = [1, 0], sizes = [7, 128], strides = [1, 1]} : vector<8x128xf32> to vector<7x128xf32>
    %97 = tpu.concatenate %96, %95 in 0 : vector<7x128xf32>, vector<1x128xf32> -> vector<8x128xf32>
    %c1664 = arith.constant 1664 : index
    %c0_46 = arith.constant 0 : index
    %98 = vector.load %arg2[%c1664, %c0_46] : memref<4480x128xbf16, #tpu.memory_space<vmem>>, vector<128x128xbf16>
    %99 = arith.truncf %97 : vector<8x128xf32> to vector<8x128xbf16>
    %cst_47 = arith.constant dense<0.000000e+00> : vector<8x128xf32>
    %100 = tpu.matmul %99, %98, %cst_47 {dimension_numbers = #tpu.dot_dimension_numbers<[1], [0], [0], [1], [0, 0, 1, 1], [], []>} : vector<8x128xbf16>, vector<128x128xbf16>, vector<8x128xf32> -> vector<8x128xf32>
    %101 = arith.addf %94, %100 : vector<8x128xf32>
    %c5 = arith.constant 5 : index
    %c0_48 = arith.constant 0 : index
    %102 = vector.load %arg3[%c5, %c0_48] : memref<16x128xf32, #tpu.memory_space<vmem>>, vector<1x128xf32>
    %103 = vector.broadcast %102 : vector<1x128xf32> to vector<8x128xf32>
    %104 = arith.addf %101, %103 : vector<8x128xf32>
    %c6 = arith.constant 6 : index
    %c0_49 = arith.constant 0 : index
    %105 = vector.load %arg3[%c6, %c0_49] : memref<16x128xf32, #tpu.memory_space<vmem>>, vector<1x128xf32>
    %c1920 = arith.constant 1920 : index
    %c0_50 = arith.constant 0 : index
    %106 = vector.load %arg2[%c1920, %c0_50] : memref<4480x128xbf16, #tpu.memory_space<vmem>>, vector<128x128xbf16>
    %107 = arith.truncf %104 : vector<8x128xf32> to vector<8x128xbf16>
    %cst_51 = arith.constant dense<0.000000e+00> : vector<8x128xf32>
    %108 = tpu.matmul %107, %106, %cst_51 {dimension_numbers = #tpu.dot_dimension_numbers<[1], [0], [0], [1], [0, 0, 1, 1], [], []>} : vector<8x128xbf16>, vector<128x128xbf16>, vector<8x128xf32> -> vector<8x128xf32>
    %cst_52 = arith.constant 0.000000e+00 : f32
    %109 = vector.broadcast %cst_52 : f32 to vector<1x128xf32>
    %110 = vector.extract_strided_slice %104 {offsets = [0, 0], sizes = [7, 128], strides = [1, 1]} : vector<8x128xf32> to vector<7x128xf32>
    %111 = tpu.concatenate %109, %110 in 0 : vector<1x128xf32>, vector<7x128xf32> -> vector<8x128xf32>
    %c2176 = arith.constant 2176 : index
    %c0_53 = arith.constant 0 : index
    %112 = vector.load %arg2[%c2176, %c0_53] : memref<4480x128xbf16, #tpu.memory_space<vmem>>, vector<128x128xbf16>
    %113 = arith.truncf %111 : vector<8x128xf32> to vector<8x128xbf16>
    %cst_54 = arith.constant dense<0.000000e+00> : vector<8x128xf32>
    %114 = tpu.matmul %113, %112, %cst_54 {dimension_numbers = #tpu.dot_dimension_numbers<[1], [0], [0], [1], [0, 0, 1, 1], [], []>} : vector<8x128xbf16>, vector<128x128xbf16>, vector<8x128xf32> -> vector<8x128xf32>
    %115 = arith.addf %108, %114 : vector<8x128xf32>
    %116 = vector.broadcast %105 : vector<1x128xf32> to vector<8x128xf32>
    %117 = arith.addf %115, %116 : vector<8x128xf32>
    %c2048 = arith.constant 2048 : index
    %c0_55 = arith.constant 0 : index
    %118 = vector.load %arg2[%c2048, %c0_55] : memref<4480x128xbf16, #tpu.memory_space<vmem>>, vector<128x128xbf16>
    %119 = arith.truncf %104 : vector<8x128xf32> to vector<8x128xbf16>
    %cst_56 = arith.constant dense<0.000000e+00> : vector<8x128xf32>
    %120 = tpu.matmul %119, %118, %cst_56 {dimension_numbers = #tpu.dot_dimension_numbers<[1], [0], [0], [1], [0, 0, 1, 1], [], []>} : vector<8x128xbf16>, vector<128x128xbf16>, vector<8x128xf32> -> vector<8x128xf32>
    %cst_57 = arith.constant 0.000000e+00 : f32
    %121 = vector.broadcast %cst_57 : f32 to vector<1x128xf32>
    %122 = vector.extract_strided_slice %104 {offsets = [1, 0], sizes = [7, 128], strides = [1, 1]} : vector<8x128xf32> to vector<7x128xf32>
    %123 = tpu.concatenate %122, %121 in 0 : vector<7x128xf32>, vector<1x128xf32> -> vector<8x128xf32>
    %c1792 = arith.constant 1792 : index
    %c0_58 = arith.constant 0 : index
    %124 = vector.load %arg2[%c1792, %c0_58] : memref<4480x128xbf16, #tpu.memory_space<vmem>>, vector<128x128xbf16>
    %125 = arith.truncf %123 : vector<8x128xf32> to vector<8x128xbf16>
    %cst_59 = arith.constant dense<0.000000e+00> : vector<8x128xf32>
    %126 = tpu.matmul %125, %124, %cst_59 {dimension_numbers = #tpu.dot_dimension_numbers<[1], [0], [0], [1], [0, 0, 1, 1], [], []>} : vector<8x128xbf16>, vector<128x128xbf16>, vector<8x128xf32> -> vector<8x128xf32>
    %127 = arith.addf %120, %126 : vector<8x128xf32>
    %128 = vector.broadcast %105 : vector<1x128xf32> to vector<8x128xf32>
    %129 = arith.addf %127, %128 : vector<8x128xf32>
    %130 = vector.extract_strided_slice %117 {offsets = [0, 0], sizes = [1, 128], strides = [1, 1]} : vector<8x128xf32> to vector<1x128xf32>
    %c0_60 = arith.constant 0 : index
    %c0_61 = arith.constant 0 : index
    %131 = vector.load %arg5[%c0_60, %c0_61] : memref<16x128xf32, #tpu.memory_space<vmem>>, vector<1x128xf32>
    tpu.vector_store %arg5[%c0_60, %c0_61], %130 {strides = array<i32>} : memref<16x128xf32, #tpu.memory_space<vmem>>, vector<1x128xf32>,
    %132 = vector.extract_strided_slice %129 {offsets = [0, 0], sizes = [1, 128], strides = [1, 1]} : vector<8x128xf32> to vector<1x128xf32>
    %c1_62 = arith.constant 1 : index
    %c0_63 = arith.constant 0 : index
    %133 = vector.load %arg5[%c1_62, %c0_63] : memref<16x128xf32, #tpu.memory_space<vmem>>, vector<1x128xf32>
    tpu.vector_store %arg5[%c1_62, %c0_63], %132 {strides = array<i32>} : memref<16x128xf32, #tpu.memory_space<vmem>>, vector<1x128xf32>,
    %134 = vector.extract_strided_slice %117 {offsets = [1, 0], sizes = [1, 128], strides = [1, 1]} : vector<8x128xf32> to vector<1x128xf32>
    %c2_64 = arith.constant 2 : index
    %c0_65 = arith.constant 0 : index
    %135 = vector.load %arg5[%c2_64, %c0_65] : memref<16x128xf32, #tpu.memory_space<vmem>>, vector<1x128xf32>
    tpu.vector_store %arg5[%c2_64, %c0_65], %134 {strides = array<i32>} : memref<16x128xf32, #tpu.memory_space<vmem>>, vector<1x128xf32>,
    %136 = vector.extract_strided_slice %129 {offsets = [1, 0], sizes = [1, 128], strides = [1, 1]} : vector<8x128xf32> to vector<1x128xf32>
    %c3_66 = arith.constant 3 : index
    %c0_67 = arith.constant 0 : index
    %137 = vector.load %arg5[%c3_66, %c0_67] : memref<16x128xf32, #tpu.memory_space<vmem>>, vector<1x128xf32>
    tpu.vector_store %arg5[%c3_66, %c0_67], %136 {strides = array<i32>} : memref<16x128xf32, #tpu.memory_space<vmem>>, vector<1x128xf32>,
    %138 = vector.extract_strided_slice %117 {offsets = [2, 0], sizes = [1, 128], strides = [1, 1]} : vector<8x128xf32> to vector<1x128xf32>
    %c4_68 = arith.constant 4 : index
    %c0_69 = arith.constant 0 : index
    %139 = vector.load %arg5[%c4_68, %c0_69] : memref<16x128xf32, #tpu.memory_space<vmem>>, vector<1x128xf32>
    tpu.vector_store %arg5[%c4_68, %c0_69], %138 {strides = array<i32>} : memref<16x128xf32, #tpu.memory_space<vmem>>, vector<1x128xf32>,
    %140 = vector.extract_strided_slice %129 {offsets = [2, 0], sizes = [1, 128], strides = [1, 1]} : vector<8x128xf32> to vector<1x128xf32>
    %c5_70 = arith.constant 5 : index
    %c0_71 = arith.constant 0 : index
    %141 = vector.load %arg5[%c5_70, %c0_71] : memref<16x128xf32, #tpu.memory_space<vmem>>, vector<1x128xf32>
    tpu.vector_store %arg5[%c5_70, %c0_71], %140 {strides = array<i32>} : memref<16x128xf32, #tpu.memory_space<vmem>>, vector<1x128xf32>,
    %142 = vector.extract_strided_slice %117 {offsets = [3, 0], sizes = [1, 128], strides = [1, 1]} : vector<8x128xf32> to vector<1x128xf32>
    %c6_72 = arith.constant 6 : index
    %c0_73 = arith.constant 0 : index
    %143 = vector.load %arg5[%c6_72, %c0_73] : memref<16x128xf32, #tpu.memory_space<vmem>>, vector<1x128xf32>
    tpu.vector_store %arg5[%c6_72, %c0_73], %142 {strides = array<i32>} : memref<16x128xf32, #tpu.memory_space<vmem>>, vector<1x128xf32>,
    %144 = vector.extract_strided_slice %129 {offsets = [3, 0], sizes = [1, 128], strides = [1, 1]} : vector<8x128xf32> to vector<1x128xf32>
    %c7 = arith.constant 7 : index
    %c0_74 = arith.constant 0 : index
    %145 = vector.load %arg5[%c7, %c0_74] : memref<16x128xf32, #tpu.memory_space<vmem>>, vector<1x128xf32>
    tpu.vector_store %arg5[%c7, %c0_74], %144 {strides = array<i32>} : memref<16x128xf32, #tpu.memory_space<vmem>>, vector<1x128xf32>,
    %146 = vector.extract_strided_slice %117 {offsets = [4, 0], sizes = [1, 128], strides = [1, 1]} : vector<8x128xf32> to vector<1x128xf32>
    %c8 = arith.constant 8 : index
    %c0_75 = arith.constant 0 : index
    %147 = vector.load %arg5[%c8, %c0_75] : memref<16x128xf32, #tpu.memory_space<vmem>>, vector<1x128xf32>
    tpu.vector_store %arg5[%c8, %c0_75], %146 {strides = array<i32>} : memref<16x128xf32, #tpu.memory_space<vmem>>, vector<1x128xf32>,
    %148 = vector.extract_strided_slice %129 {offsets = [4, 0], sizes = [1, 128], strides = [1, 1]} : vector<8x128xf32> to vector<1x128xf32>
    %c9 = arith.constant 9 : index
    %c0_76 = arith.constant 0 : index
    %149 = vector.load %arg5[%c9, %c0_76] : memref<16x128xf32, #tpu.memory_space<vmem>>, vector<1x128xf32>
    tpu.vector_store %arg5[%c9, %c0_76], %148 {strides = array<i32>} : memref<16x128xf32, #tpu.memory_space<vmem>>, vector<1x128xf32>,
    %150 = vector.extract_strided_slice %117 {offsets = [5, 0], sizes = [1, 128], strides = [1, 1]} : vector<8x128xf32> to vector<1x128xf32>
    %c10 = arith.constant 10 : index
    %c0_77 = arith.constant 0 : index
    %151 = vector.load %arg5[%c10, %c0_77] : memref<16x128xf32, #tpu.memory_space<vmem>>, vector<1x128xf32>
    tpu.vector_store %arg5[%c10, %c0_77], %150 {strides = array<i32>} : memref<16x128xf32, #tpu.memory_space<vmem>>, vector<1x128xf32>,
    %152 = vector.extract_strided_slice %129 {offsets = [5, 0], sizes = [1, 128], strides = [1, 1]} : vector<8x128xf32> to vector<1x128xf32>
    %c11 = arith.constant 11 : index
    %c0_78 = arith.constant 0 : index
    %153 = vector.load %arg5[%c11, %c0_78] : memref<16x128xf32, #tpu.memory_space<vmem>>, vector<1x128xf32>
    tpu.vector_store %arg5[%c11, %c0_78], %152 {strides = array<i32>} : memref<16x128xf32, #tpu.memory_space<vmem>>, vector<1x128xf32>,
    %154 = vector.extract_strided_slice %117 {offsets = [6, 0], sizes = [1, 128], strides = [1, 1]} : vector<8x128xf32> to vector<1x128xf32>
    %c12 = arith.constant 12 : index
    %c0_79 = arith.constant 0 : index
    %155 = vector.load %arg5[%c12, %c0_79] : memref<16x128xf32, #tpu.memory_space<vmem>>, vector<1x128xf32>
    tpu.vector_store %arg5[%c12, %c0_79], %154 {strides = array<i32>} : memref<16x128xf32, #tpu.memory_space<vmem>>, vector<1x128xf32>,
    %156 = vector.extract_strided_slice %129 {offsets = [6, 0], sizes = [1, 128], strides = [1, 1]} : vector<8x128xf32> to vector<1x128xf32>
    %c13 = arith.constant 13 : index
    %c0_80 = arith.constant 0 : index
    %157 = vector.load %arg5[%c13, %c0_80] : memref<16x128xf32, #tpu.memory_space<vmem>>, vector<1x128xf32>
    tpu.vector_store %arg5[%c13, %c0_80], %156 {strides = array<i32>} : memref<16x128xf32, #tpu.memory_space<vmem>>, vector<1x128xf32>,
    %158 = vector.extract_strided_slice %117 {offsets = [7, 0], sizes = [1, 128], strides = [1, 1]} : vector<8x128xf32> to vector<1x128xf32>
    %c14 = arith.constant 14 : index
    %c0_81 = arith.constant 0 : index
    %159 = vector.load %arg5[%c14, %c0_81] : memref<16x128xf32, #tpu.memory_space<vmem>>, vector<1x128xf32>
    tpu.vector_store %arg5[%c14, %c0_81], %158 {strides = array<i32>} : memref<16x128xf32, #tpu.memory_space<vmem>>, vector<1x128xf32>,
    %160 = vector.extract_strided_slice %129 {offsets = [7, 0], sizes = [1, 128], strides = [1, 1]} : vector<8x128xf32> to vector<1x128xf32>
    %c15 = arith.constant 15 : index
    %c0_82 = arith.constant 0 : index
    %161 = vector.load %arg5[%c15, %c0_82] : memref<16x128xf32, #tpu.memory_space<vmem>>, vector<1x128xf32>
    tpu.vector_store %arg5[%c15, %c0_82], %160 {strides = array<i32>} : memref<16x128xf32, #tpu.memory_space<vmem>>, vector<1x128xf32>,
    %c0_83 = arith.constant 0 : index
    %c0_84 = arith.constant 0 : index
    %162 = vector.load %arg5[%c0_83, %c0_84] : memref<16x128xf32, #tpu.memory_space<vmem>>, vector<16x128xf32>
    %cst_85 = arith.constant 0.000000e+00 : f32
    %163 = vector.broadcast %cst_85 : f32 to vector<16x128xf32>
    %164 = arith.maximumf %162, %163 : vector<16x128xf32>
    %cst_86 = arith.constant 0.000000e+00 : f32
    %165 = vector.broadcast %cst_86 : f32 to vector<2x128xf32>
    %166 = vector.extract_strided_slice %164 {offsets = [0, 0], sizes = [14, 128], strides = [1, 1]} : vector<16x128xf32> to vector<14x128xf32>
    %167 = tpu.concatenate %165, %166 in 0 : vector<2x128xf32>, vector<14x128xf32> -> vector<16x128xf32>
    %c2304 = arith.constant 2304 : index
    %c0_87 = arith.constant 0 : index
    %168 = vector.load %arg2[%c2304, %c0_87] : memref<4480x128xbf16, #tpu.memory_space<vmem>>, vector<128x128xbf16>
    %169 = arith.truncf %167 : vector<16x128xf32> to vector<16x128xbf16>
    %cst_88 = arith.constant dense<0.000000e+00> : vector<16x128xf32>
    %170 = tpu.matmul %169, %168, %cst_88 {dimension_numbers = #tpu.dot_dimension_numbers<[1], [0], [0], [1], [0, 0, 1, 1], [], []>} : vector<16x128xbf16>, vector<128x128xbf16>, vector<16x128xf32> -> vector<16x128xf32>
    %c2432 = arith.constant 2432 : index
    %c0_89 = arith.constant 0 : index
    %171 = vector.load %arg2[%c2432, %c0_89] : memref<4480x128xbf16, #tpu.memory_space<vmem>>, vector<128x128xbf16>
    %172 = arith.truncf %164 : vector<16x128xf32> to vector<16x128xbf16>
    %cst_90 = arith.constant dense<0.000000e+00> : vector<16x128xf32>
    %173 = tpu.matmul %172, %171, %cst_90 {dimension_numbers = #tpu.dot_dimension_numbers<[1], [0], [0], [1], [0, 0, 1, 1], [], []>} : vector<16x128xbf16>, vector<128x128xbf16>, vector<16x128xf32> -> vector<16x128xf32>
    %174 = arith.addf %170, %173 : vector<16x128xf32>
    %cst_91 = arith.constant 0.000000e+00 : f32
    %175 = vector.broadcast %cst_91 : f32 to vector<2x128xf32>
    %176 = vector.extract_strided_slice %164 {offsets = [2, 0], sizes = [14, 128], strides = [1, 1]} : vector<16x128xf32> to vector<14x128xf32>
    %177 = tpu.concatenate %176, %175 in 0 : vector<14x128xf32>, vector<2x128xf32> -> vector<16x128xf32>
    %c2560 = arith.constant 2560 : index
    %c0_92 = arith.constant 0 : index
    %178 = vector.load %arg2[%c2560, %c0_92] : memref<4480x128xbf16, #tpu.memory_space<vmem>>, vector<128x128xbf16>
    %179 = arith.truncf %177 : vector<16x128xf32> to vector<16x128xbf16>
    %cst_93 = arith.constant dense<0.000000e+00> : vector<16x128xf32>
    %180 = tpu.matmul %179, %178, %cst_93 {dimension_numbers = #tpu.dot_dimension_numbers<[1], [0], [0], [1], [0, 0, 1, 1], [], []>} : vector<16x128xbf16>, vector<128x128xbf16>, vector<16x128xf32> -> vector<16x128xf32>
    %181 = arith.addf %174, %180 : vector<16x128xf32>
    %c7_94 = arith.constant 7 : index
    %c0_95 = arith.constant 0 : index
    %182 = vector.load %arg3[%c7_94, %c0_95] : memref<16x128xf32, #tpu.memory_space<vmem>>, vector<1x128xf32>
    %183 = vector.broadcast %182 : vector<1x128xf32> to vector<16x128xf32>
    %184 = arith.addf %181, %183 : vector<16x128xf32>
    %cst_96 = arith.constant 0.000000e+00 : f32
    %185 = vector.broadcast %cst_96 : f32 to vector<16x128xf32>
    %186 = arith.maximumf %184, %185 : vector<16x128xf32>
    %c2688 = arith.constant 2688 : index
    %c0_97 = arith.constant 0 : index
    %187 = vector.load %arg2[%c2688, %c0_97] : memref<4480x128xbf16, #tpu.memory_space<vmem>>, vector<128x128xbf16>
    %188 = arith.truncf %186 : vector<16x128xf32> to vector<16x128xbf16>
    %cst_98 = arith.constant dense<0.000000e+00> : vector<16x128xf32>
    %189 = tpu.matmul %188, %187, %cst_98 {dimension_numbers = #tpu.dot_dimension_numbers<[1], [0], [0], [1], [0, 0, 1, 1], [], []>} : vector<16x128xbf16>, vector<128x128xbf16>, vector<16x128xf32> -> vector<16x128xf32>
    %c8_99 = arith.constant 8 : index
    %c0_100 = arith.constant 0 : index
    %190 = vector.load %arg3[%c8_99, %c0_100] : memref<16x128xf32, #tpu.memory_space<vmem>>, vector<1x128xf32>
    %191 = vector.broadcast %190 : vector<1x128xf32> to vector<16x128xf32>
    %192 = arith.addf %189, %191 : vector<16x128xf32>
    %193 = arith.addf %192, %162 : vector<16x128xf32>
    %cst_101 = arith.constant 0.000000e+00 : f32
    %194 = vector.broadcast %cst_101 : f32 to vector<16x128xf32>
    %195 = arith.maximumf %193, %194 : vector<16x128xf32>
    %cst_102 = arith.constant 0.000000e+00 : f32
    %196 = vector.broadcast %cst_102 : f32 to vector<1x128xf32>
    %197 = vector.extract_strided_slice %195 {offsets = [0, 0], sizes = [15, 128], strides = [1, 1]} : vector<16x128xf32> to vector<15x128xf32>
    %198 = tpu.concatenate %196, %197 in 0 : vector<1x128xf32>, vector<15x128xf32> -> vector<16x128xf32>
    %c2816 = arith.constant 2816 : index
    %c0_103 = arith.constant 0 : index
    %199 = vector.load %arg2[%c2816, %c0_103] : memref<4480x128xbf16, #tpu.memory_space<vmem>>, vector<128x128xbf16>
    %200 = arith.truncf %198 : vector<16x128xf32> to vector<16x128xbf16>
    %cst_104 = arith.constant dense<0.000000e+00> : vector<16x128xf32>
    %201 = tpu.matmul %200, %199, %cst_104 {dimension_numbers = #tpu.dot_dimension_numbers<[1], [0], [0], [1], [0, 0, 1, 1], [], []>} : vector<16x128xbf16>, vector<128x128xbf16>, vector<16x128xf32> -> vector<16x128xf32>
    %c2944 = arith.constant 2944 : index
    %c0_105 = arith.constant 0 : index
    %202 = vector.load %arg2[%c2944, %c0_105] : memref<4480x128xbf16, #tpu.memory_space<vmem>>, vector<128x128xbf16>
    %203 = arith.truncf %195 : vector<16x128xf32> to vector<16x128xbf16>
    %cst_106 = arith.constant dense<0.000000e+00> : vector<16x128xf32>
    %204 = tpu.matmul %203, %202, %cst_106 {dimension_numbers = #tpu.dot_dimension_numbers<[1], [0], [0], [1], [0, 0, 1, 1], [], []>} : vector<16x128xbf16>, vector<128x128xbf16>, vector<16x128xf32> -> vector<16x128xf32>
    %205 = arith.addf %201, %204 : vector<16x128xf32>
    %cst_107 = arith.constant 0.000000e+00 : f32
    %206 = vector.broadcast %cst_107 : f32 to vector<1x128xf32>
    %207 = vector.extract_strided_slice %195 {offsets = [1, 0], sizes = [15, 128], strides = [1, 1]} : vector<16x128xf32> to vector<15x128xf32>
    %208 = tpu.concatenate %207, %206 in 0 : vector<15x128xf32>, vector<1x128xf32> -> vector<16x128xf32>
    %c3072 = arith.constant 3072 : index
    %c0_108 = arith.constant 0 : index
    %209 = vector.load %arg2[%c3072, %c0_108] : memref<4480x128xbf16, #tpu.memory_space<vmem>>, vector<128x128xbf16>
    %210 = arith.truncf %208 : vector<16x128xf32> to vector<16x128xbf16>
    %cst_109 = arith.constant dense<0.000000e+00> : vector<16x128xf32>
    %211 = tpu.matmul %210, %209, %cst_109 {dimension_numbers = #tpu.dot_dimension_numbers<[1], [0], [0], [1], [0, 0, 1, 1], [], []>} : vector<16x128xbf16>, vector<128x128xbf16>, vector<16x128xf32> -> vector<16x128xf32>
    %212 = arith.addf %205, %211 : vector<16x128xf32>
    %c9_110 = arith.constant 9 : index
    %c0_111 = arith.constant 0 : index
    %213 = vector.load %arg3[%c9_110, %c0_111] : memref<16x128xf32, #tpu.memory_space<vmem>>, vector<1x128xf32>
    %214 = vector.broadcast %213 : vector<1x128xf32> to vector<16x128xf32>
    %215 = arith.addf %212, %214 : vector<16x128xf32>
    %cst_112 = arith.constant 0.000000e+00 : f32
    %216 = vector.broadcast %cst_112 : f32 to vector<16x128xf32>
    %217 = arith.maximumf %215, %216 : vector<16x128xf32>
    %c3200 = arith.constant 3200 : index
    %c0_113 = arith.constant 0 : index
    %218 = vector.load %arg2[%c3200, %c0_113] : memref<4480x128xbf16, #tpu.memory_space<vmem>>, vector<128x128xbf16>
    %219 = arith.truncf %217 : vector<16x128xf32> to vector<16x128xbf16>
    %cst_114 = arith.constant dense<0.000000e+00> : vector<16x128xf32>
    %220 = tpu.matmul %219, %218, %cst_114 {dimension_numbers = #tpu.dot_dimension_numbers<[1], [0], [0], [1], [0, 0, 1, 1], [], []>} : vector<16x128xbf16>, vector<128x128xbf16>, vector<16x128xf32> -> vector<16x128xf32>
    %c10_115 = arith.constant 10 : index
    %c0_116 = arith.constant 0 : index
    %221 = vector.load %arg3[%c10_115, %c0_116] : memref<16x128xf32, #tpu.memory_space<vmem>>, vector<1x128xf32>
    %222 = vector.broadcast %221 : vector<1x128xf32> to vector<16x128xf32>
    %223 = arith.addf %220, %222 : vector<16x128xf32>
    %224 = arith.addf %223, %193 : vector<16x128xf32>
    %cst_117 = arith.constant 0.000000e+00 : f32
    %225 = vector.broadcast %cst_117 : f32 to vector<1x128xf32>
    %226 = vector.extract_strided_slice %224 {offsets = [0, 0], sizes = [15, 128], strides = [1, 1]} : vector<16x128xf32> to vector<15x128xf32>
    %227 = tpu.concatenate %225, %226 in 0 : vector<1x128xf32>, vector<15x128xf32> -> vector<16x128xf32>
    %c3328 = arith.constant 3328 : index
    %c0_118 = arith.constant 0 : index
    %228 = vector.load %arg2[%c3328, %c0_118] : memref<4480x128xbf16, #tpu.memory_space<vmem>>, vector<128x128xbf16>
    %229 = arith.truncf %227 : vector<16x128xf32> to vector<16x128xbf16>
    %cst_119 = arith.constant dense<0.000000e+00> : vector<16x128xf32>
    %230 = tpu.matmul %229, %228, %cst_119 {dimension_numbers = #tpu.dot_dimension_numbers<[1], [0], [0], [1], [0, 0, 1, 1], [], []>} : vector<16x128xbf16>, vector<128x128xbf16>, vector<16x128xf32> -> vector<16x128xf32>
    %c3456 = arith.constant 3456 : index
    %c0_120 = arith.constant 0 : index
    %231 = vector.load %arg2[%c3456, %c0_120] : memref<4480x128xbf16, #tpu.memory_space<vmem>>, vector<128x128xbf16>
    %232 = arith.truncf %224 : vector<16x128xf32> to vector<16x128xbf16>
    %cst_121 = arith.constant dense<0.000000e+00> : vector<16x128xf32>
    %233 = tpu.matmul %232, %231, %cst_121 {dimension_numbers = #tpu.dot_dimension_numbers<[1], [0], [0], [1], [0, 0, 1, 1], [], []>} : vector<16x128xbf16>, vector<128x128xbf16>, vector<16x128xf32> -> vector<16x128xf32>
    %234 = arith.addf %230, %233 : vector<16x128xf32>
    %cst_122 = arith.constant 0.000000e+00 : f32
    %235 = vector.broadcast %cst_122 : f32 to vector<1x128xf32>
    %236 = vector.extract_strided_slice %224 {offsets = [1, 0], sizes = [15, 128], strides = [1, 1]} : vector<16x128xf32> to vector<15x128xf32>
    %237 = tpu.concatenate %236, %235 in 0 : vector<15x128xf32>, vector<1x128xf32> -> vector<16x128xf32>
    %c3584 = arith.constant 3584 : index
    %c0_123 = arith.constant 0 : index
    %238 = vector.load %arg2[%c3584, %c0_123] : memref<4480x128xbf16, #tpu.memory_space<vmem>>, vector<128x128xbf16>
    %239 = arith.truncf %237 : vector<16x128xf32> to vector<16x128xbf16>
    %cst_124 = arith.constant dense<0.000000e+00> : vector<16x128xf32>
    %240 = tpu.matmul %239, %238, %cst_124 {dimension_numbers = #tpu.dot_dimension_numbers<[1], [0], [0], [1], [0, 0, 1, 1], [], []>} : vector<16x128xbf16>, vector<128x128xbf16>, vector<16x128xf32> -> vector<16x128xf32>
    %241 = arith.addf %234, %240 : vector<16x128xf32>
    %c11_125 = arith.constant 11 : index
    %c0_126 = arith.constant 0 : index
    %242 = vector.load %arg3[%c11_125, %c0_126] : memref<16x128xf32, #tpu.memory_space<vmem>>, vector<1x128xf32>
    %243 = vector.broadcast %242 : vector<1x128xf32> to vector<16x128xf32>
    %244 = arith.addf %241, %243 : vector<16x128xf32>
    %cst_127 = arith.constant 0.000000e+00 : f32
    %245 = vector.broadcast %cst_127 : f32 to vector<1x128xf32>
    %246 = vector.extract_strided_slice %244 {offsets = [0, 0], sizes = [15, 128], strides = [1, 1]} : vector<16x128xf32> to vector<15x128xf32>
    %247 = tpu.concatenate %245, %246 in 0 : vector<1x128xf32>, vector<15x128xf32> -> vector<16x128xf32>
    %c3712 = arith.constant 3712 : index
    %c0_128 = arith.constant 0 : index
    %248 = vector.load %arg2[%c3712, %c0_128] : memref<4480x128xbf16, #tpu.memory_space<vmem>>, vector<128x128xbf16>
    %249 = arith.truncf %247 : vector<16x128xf32> to vector<16x128xbf16>
    %cst_129 = arith.constant dense<0.000000e+00> : vector<16x128xf32>
    %250 = tpu.matmul %249, %248, %cst_129 {dimension_numbers = #tpu.dot_dimension_numbers<[1], [0], [0], [1], [0, 0, 1, 1], [], []>} : vector<16x128xbf16>, vector<128x128xbf16>, vector<16x128xf32> -> vector<16x128xf32>
    %c3840 = arith.constant 3840 : index
    %c0_130 = arith.constant 0 : index
    %251 = vector.load %arg2[%c3840, %c0_130] : memref<4480x128xbf16, #tpu.memory_space<vmem>>, vector<128x128xbf16>
    %252 = arith.truncf %244 : vector<16x128xf32> to vector<16x128xbf16>
    %cst_131 = arith.constant dense<0.000000e+00> : vector<16x128xf32>
    %253 = tpu.matmul %252, %251, %cst_131 {dimension_numbers = #tpu.dot_dimension_numbers<[1], [0], [0], [1], [0, 0, 1, 1], [], []>} : vector<16x128xbf16>, vector<128x128xbf16>, vector<16x128xf32> -> vector<16x128xf32>
    %254 = arith.addf %250, %253 : vector<16x128xf32>
    %cst_132 = arith.constant 0.000000e+00 : f32
    %255 = vector.broadcast %cst_132 : f32 to vector<1x128xf32>
    %256 = vector.extract_strided_slice %244 {offsets = [1, 0], sizes = [15, 128], strides = [1, 1]} : vector<16x128xf32> to vector<15x128xf32>
    %257 = tpu.concatenate %256, %255 in 0 : vector<15x128xf32>, vector<1x128xf32> -> vector<16x128xf32>
    %c3968 = arith.constant 3968 : index
    %c0_133 = arith.constant 0 : index
    %258 = vector.load %arg2[%c3968, %c0_133] : memref<4480x128xbf16, #tpu.memory_space<vmem>>, vector<128x128xbf16>
    %259 = arith.truncf %257 : vector<16x128xf32> to vector<16x128xbf16>
    %cst_134 = arith.constant dense<0.000000e+00> : vector<16x128xf32>
    %260 = tpu.matmul %259, %258, %cst_134 {dimension_numbers = #tpu.dot_dimension_numbers<[1], [0], [0], [1], [0, 0, 1, 1], [], []>} : vector<16x128xbf16>, vector<128x128xbf16>, vector<16x128xf32> -> vector<16x128xf32>
    %261 = arith.addf %254, %260 : vector<16x128xf32>
    %c12_135 = arith.constant 12 : index
    %c0_136 = arith.constant 0 : index
    %262 = vector.load %arg3[%c12_135, %c0_136] : memref<16x128xf32, #tpu.memory_space<vmem>>, vector<1x128xf32>
    %263 = vector.broadcast %262 : vector<1x128xf32> to vector<16x128xf32>
    %264 = arith.addf %261, %263 : vector<16x128xf32>
    %cst_137 = arith.constant 0.000000e+00 : f32
    %265 = vector.broadcast %cst_137 : f32 to vector<16x128xf32>
    %266 = arith.maximumf %264, %265 : vector<16x128xf32>
    %cst_138 = arith.constant 0.000000e+00 : f32
    %267 = vector.broadcast %cst_138 : f32 to vector<1x128xf32>
    %268 = vector.extract_strided_slice %266 {offsets = [0, 0], sizes = [15, 128], strides = [1, 1]} : vector<16x128xf32> to vector<15x128xf32>
    %269 = tpu.concatenate %267, %268 in 0 : vector<1x128xf32>, vector<15x128xf32> -> vector<16x128xf32>
    %c4096 = arith.constant 4096 : index
    %c0_139 = arith.constant 0 : index
    %270 = vector.load %arg2[%c4096, %c0_139] : memref<4480x128xbf16, #tpu.memory_space<vmem>>, vector<128x128xbf16>
    %271 = arith.truncf %269 : vector<16x128xf32> to vector<16x128xbf16>
    %cst_140 = arith.constant dense<0.000000e+00> : vector<16x128xf32>
    %272 = tpu.matmul %271, %270, %cst_140 {dimension_numbers = #tpu.dot_dimension_numbers<[1], [0], [0], [1], [0, 0, 1, 1], [], []>} : vector<16x128xbf16>, vector<128x128xbf16>, vector<16x128xf32> -> vector<16x128xf32>
    %c4224 = arith.constant 4224 : index
    %c0_141 = arith.constant 0 : index
    %273 = vector.load %arg2[%c4224, %c0_141] : memref<4480x128xbf16, #tpu.memory_space<vmem>>, vector<128x128xbf16>
    %274 = arith.truncf %266 : vector<16x128xf32> to vector<16x128xbf16>
    %cst_142 = arith.constant dense<0.000000e+00> : vector<16x128xf32>
    %275 = tpu.matmul %274, %273, %cst_142 {dimension_numbers = #tpu.dot_dimension_numbers<[1], [0], [0], [1], [0, 0, 1, 1], [], []>} : vector<16x128xbf16>, vector<128x128xbf16>, vector<16x128xf32> -> vector<16x128xf32>
    %276 = arith.addf %272, %275 : vector<16x128xf32>
    %cst_143 = arith.constant 0.000000e+00 : f32
    %277 = vector.broadcast %cst_143 : f32 to vector<1x128xf32>
    %278 = vector.extract_strided_slice %266 {offsets = [1, 0], sizes = [15, 128], strides = [1, 1]} : vector<16x128xf32> to vector<15x128xf32>
    %279 = tpu.concatenate %278, %277 in 0 : vector<15x128xf32>, vector<1x128xf32> -> vector<16x128xf32>
    %c4352 = arith.constant 4352 : index
    %c0_144 = arith.constant 0 : index
    %280 = vector.load %arg2[%c4352, %c0_144] : memref<4480x128xbf16, #tpu.memory_space<vmem>>, vector<128x128xbf16>
    %281 = arith.truncf %279 : vector<16x128xf32> to vector<16x128xbf16>
    %cst_145 = arith.constant dense<0.000000e+00> : vector<16x128xf32>
    %282 = tpu.matmul %281, %280, %cst_145 {dimension_numbers = #tpu.dot_dimension_numbers<[1], [0], [0], [1], [0, 0, 1, 1], [], []>} : vector<16x128xbf16>, vector<128x128xbf16>, vector<16x128xf32> -> vector<16x128xf32>
    %283 = arith.addf %276, %282 : vector<16x128xf32>
    %c13_146 = arith.constant 13 : index
    %c0_147 = arith.constant 0 : index
    %284 = vector.load %arg3[%c13_146, %c0_147] : memref<16x128xf32, #tpu.memory_space<vmem>>, vector<1x128xf32>
    %285 = vector.broadcast %284 : vector<1x128xf32> to vector<16x128xf32>
    %286 = arith.addf %283, %285 : vector<16x128xf32>
    %c0_148 = arith.constant 0 : index
    %c0_149 = arith.constant 0 : index
    %287 = vector.load %arg4[%c0_148, %c0_149] : memref<16x128xf32, #tpu.memory_space<vmem>>, vector<16x128xf32>
    tpu.vector_store %arg4[%c0_148, %c0_149], %286 {strides = array<i32>} : memref<16x128xf32, #tpu.memory_space<vmem>>, vector<16x128xf32>,
    return
  }
  func.func @transform_0(%arg0: i32) -> (i32, i32) {
    %c0_i32 = arith.constant 0 : i32
    %c0_i32_0 = arith.constant 0 : i32
    return %arg0, %c0_i32 : i32, i32
  }
  func.func @transform_1(%arg0: i32) -> (i32, i32) {
    %c0_i32 = arith.constant 0 : i32
    %c0_i32_0 = arith.constant 0 : i32
    %c0_i32_1 = arith.constant 0 : i32
    return %c0_i32, %c0_i32_0 : i32, i32
  }
  func.func @transform_2(%arg0: i32) -> (i32, i32) {
    %c0_i32 = arith.constant 0 : i32
    %c0_i32_0 = arith.constant 0 : i32
    %c0_i32_1 = arith.constant 0 : i32
    return %c0_i32, %c0_i32_0 : i32, i32
  }
  func.func @transform_3(%arg0: i32) -> (i32, i32) {
    %c0_i32 = arith.constant 0 : i32
    %c0_i32_0 = arith.constant 0 : i32
    return %arg0, %c0_i32 : i32, i32
  }
}

</mosaic_0001>

<bundles_post_ra>
// kernel: tpu_custom_call.1
= control target key start
LH: loop header
LB: loop body
LE: loop exit
PB: predicated region body
PF: predicated region fallthrough
CT: control target
= control target key end

     0   :  { %6 = vsyncpa [#allocation3], 0  ;;  %s125_s0 = inlined_call_operand.hbm [shape: f32[8,128], index: 0, kind: input, shape index: {}]   ;;  %s126_s1 = inlined_call_operand.hbm [shape: f32[8,128], index: 1, kind: output, shape index: {}]  }
   0x1   :  { %7 = vsyncpa [#allocation4], 0  ;;  %s89_s6 = smov [#allocation2]   ;;  %s41_s10 = scalar_lea.hbm %s125_s0, 128 }
   0x2   :  { %s14_s7 = sshll.u32 %s89_s6, 4  ;;  %p42_p0 = scmp.ne.s32.totalorder %s125_s0, %s41_s10  ;;  %s15_s7 = int_to_ptr.vmem [resolvable:$true] %s14_s7 }
   0x3   :  { %p45_p1 = scmp.lt.u32.totalorder %s41_s10, %s125_s0 }
   0x5   :  { %p47_p2 = pnand %p45_p1, %p42_p0 }
   0x7   :  { %50 = shalt.err (!%p47_p2)
}
   0x8   :  { %s51_s15 = scalar_lea.vmem %s15_s7, 128  ;;  %p56_p4 = scmp.lt.s32.totalorder %s15_s7, %s15_s7 }
   0x9   :  { %p52_p3 = scmp.ne.s32.totalorder %s15_s7, %s51_s15  ;;  %p57_p5 = scmp.lt.s32.totalorder %s51_s15, %s51_s15 }
   0xb   :  { %p58_p6 = por %p57_p5, %p56_p4 }
   0xd   :  { %p59_p7 = pnand %p58_p6, %p52_p3 }
   0xf   :  { %62 = shalt.err (!%p59_p7)
}
  0x10   :  { %17 = dma.hbm_to_vmem [thread:$0]  %s125_s0, 128, %s15_s7, [#allocation3]  }
  0x11   :  { %85 = dma.done.wait [#allocation3], 128  }
  0x12   :  { %86 = vsyncadd [#allocation3], 4294967168  ;;  %s90_s18 = smov [#allocation5]   ;;  %v21_v0 = vld [vmem:[#allocation2] sm:$0xff] }
  0x13   :  { %s30_s19 = sshll.u32 %s90_s18, 4  ;;  %v22_v1 = vrot.slane %v21_v0, 7  ;;  %s31_s19 = int_to_ptr.vmem [resolvable:$true] %s30_s19 }
  0x14   :  { %s63_s20 = scalar_lea.vmem %s31_s19, 128  ;;  %p68_p9 = scmp.lt.s32.totalorder %s31_s19, %s31_s19 }
  0x15   :  { %23 = vst [vmem:[#allocation5] sm:$0xff] %v22_v1  ;;  %p64_p8 = scmp.ne.s32.totalorder %s31_s19, %s63_s20  ;;  %p69_p10 = scmp.lt.s32.totalorder %s63_s20, %s63_s20 }
  0x17   :  { %p70_p11 = por %p69_p10, %p68_p9 }
  0x19   :  { %p71_p12 = pnand %p70_p11, %p64_p8 }
  0x1b   :  { %74 = shalt.err (!%p71_p12)
}
  0x1c   :  { %s75_s23 = scalar_lea.hbm %s126_s1, 128 }
  0x1d   :  { %p76_p13 = scmp.ne.s32.totalorder %s126_s1, %s75_s23  ;;  %p79_p0 = scmp.lt.u32.totalorder %s75_s23, %s126_s1 }
  0x1f   :  { %p81_p1 = pnand %p79_p0, %p76_p13 }
  0x21   :  { %84 = shalt.err (!%p81_p1)
}
  0x22   :  { %33 = dma.vmem_to_hbm [thread:$0]  %s31_s19, 128, %s126_s1, [#allocation4]  }
  0x23   :  { %87 = dma.done.wait [#allocation4], 128  }
  0x24   :  { %88 = vsyncadd [#allocation4], 4294967168 }
  0x25   :  { %37 = vsyncpa [#allocation3], 1 }
  0x26   :  { %38 = vsyncpa [#allocation4], 1 }

// kernel: tpu_custom_call.1
= control target key start
LH: loop header
LB: loop body
LE: loop exit
PB: predicated region body
PF: predicated region fallthrough
CT: control target
= control target key end

     0   :  { %6 = vsyncpa [#allocation3], 0  ;;  %s138_s0 = inlined_call_operand.hbm [shape: f32[8,128], index: 0, kind: input, shape index: {}]   ;;  %s139_s1 = inlined_call_operand.hbm [shape: f32[16,128], index: 1, kind: output, shape index: {}]  }
   0x1   :  { %7 = vsyncpa [#allocation4], 0  ;;  %s99_s6 = smov [#allocation2]   ;;  %s51_s10 = scalar_lea.hbm %s138_s0, 128 }
   0x2   :  { %s14_s7 = sshll.u32 %s99_s6, 4  ;;  %p52_p0 = scmp.ne.s32.totalorder %s138_s0, %s51_s10  ;;  %s15_s7 = int_to_ptr.vmem [resolvable:$true] %s14_s7 }
   0x3   :  { %p55_p1 = scmp.lt.u32.totalorder %s51_s10, %s138_s0 }
   0x5   :  { %p57_p2 = pnand %p55_p1, %p52_p0 }
   0x7   :  { %60 = shalt.err (!%p57_p2)
}
   0x8   :  { %s61_s15 = scalar_lea.vmem %s15_s7, 128  ;;  %p66_p4 = scmp.lt.s32.totalorder %s15_s7, %s15_s7 }
   0x9   :  { %p62_p3 = scmp.ne.s32.totalorder %s15_s7, %s61_s15  ;;  %p67_p5 = scmp.lt.s32.totalorder %s61_s15, %s61_s15 }
   0xb   :  { %p68_p6 = por %p67_p5, %p66_p4 }
   0xd   :  { %p69_p7 = pnand %p68_p6, %p62_p3 }
   0xf   :  { %72 = shalt.err (!%p69_p7)
}
  0x10   :  { %17 = dma.hbm_to_vmem [thread:$0]  %s138_s0, 128, %s15_s7, [#allocation3]  }
  0x11   :  { %95 = dma.done.wait [#allocation3], 128  }
  0x12   :  { %96 = vsyncadd [#allocation3], 4294967168  ;;  %v100_v0 = vmov 0.0   ;;  %s101_s18 = smov [#allocation5]   ;;  %v23_v1 = vld [vmem:[#allocation2] sm:$0xff] }
  0x13   :  { %21 = vst [vmem:[#allocation5] sm:$0xff] %v100_v0  ;;  %22 = vst [vmem:[#allocation5 + $0x8] sm:$0xff] %v100_v0  ;;  %s34_s19 = sshll.u32 %s101_s18, 4  ;;  %v26_v2 = vadd.f32 1.0, %v23_v1  ;;  %s35_s19 = int_to_ptr.vmem [resolvable:$true] %s34_s19 }
  0x14   :  { %24 = vst [vmem:[#allocation5] ss:$2 sm:$0xff] %v23_v1  ;;  %s73_s20 = scalar_lea.vmem %s35_s19, 256  ;;  %p78_p9 = scmp.lt.s32.totalorder %s35_s19, %s35_s19 }
  0x15   :  { %28 = vst [vmem:[#allocation5 + $0x1] ss:$2 sm:$0xff] %v26_v2  ;;  %p74_p8 = scmp.ne.s32.totalorder %s35_s19, %s73_s20  ;;  %p79_p10 = scmp.lt.s32.totalorder %s73_s20, %s73_s20 }
  0x17   :  { %p80_p11 = por %p79_p10, %p78_p9 }
  0x19   :  { %p81_p12 = pnand %p80_p11, %p74_p8 }
  0x1b   :  { %84 = shalt.err (!%p81_p12)
}
  0x1c   :  { %s85_s22 = scalar_lea.hbm %s139_s1, 256 }
  0x1d   :  { %p86_p13 = scmp.ne.s32.totalorder %s139_s1, %s85_s22  ;;  %p89_p0 = scmp.lt.u32.totalorder %s85_s22, %s139_s1 }
  0x1f   :  { %p91_p1 = pnand %p89_p0, %p86_p13 }
  0x21   :  { %94 = shalt.err (!%p91_p1)
}
  0x22   :  { %s102_s27 = smov 128   ;;  %s103_s28 = smov 8  }
  0x23   :  { %40 = dma.vmem_to_hbm [thread:$0]  %s35_s19, 256, %s139_s1, [#allocation4], %s102_s27, %s102_s27, %s103_s28  }
  0x24   :  { %97 = dma.done.wait [#allocation4], 256  }
  0x25   :  { %98 = vsyncadd [#allocation4], 4294967040 }
  0x26   :  { %44 = vsyncpa [#allocation3], 1 }
  0x27   :  { %45 = vsyncpa [#allocation4], 1 }

// kernel: forward.1
= control target key start
LH: loop header
LB: loop body
LE: loop exit
PB: predicated region body
PF: predicated region fallthrough
CT: control target
= control target key end

     0   :  { %8 = vsyncpa [#allocation4], 0  ;;  %s6914_s0 = inlined_call_operand.hbm [shape: f32[16,128], index: 0, kind: input, shape index: {}]   ;;  %s6915_s1 = inlined_call_operand.hbm [shape: bf16[4480,128], index: 1, kind: input, shape index: {}]   ;;  %s6916_s2 = inlined_call_operand.hbm [shape: f32[16,128], index: 2, kind: input, shape index: {}]   ;;  %s6917_s3 = inlined_call_operand.hbm [shape: f32[32,128], index: 3, kind: output, shape index: {}]  }
   0x1   :  { %10 = vsyncpa [#allocation4 + $0x1], 0 }
   0x2   :  { %11 = vsyncpa [#allocation7], 0 }
   0x3   :  { %12 = vsyncpa [#allocation5], 0 }
   0x4   :  { %14 = vsyncpa [#allocation5 + $0x1], 0  ;;  %s6214_s12 = smov 0   ;;  %s6216_s13 = smov 0  }
   0x5   :  { %s6218_s14 = smov 0   ;;  %s6220_s15 = smov 0  }
   0x6 LB: > { %s6235_s16 = sadd.s32 4294967295, %s6179_s15   ;;  %s4265_s17 = sadd.s32 4294967294, %s6179_s15   ;;  %s6179_s15 = sphi %s6220_s15, %s6949_s15   ;;  %s6175_s14 = sphi %s6218_s14, %s6948_s14   ;;  %s6171_s13 = sphi %s6216_s13, %s6947_s13   ;;  %s6167_s12 = sphi %s6214_s12, %s6946_s12  }
   0x7   : > { %p40_p0 = scmp.ne.s32.totalorder %s6171_s13, %s6167_s12  ;;  %p6918_p1 = scmp.eq.s32.totalorder %s6235_s16, 0 }
   0x8   : > { %p112_p3 = scmp.eq.s32.totalorder %s4265_s17, 1  ;;  %p4266_p5 = scmp.ge.s32.totalorder %s6179_s15, 1 }
   0x9   : > { %p6244_p4 = por %p6918_p1, %p40_p0  ;;  %p119_p7 = scmp.lt.s32.totalorder %s6179_s15, 3 }
   0xa   : > { %p6249_p6 = por %p112_p3, %p40_p0  ;;  %s6181_s21 = smov [#allocation6]  }
   0xb   : > { %s6921_s18 = scalar_select %p6244_p4, 1, 0 }
   0xc   : > { %s6922_s19 = scalar_select %p6249_p6, 1, 0 }
   0xd   : > { %p6254_p8 = pnand %p4266_p5, %p119_p7  ;;  %s131_s22 = sshll.u32 %s6181_s21, 4  ;;  %s6258_s22 = int_to_ptr.vmem [resolvable:$true] %s131_s22 }
   0xe   : > { %s6182_s24 = smov [#allocation8]   ;;  %s6023_s28 = scalar_lea.hbm %s6915_s1, 35840 }
   0xf   : > { %p5679_p9 = pneg %p6254_p8  ;;  %s144_s25 = sshll.u32 %s6182_s24, 4  ;;  %s6269_s25 = int_to_ptr.vmem [resolvable:$true] %s144_s25 }
  0x10   : > { %p6024_p12 = scmp.ne.s32.totalorder %s6915_s1, %s6023_s28  ;;  %p6030_p5 = scmp.lt.u32.totalorder %s6023_s28, %s6915_s1 }
  0x11   : > { %p6265_p11 = pnand %p5679_p9, %p6918_p1 }
  0x13   : > { %p6025_p13 = pneg %p6265_p11 }
  0x15   : > { %p6026_p0 = pnand %p6025_p13, %p6024_p12 }
  0x17   : > { %p6027_p3 = pneg %p6026_p0 }
  0x19   : > { %p6032_p7 = pnand %p6030_p5, %p6027_p3 }
  0x1b   : > { %6035 = shalt.err (!%p6032_p7)
}
  0x1c   : > { %s6036_s6 = scalar_lea.vmem %s6258_s22, 35840  ;;  %p6044_p2 = scmp.lt.s32.totalorder %s6258_s22, %s6258_s22 }
  0x1d   : > { %p6037_p9 = scmp.ne.s32.totalorder %s6258_s22, %s6036_s6  ;;  %p6045_p12 = scmp.lt.s32.totalorder %s6036_s6, %s6036_s6 }
  0x1f   : > { %p6039_p10 = pnand %p6037_p9, %p6025_p13  ;;  %p6046_p0 = por %p6045_p12, %p6044_p2 }
  0x21   : > { %p6040_p1 = pneg %p6039_p10 }
  0x23   : > { %p6047_p6 = pnand %p6046_p0, %p6040_p1 }
  0x25   : > { %6050 = shalt.err (!%p6047_p6)
}
  0x26   : > { %s6183_s7 = smov 64   ;;  %s6184_s8 = smov 4  }
  0x27   : > { %5682 = dma.hbm_to_vmem [thread:$0]  (!%p6265_p11), %s6915_s1, 35840, %s6258_s22, [#allocation7], %s6183_s7, %s6183_s7, %s6184_s8  }
  0x28   : > { %s6051_s21 = scalar_lea.hbm %s6916_s2, 256 }
  0x29   : > { %p6052_p2 = scmp.ne.s32.totalorder %s6916_s2, %s6051_s21  ;;  %p6058_p10 = scmp.lt.u32.totalorder %s6051_s21, %s6916_s2 }
  0x2b   : > { %p6054_p1 = pnand %p6052_p2, %p6025_p13 }
  0x2d   : > { %p6055_p6 = pneg %p6054_p1 }
  0x2f   : > { %p6060_p3 = pnand %p6058_p10, %p6055_p6 }
  0x31   : > { %6063 = shalt.err (!%p6060_p3)
}
  0x32   : > { %s6064_s22 = scalar_lea.vmem %s6269_s25, 256  ;;  %p6072_p12 = scmp.lt.s32.totalorder %s6269_s25, %s6269_s25 }
  0x33   : > { %p6065_p5 = scmp.ne.s32.totalorder %s6269_s25, %s6064_s22  ;;  %p6073_p0 = scmp.lt.s32.totalorder %s6064_s22, %s6064_s22 }
  0x35   : > { %p6067_p7 = pnand %p6065_p5, %p6025_p13  ;;  %p6074_p2 = por %p6073_p0, %p6072_p12 }
  0x37   : > { %p6068_p9 = pneg %p6067_p7 }
  0x39   : > { %p6075_p1 = pnand %p6074_p2, %p6068_p9 }
  0x3b   : > { %6078 = shalt.err (!%p6075_p1)
}
  0x3c   : > { %s6185_s29 = smov 128   ;;  %s6186_s30 = smov 8  }
  0x3d   : > { %5685 = dma.hbm_to_vmem [thread:$0]  (!%p6265_p11), %s6916_s2, 256, %s6269_s25, [#allocation7], %s6185_s29, %s6185_s29, %s6186_s30  }
  0x3e   : > { %s6324_s6 = sadd.s32 1, %s6179_s15   ;;  %s27_s8 = sadd.s32 1, %s6175_s14 }
  0x3f   : > { %s24_s7 = ssub.s32 %s6179_s15, %s6324_s6  ;;  %p34_p6 = scmp.ne.s32.totalorder %s6175_s14, %s6171_s13 }
  0x40   : > { %p25_p13 = scmp.eq.s32.totalorder %s24_s7, 0  ;;  %p35_p10 = scmp.eq.s32.totalorder %s6179_s15, 0 }
  0x41   : > { %p6925_p5 = scmp.eq.s32.totalorder %s6235_s16, 1  ;;  %p5696_p9 = scmp.lt.s32.totalorder %s6179_s15, 2 }
  0x42   : > { %s6333_s9 = scalar_select %p25_p13, %s6175_s14, %s27_s8  }
  0x43   : > { %p36_p3 = por %p35_p10, %p34_p6  ;;  %p6337_p7 = por %p6925_p5, %p34_p6 }
  0x44   : > { %s158_s23 = sand.u32 1, %s6175_s14   ;;  %s4271_s25 = sshll.u32 %s6179_s15, 7 }
  0x45   : > { %s6926_s10 = scalar_select %p6337_p7, 1, 0 }
  0x46   : > { %s4270_s11 = sshll.u32 %s158_s23, 3  ;;  %s6347_s24 = scalar_lea.hbm %s6914_s0, %s4271_s25 }
  0x47   : > { %s162_s26 = scalar_lea.vmem [#allocation3], %s4270_s11  ;;  %p6351_p11 = pnand %p5696_p9, %p36_p3 }
  0x48   : > { %s169_s27 = sshll.u32 %s162_s26, 4  ;;  %s159_s22 = scalar_lea.sflag [#allocation4], %s158_s23  ;;  %s6349_s27 = int_to_ptr.vmem [resolvable:$true] %s169_s27 }
  0x49   : > { %s6079_s29 = scalar_lea.hbm %s6347_s24, 128  ;;  %p6081_p0 = pneg %p6351_p11 }
  0x4a   : > { %p6080_p12 = scmp.ne.s32.totalorder %s6347_s24, %s6079_s29  ;;  %s6084_s5 = scalar_lea.hbm %s6914_s0, 256 }
  0x4b   : > { %p6085_p13 = scmp.lt.u32.totalorder %s6347_s24, %s6914_s0  ;;  %p6086_p6 = scmp.lt.u32.totalorder %s6084_s5, %s6079_s29 }
  0x4c   : > { %p6082_p2 = pnand %p6081_p0, %p6080_p12  ;;  %p6088_p3 = scmp.lt.u32.totalorder %s6079_s29, %s6347_s24 }
  0x4d   : > { %p6087_p10 = por %p6086_p6, %p6085_p13 }
  0x4e   : > { %p6083_p1 = pneg %p6082_p2 }
  0x4f   : > { %p6089_p5 = por %p6088_p3, %p6087_p10 }
  0x51   : > { %p6090_p9 = pnand %p6089_p5, %p6083_p1 }
  0x53   : > { %6093 = shalt.err (!%p6090_p9)
}
  0x54   : > { %s6094_s23 = scalar_lea.vmem %s6349_s27, 128  ;;  %s6187_s11 = smov [#allocation3]  }
  0x55   : > { %p6095_p12 = scmp.ne.s32.totalorder %s6349_s27, %s6094_s23  ;;  %s6099_s25 = sshll.u32 %s6187_s11, 4  ;;  %s6100_s25 = int_to_ptr.vmem [resolvable:$false] %s6099_s25 }
  0x56   : > { %s6101_s17 = scalar_lea.vmem %s6100_s25, 256  ;;  %p6102_p4 = scmp.lt.s32.totalorder %s6349_s27, %s6100_s25 }
  0x57   : > { %p6097_p2 = pnand %p6095_p12, %p6081_p0  ;;  %p6103_p13 = scmp.lt.s32.totalorder %s6101_s17, %s6094_s23 }
  0x59   : > { %p6098_p7 = pneg %p6097_p2  ;;  %p6104_p6 = por %p6103_p13, %p6102_p4 }
  0x5b   : > { %p6105_p10 = pnand %p6104_p6, %p6098_p7 }
  0x5d   : > { %6108 = shalt.err (!%p6105_p10)
}
  0x5e   : > { %5689 = dma.hbm_to_vmem [thread:$0]  (!%p6351_p11), %s6347_s24, 128, %s6349_s27, %s159_s22  }
  0x5f   : > { %178 = sbr.rel (%p6254_p8) target bundleno = 3570 (0xdf2), region = 32  ;;  %s6383_s21 = sand.u32 (!%p6254_p8), 1, %s6171_s13  }
  0x60   : > { %s4273_s26 = sshll.u32 (!%p6254_p8), %s6383_s21, 3  ;;  %s181_s29 = scalar_lea.sflag (!%p6254_p8), [#allocation4], %s6383_s21 }
  0x61   : > { %s6387_s30 = scalar_lea.vmem (!%p6254_p8), [#allocation3], %s4273_s26  ;;  %p6928_p4 = scmp.ne.s32.totalorder (!%p6254_p8), %s6921_s18, 0 }
  0x66   : > { %6154 = dma.done.wait (%p6928_p4), %s181_s29, 128  }
  0x67   : > { %6156 = vsyncadd (%p6928_p4), %s181_s29, 4294967168  ;;  %p6929_p7 = scmp.eq.s32.totalorder %s6235_s16, 0 }
  0x69   : > { %6158 = dma.done.wait (%p6929_p7), [#allocation7], 36096   ;;  %p6930_p8 = pmov %p6929_p7 }
  0x6a   : > { %v6188_v0 = vmov 0.0   ;;  %vm6189_vm0 = vmmov 0   ;;  %v5743_v1 = vld [vmem:[#allocation6 + $0x40] sm:$0xff]   ;;  %v5745_v3 = vld [vmem:[#allocation6 + $0x48] sm:$0xff]   ;;  %v5747_v5 = vld [vmem:[#allocation6 + $0x50] sm:$0xff]   ;;  %vm221_vm1 = vcmask 1040384  }
  0x6b   : > { %6160 = vsyncadd (%p6930_p8), [#allocation7], 4294931200  ;;  %4967 = vmatprep.subr.bf16.mxu0 %v6188_v0  ;;  %4987 = vmatprep.subr.bf16.mxu1 %v6188_v0  ;;  %v5744_v2 = vld [vmem:[#allocation6] sm:$0xff]   ;;  %v5746_v4 = vld [vmem:[#allocation6 + $0x8] sm:$0xff]   ;;  %vm435_vm4 = vcmask 1046528   ;;  %vm554_vm6 = vcmask 1041408  }
  0x6c   : > { %4983 = vmatprep.mubr.msk.bf16.mxu0 %vm6189_vm0, %v6188_v0  ;;  %5003 = vmatprep.mubr.msk.bf16.mxu1 %vm6189_vm0, %v6188_v0  ;;  %v5748_v6 = vld [vmem:[#allocation6 + $0x10] sm:$0xff]   ;;  %v5749_v7 = vld [vmem:[#allocation6 + $0x58] sm:$0xff]   ;;  %v5751_v9 = vld [vmem:[#allocation6 + $0x60] sm:$0xff]   ;;  %vm768_vm9 = vcmask 1045504   ;;  %vm6190_vm11 = vmmov 1   ;;  %s4276_s18 = sshll.u32 %s6383_s21, 4 }
  0x6d   : > { %4968 = vmatpush3.bf16.msra.mxu0 %v5743_v1  ;;  %4988 = vmatpush3.bf16.msra.mxu1 %v5744_v2  ;;  %v5750_v8 = vld [vmem:[#allocation6 + $0x18] sm:$0xff]   ;;  %v5752_v10 = vld [vmem:[#allocation6 + $0x20] sm:$0xff]   ;;  %v5753_v11 = vld [vmem:[#allocation6 + $0x68] sm:$0xff]   ;;  %s214_s20 = scalar_lea.vmem [#allocation9], %s4276_s18  ;;  %s4651_s27 = sshll.u32 %s6235_s16, 8 }
  0x6e   : > { %4969 = vmatprep.subr.bf16.mxu0 %v6188_v0  ;;  %4989 = vmatprep.subr.bf16.mxu1 %v6188_v0  ;;  %v5754_v12 = vld [vmem:[#allocation6 + $0x28] sm:$0xff]   ;;  %vm6414_vm2 = vmneg %vm221_vm1  ;;  %v217_v14 = vld [vmem:[%s6387_s30] sm:$0xff]  ;;  %s4173_s24 = sshll.u32 %s214_s20, 4  ;;  %s6870_s4 = scalar_lea.hbm %s6917_s3, %s4651_s27  ;;  %s6865_s24 = int_to_ptr.vmem [resolvable:$true] %s4173_s24 }
  0x6f   : > { %v5755_v15 = vld [vmem:[#allocation6 + $0x70] sm:$0xff]   ;;  %v5757_v17 = vld [vmem:[#allocation6 + $0x78] sm:$0xff]   ;;  %v433_v18 = vrot.slane %v217_v14, 1  ;;  %v219_v19 = vrot.slane %v217_v14, 7  ;;  %vm6424_vm3 = vmpackc.low %vm6414_vm2, %vm6414_vm2  ;;  %v256_v23 = vpack.c.bf16 %v217_v14, %v217_v14  ;;  %s4160_s5 = scalar_lea.sflag [#allocation5], %s6383_s21  ;;  %s6109_s7 = scalar_lea.vmem %s6865_s24, 256 }
  0x70   : > { %v5756_v16 = vld [vmem:[#allocation6 + $0x30] sm:$0xff]   ;;  %v5758_v21 = vld [vmem:[#allocation6 + $0x38] sm:$0xff]   ;;  %v5759_v22 = vld [vmem:[#allocation6 + $0x80] sm:$0xff]   ;;  %p6110_p11 = scmp.ne.s32.totalorder %s6865_s24, %s6109_s7  ;;  %p6943_p0 = scmp.ne.s32.totalorder %s6926_s10, 0 }
  0x71   : > { %4970 = vmatpush3.bf16.msra.mxu0 %v5745_v3  ;;  %4990 = vmatpush3.bf16.msra.mxu1 %v5746_v4  ;;  %v4296_v24 = vpack.c.bf16 %v219_v19, %v219_v19  ;;  %v5760_v25 = vld [vmem:[#allocation6 + $0x88] sm:$0xff]   ;;  %v5761_v26 = vld [vmem:[#allocation6 + $0x90] sm:$0xff]   ;;  %v5762_v27 = vld [vmem:[#allocation6 + $0x98] sm:$0xff]   ;;  %v4307_v33 = vpack.c.bf16 %v433_v18, %v433_v18  ;;  %s6191_s16 = smov [#allocation9]  }
  0x72   : > { %4971 = vmatprep.subr.bf16.mxu0 %v6188_v0  ;;  %4991 = vmatprep.subr.bf16.mxu1 %v6188_v0  ;;  %v5763_v28 = vld [vmem:[#allocation6 + $0xa0] sm:$0xff]   ;;  %v5764_v29 = vld [vmem:[#allocation6 + $0xa8] sm:$0xff]   ;;  %v5765_v30 = vld [vmem:[#allocation6 + $0xb0] sm:$0xff]   ;;  %p6111_p1 = pnand %p6110_p11, %p6943_p0  ;;  %s6113_s8 = sshll.u32 %s6191_s16, 4  ;;  %s6114_s8 = int_to_ptr.vmem [resolvable:$false] %s6113_s8 }
  0x73   : > { %vm6445_vm5 = vmpackc.low %vm435_vm4, %vm435_vm4  ;;  %v5766_v32 = vld [vmem:[#allocation6 + $0xb8] sm:$0xff]   ;;  %v5767_v34 = vld [vmem:[#allocation6 + $0x100] sm:$0xff]   ;;  %s6115_s23 = scalar_lea.vmem %s6114_s8, 512  ;;  %p6116_p5 = scmp.lt.s32.totalorder %s6865_s24, %s6114_s8 }
  0x74   : > { %v5768_v35 = vld [vmem:[#allocation6 + $0xc0] sm:$0xff]   ;;  %v5769_v36 = vld [vmem:[#allocation6 + $0x108] sm:$0xff]   ;;  %v5771_v38 = vld [vmem:[#allocation6 + $0x110] sm:$0xff]   ;;  %p6112_p3 = pneg %p6111_p1  ;;  %p6117_p9 = scmp.lt.s32.totalorder %s6115_s23, %s6109_s7 }
  0x75   : > { %4972 = vmatpush3.bf16.msra.mxu0 %v5747_v5  ;;  %4992 = vmatpush3.bf16.msra.mxu1 %v5748_v6  ;;  %v5770_v37 = vld [vmem:[#allocation6 + $0xc8] sm:$0xff]   ;;  %v5772_v39 = vld [vmem:[#allocation6 + $0xd0] sm:$0xff]   ;;  %v5773_v40 = vld [vmem:[#allocation6 + $0x118] sm:$0xff]  }
  0x76   : > { %4973 = vmatprep.subr.bf16.mxu0 %v6188_v0  ;;  %4993 = vmatprep.subr.bf16.mxu1 %v6188_v0  ;;  %v5774_v41 = vld [vmem:[#allocation6 + $0xd8] sm:$0xff]   ;;  %v5775_v42 = vld [vmem:[#allocation6 + $0x120] sm:$0xff]   ;;  %v5777_v44 = vld [vmem:[#allocation6 + $0x128] sm:$0xff]   ;;  %p6118_p12 = por %p6117_p9, %p6116_p5 }
  0x77   : > { %v5776_v43 = vld [vmem:[#allocation6 + $0xe0] sm:$0xff]   ;;  %v5778_v45 = vld [vmem:[#allocation6 + $0xe8] sm:$0xff]   ;;  %v5779_v46 = vld [vmem:[#allocation6 + $0x130] sm:$0xff]  }
  0x78   : > { %v5780_v47 = vld [vmem:[#allocation6 + $0xf0] sm:$0xff]   ;;  %v5781_v48 = vld [vmem:[#allocation6 + $0x138] sm:$0xff]   ;;  %v4309_v60 = vld [vmem:[#allocation8] ss:$0 sm:$0xff]  ;;  %p6119_p2 = pnand %p6118_p12, %p6112_p3 }
  0x79   : > { %4974 = vmatpush3.bf16.msra.mxu0 %v5749_v7  ;;  %4994 = vmatpush3.bf16.msra.mxu1 %v5750_v8  ;;  %v5782_v49 = vld [vmem:[#allocation6 + $0xf8] sm:$0xff]   ;;  %vm6478_vm7 = vmneg %vm554_vm6  ;;  %v5783_v6 = vld [vmem:[#allocation6 + $0x140] sm:$0xff]  }
  0x7a   : > { %4975 = vmatprep.subr.bf16.mxu0 %v6188_v0  ;;  %4995 = vmatprep.subr.bf16.mxu1 %v6188_v0  ;;  %vm4328_vm8 = vmpackc.low %vm6478_vm7, %vm6478_vm7  ;;  %v5787_v14 = vld [vmem:[#allocation6 + $0x160] sm:$0xff]   ;;  %v5877_v20 = vld [vmem:[#allocation6 + $0x418] sm:$0xff]  }
  0x7b   : > { %vm4339_vm10 = vmpackc.low %vm768_vm9, %vm768_vm9  ;;  %v5892_v31 = vld [vmem:[#allocation6 + $0x4d8] sm:$0xff]   ;;  %v5937_v13 = vld [vmem:[#allocation6 + $0x610] sm:$0xff]  }
  0x7c   : > { %vm4485_vm12 = vmpackc.low %vm6190_vm11, %vm6478_vm7  ;;  %v5906_v5 = vld [vmem:[#allocation6 + $0x518] sm:$0xff]  }
  0x7d   : > { %4976 = vmatpush3.bf16.msra.mxu0 %v5751_v9  ;;  %4996 = vmatpush3.bf16.msra.mxu1 %v5752_v10  ;;  %v5784_v10 = vld [vmem:[#allocation6 + $0x148] sm:$0xff]   ;;  %vm4496_vm13 = vmpackc.low %vm768_vm9, %vm6190_vm11 }
  0x7e   : > { %4977 = vmatprep.subr.bf16.mxu0 %v6188_v0  ;;  %4997 = vmatprep.subr.bf16.mxu1 %v6188_v0  ;;  %vm6719_vm14 = vmpackc.low %vm6190_vm11, %vm6414_vm2 }
  0x7f   : > { %vm6740_vm15 = vmpackc.low %vm435_vm4, %vm6190_vm11 }
  0x81   : > { %4978 = vmatpush3.bf16.msra.mxu0 %v5753_v11  ;;  %4998 = vmatpush3.bf16.msra.mxu1 %v5754_v12  ;;  %v5785_v11 = vld [vmem:[#allocation6 + $0x150] sm:$0xff]   ;;  %v5786_v12 = vld [vmem:[#allocation6 + $0x158] sm:$0xff]  }
  0x82   : > { %4979 = vmatprep.subr.bf16.mxu0 %v6188_v0  ;;  %4999 = vmatprep.subr.bf16.mxu1 %v6188_v0 }
  0x85   : > { %4980 = vmatpush3.bf16.msra.mxu0 %v5755_v15  ;;  %5000 = vmatpush3.bf16.msra.mxu1 %v5756_v16  ;;  %v5788_v15 = vld [vmem:[#allocation6 + $0x168] sm:$0xff]   ;;  %v5789_v16 = vld [vmem:[#allocation6 + $0x170] sm:$0xff]  }
  0x86   : > { %4981 = vmatprep.subr.bf16.mxu0 %v6188_v0  ;;  %5001 = vmatprep.subr.bf16.mxu1 %v6188_v0 }
  0x89   : > { %4982 = vmatpush3.bf16.msra.mxu0 %v5757_v17  ;;  %5002 = vmatpush3.bf16.msra.mxu1 %v5758_v21  ;;  %v5790_v17 = vld [vmem:[#allocation6 + $0x178] sm:$0xff]   ;;  %v5791_v21 = vld [vmem:[#allocation6 + $0x180] sm:$0xff]  }
  0x8a   : > { %5007 = vmatprep.subr.bf16.mxu0 %v6188_v0  ;;  %5027 = vmatprep.subr.bf16.mxu1 %v6188_v0 }
  0x8c   : > { %4984 = vmatmul.mubr.bf16.vlgmr.msra.gmra.mrb[0].mxu0 %v256_v23  ;;  %5004 = vmatmul.mubr.msk.bf16.vlgmr.msra.gmra.mrb[0].mxu1 %vm6424_vm3, %v4296_v24  ;;  %v5793_v23 = vld [vmem:[#allocation6 + $0x190] sm:$0xff]   ;;  %v5794_v24 = vld [vmem:[#allocation6 + $0x198] sm:$0xff]  }
  0x8d   : > { %5008 = vmatpush3.bf16.msra.mxu0 %v5759_v22  ;;  %5023 = vmatprep.mubr.msk.bf16.mxu0 %vm6189_vm0, %v6188_v0  ;;  %v5792_v22 = vld [vmem:[#allocation6 + $0x188] sm:$0xff]  }
  0x8e   : > { %5009 = vmatprep.subr.bf16.mxu0 %v6188_v0  ;;  %5043 = vmatprep.mubr.msk.bf16.mxu1 %vm6189_vm0, %v6188_v0 }
  0x8f   : > { %5028 = vmatpush3.bf16.msra.mxu1 %v5767_v34  ;;  %v5807_v34 = vld [vmem:[#allocation6 + $0x220] sm:$0xff]  }
  0x90   : > { %5029 = vmatprep.subr.bf16.mxu1 %v6188_v0 }
  0x91   : > { %5010 = vmatpush3.bf16.msra.mxu0 %v5760_v25  ;;  %v5795_v25 = vld [vmem:[#allocation6 + $0x1a0] sm:$0xff]  }
  0x92   : > { %5011 = vmatprep.subr.bf16.mxu0 %v6188_v0 }
  0x93   : > { %5030 = vmatpush3.bf16.msra.mxu1 %v5769_v36 }
  0x94   : > { %5031 = vmatprep.subr.bf16.mxu1 %v6188_v0 }
  0x95   : > { %5012 = vmatpush3.bf16.msra.mxu0 %v5761_v26  ;;  %v5796_v26 = vld [vmem:[#allocation6 + $0x1a8] sm:$0xff]  }
  0x96   : > { %5013 = vmatprep.subr.bf16.mxu0 %v6188_v0 }
  0x97   : > { %5032 = vmatpush3.bf16.msra.mxu1 %v5771_v38 }
  0x98   : > { %5033 = vmatprep.subr.bf16.mxu1 %v6188_v0 }
  0x99   : > { %5014 = vmatpush3.bf16.msra.mxu0 %v5762_v27  ;;  %v5797_v27 = vld [vmem:[#allocation6 + $0x1b0] sm:$0xff]  }
  0x9a   : > { %5015 = vmatprep.subr.bf16.mxu0 %v6188_v0 }
  0x9b   : > { %5034 = vmatpush3.bf16.msra.mxu1 %v5773_v40 }
  0x9c   : > { %5035 = vmatprep.subr.bf16.mxu1 %v6188_v0 }
  0x9d   : > { %5016 = vmatpush3.bf16.msra.mxu0 %v5763_v28  ;;  %v5798_v28 = vld [vmem:[#allocation6 + $0x1b8] sm:$0xff]  }
  0x9e   : > { %5017 = vmatprep.subr.bf16.mxu0 %v6188_v0 }
  0x9f   : > { %5036 = vmatpush3.bf16.msra.mxu1 %v5775_v42 }
  0xa0   : > { %5037 = vmatprep.subr.bf16.mxu1 %v6188_v0 }
  0xa1   : > { %5018 = vmatpush3.bf16.msra.mxu0 %v5764_v29  ;;  %v5799_v29 = vld [vmem:[#allocation6 + $0x200] sm:$0xff]  }
  0xa2   : > { %5019 = vmatprep.subr.bf16.mxu0 %v6188_v0 }
  0xa3   : > { %5038 = vmatpush3.bf16.msra.mxu1 %v5777_v44 }
  0xa4   : > { %5039 = vmatprep.subr.bf16.mxu1 %v6188_v0 }
  0xa5   : > { %5020 = vmatpush3.bf16.msra.mxu0 %v5765_v30  ;;  %v5801_v30 = vld [vmem:[#allocation6 + $0x208] sm:$0xff]  }
  0xa6   : > { %5021 = vmatprep.subr.bf16.mxu0 %v6188_v0 }
  0xa7   : > { %5040 = vmatpush3.bf16.msra.mxu1 %v5779_v46  ;;  %v4342_v46 = vld [vmem:[#allocation8 + $0x1] ss:$0 sm:$0xff] }
  0xa8   : > { %5041 = vmatprep.subr.bf16.mxu1 %v6188_v0 }
  0xa9   : > { %5022 = vmatpush3.bf16.msra.mxu0 %v5766_v32  ;;  %v5803_v32 = vld [vmem:[#allocation6 + $0x210] sm:$0xff]  }
  0xaa   : > { %5047 = vmatprep.subr.bf16.mxu0 %v6188_v0 }
  0xab   : > { %5042 = vmatpush3.bf16.msra.mxu1 %v5781_v48 }
  0xac   : > { %5024 = vmatmul.mubr.msk.bf16.vlgmr.msra.gmra.mrb[4].mxu0 %vm6445_vm5, %v4307_v33  ;;  %5067 = vmatprep.subr.bf16.mxu1 %v6188_v0  ;;  %v5805_v33 = vld [vmem:[#allocation6 + $0x218] sm:$0xff]  }
  0xad   : > { %5063 = vmatprep.mubr.msk.bf16.mxu0 %vm6189_vm0, %v6188_v0  ;;  %5048 = vmatpush3.bf16.msra.mxu0 %v5768_v35  ;;  %v5809_v35 = vld [vmem:[#allocation6 + $0x228] sm:$0xff]  }
  0xae   : > { %5049 = vmatprep.subr.bf16.mxu0 %v6188_v0 }
  0xb1   : > { %5050 = vmatpush3.bf16.msra.mxu0 %v5770_v37 }
  0xb2   : > { %5051 = vmatprep.subr.bf16.mxu0 %v6188_v0 }
  0xb5   : > { %5052 = vmatpush3.bf16.msra.mxu0 %v5772_v39 }
  0xb6   : > { %5053 = vmatprep.subr.bf16.mxu0 %v6188_v0 }
  0xb9   : > { %5054 = vmatpush3.bf16.msra.mxu0 %v5774_v41 }
  0xba   : > { %5055 = vmatprep.subr.bf16.mxu0 %v6188_v0 }
  0xbd   : > { %5056 = vmatpush3.bf16.msra.mxu0 %v5776_v43 }
  0xbe   : > { %5057 = vmatprep.subr.bf16.mxu0 %v6188_v0 }
  0xc1   : > { %5058 = vmatpush3.bf16.msra.mxu0 %v5778_v45 }
  0xc2   : > { %5059 = vmatprep.subr.bf16.mxu0 %v6188_v0 }
  0xc5   : > { %5060 = vmatpush3.bf16.msra.mxu0 %v5780_v47 }
  0xc6   : > { %5061 = vmatprep.subr.bf16.mxu0 %v6188_v0 }
  0xc9   : > { %5062 = vmatpush3.bf16.msra.mxu0 %v5782_v49 }
  0xca   : > { %5087 = vmatprep.subr.bf16.mxu0 %v6188_v0 }
 0x15f   : > { %v339_v50 = vpop.f32.mrb[0].mxu0  ;;  %v427_v52 = vpop.f32.mrb[0].mxu1 }
 0x160   : > { %v4985_v51 = vpop.f32.mrb[1].mxu0  ;;  %v428_v53 = vadd.f32 %v427_v52, %v339_v50  ;;  %v5005_v55 = vpop.f32.mrb[1].mxu1 }
 0x161   : > { %v342_v54 = vpop.f32.mrb[2].mxu0  ;;  %v430_v57 = vpop.f32.mrb[2].mxu1  ;;  %v5802_v55 = vld [vmem:[#allocation6 + $0x1c8] sm:$0xff]  }
 0x162   : > { %v4986_v56 = vpop.f32.mrb[3].mxu0  ;;  %v5006_v58 = vpop.f32.mrb[3].mxu1  ;;  %v5806_v57 = vld [vmem:[#allocation6 + $0x1d8] sm:$0xff]  }
 0x163   : > { %v5804_v56 = vld [vmem:[#allocation6 + $0x1d0] sm:$0xff]   ;;  %v5808_v58 = vld [vmem:[#allocation6 + $0x1e0] sm:$0xff]  }
 0x17f   : > { %v536_v59 = vpop.f32.mrb[4].mxu0 }
 0x180   : > { %v542_v61 = vadd.f32 %v536_v59, %v428_v53  ;;  %v5025_v62 = vpop.f32.mrb[5].mxu0  ;;  %v5800_v53 = vld [vmem:[#allocation6 + $0x1c0] sm:$0xff]   ;;  %v5810_v59 = vld [vmem:[#allocation6 + $0x1e8] sm:$0xff]  }
 0x181   : > { %v539_v63 = vpop.f32.mrb[6].mxu0  ;;  %v5813_v62 = vld [vmem:[#allocation6 + $0x238] sm:$0xff]  }
 0x182   : > { %v6472_v1 = vadd.f32 %v4309_v60, %v542_v61  ;;  %v5026_v2 = vpop.f32.mrb[7].mxu0  ;;  %v5811_v60 = vld [vmem:[#allocation6 + $0x230] sm:$0xff]   ;;  %v5814_v63 = vld [vmem:[#allocation6 + $0x1f8] sm:$0xff]  }
 0x183   : > { %v5812_v61 = vld [vmem:[#allocation6 + $0x1f0] sm:$0xff]   ;;  %v4343_v2 = vld [vmem:[#allocation8 + $0x2] ss:$0 sm:$0xff] }
 0x184   : > { %v549_v3 = vmax.f32 %v6472_v1, 0.0  ;;  %v5817_v1 = vld [vmem:[#allocation6 + $0x250] sm:$0xff]  }
 0x186   : > { %v550_v4 = vmax.f32 %v549_v3, 0.0 }
 0x188   : > { %v552_v7 = vrot.slane %v550_v4, 6  ;;  %v589_v8 = vpack.c.bf16 %v550_v4, %v550_v4  ;;  %v766_v18 = vrot.slane %v550_v4, 2 }
 0x18a   : > { %v4329_v9 = vpack.c.bf16 %v552_v7, %v552_v7  ;;  %5044 = vmatmul.mubr.bf16.vlgmr.msra.gmra.mrb[4].mxu1 %v589_v8  ;;  %v4340_v19 = vpack.c.bf16 %v766_v18, %v766_v18  ;;  %v5819_v18 = vld [vmem:[#allocation6 + $0x260] sm:$0xff]  }
 0x18b   : > { %5068 = vmatpush3.bf16.msra.mxu1 %v5783_v6  ;;  %5083 = vmatprep.mubr.msk.bf16.mxu1 %vm6189_vm0, %v6188_v0 }
 0x18c   : > { %5064 = vmatmul.mubr.msk.bf16.vlgmr.msra.gmra.mrb[8].mxu0 %vm4328_vm8, %v4329_v9  ;;  %5069 = vmatprep.subr.bf16.mxu1 %v6188_v0 }
 0x18d   : > { %5103 = vmatprep.mubr.msk.bf16.mxu0 %vm6189_vm0, %v6188_v0  ;;  %5088 = vmatpush3.bf16.msra.mxu0 %v5791_v21  ;;  %v5821_v21 = vld [vmem:[#allocation6 + $0x270] sm:$0xff]  }
 0x18e   : > { %5089 = vmatprep.subr.bf16.mxu0 %v6188_v0 }
 0x18f   : > { %5070 = vmatpush3.bf16.msra.mxu1 %v5784_v10 }
 0x190   : > { %5071 = vmatprep.subr.bf16.mxu1 %v6188_v0 }
 0x191   : > { %5090 = vmatpush3.bf16.msra.mxu0 %v5792_v22  ;;  %v5822_v22 = vld [vmem:[#allocation6 + $0x278] sm:$0xff]  }
 0x192   : > { %5091 = vmatprep.subr.bf16.mxu0 %v6188_v0 }
 0x193   : > { %5072 = vmatpush3.bf16.msra.mxu1 %v5785_v11 }
 0x194   : > { %5073 = vmatprep.subr.bf16.mxu1 %v6188_v0 }
 0x195   : > { %5092 = vmatpush3.bf16.msra.mxu0 %v5793_v23 }
 0x196   : > { %5093 = vmatprep.subr.bf16.mxu0 %v6188_v0 }
 0x197   : > { %5074 = vmatpush3.bf16.msra.mxu1 %v5786_v12  ;;  %v5815_v12 = vld [vmem:[#allocation6 + $0x240] sm:$0xff]  }
 0x198   : > { %5075 = vmatprep.subr.bf16.mxu1 %v6188_v0 }
 0x199   : > { %5094 = vmatpush3.bf16.msra.mxu0 %v5794_v24 }
 0x19a   : > { %5095 = vmatprep.subr.bf16.mxu0 %v6188_v0 }
 0x19b   : > { %5076 = vmatpush3.bf16.msra.mxu1 %v5787_v14 }
 0x19c   : > { %5077 = vmatprep.subr.bf16.mxu1 %v6188_v0 }
 0x19d   : > { %5096 = vmatpush3.bf16.msra.mxu0 %v5795_v25  ;;  %v5823_v25 = vld [vmem:[#allocation6 + $0x280] sm:$0xff]  }
 0x19e   : > { %5097 = vmatprep.subr.bf16.mxu0 %v6188_v0 }
 0x19f   : > { %5078 = vmatpush3.bf16.msra.mxu1 %v5788_v15 }
 0x1a0   : > { %5079 = vmatprep.subr.bf16.mxu1 %v6188_v0 }
 0x1a1   : > { %5098 = vmatpush3.bf16.msra.mxu0 %v5796_v26  ;;  %v5824_v26 = vld [vmem:[#allocation6 + $0x288] sm:$0xff]  }
 0x1a2   : > { %5099 = vmatprep.subr.bf16.mxu0 %v6188_v0 }
 0x1a3   : > { %5080 = vmatpush3.bf16.msra.mxu1 %v5789_v16 }
 0x1a4   : > { %5081 = vmatprep.subr.bf16.mxu1 %v6188_v0 }
 0x1a5   : > { %5100 = vmatpush3.bf16.msra.mxu0 %v5797_v27  ;;  %v5825_v27 = vld [vmem:[#allocation6 + $0x290] sm:$0xff]  }
 0x1a6   : > { %5101 = vmatprep.subr.bf16.mxu0 %v6188_v0 }
 0x1a7   : > { %5082 = vmatpush3.bf16.msra.mxu1 %v5790_v17  ;;  %v5816_v17 = vld [vmem:[#allocation6 + $0x248] sm:$0xff]  }
 0x1a8   : > { %5107 = vmatprep.subr.bf16.mxu1 %v6188_v0 }
 0x1a9   : > { %5102 = vmatpush3.bf16.msra.mxu0 %v5798_v28  ;;  %v5826_v28 = vld [vmem:[#allocation6 + $0x298] sm:$0xff]  }
 0x1aa   : > { %5084 = vmatmul.mubr.msk.bf16.vlgmr.msra.gmra.mrb[8].mxu1 %vm4339_vm10, %v4340_v19  ;;  %5127 = vmatprep.subr.bf16.mxu0 %v6188_v0  ;;  %v5820_v19 = vld [vmem:[#allocation6 + $0x268] sm:$0xff]  }
 0x1ab   : > { %5123 = vmatprep.mubr.msk.bf16.mxu1 %vm6189_vm0, %v6188_v0  ;;  %5108 = vmatpush3.bf16.msra.mxu1 %v5799_v29  ;;  %v5827_v29 = vld [vmem:[#allocation6 + $0x2a0] sm:$0xff]  }
 0x1ac   : > { %5109 = vmatprep.subr.bf16.mxu1 %v6188_v0 }
 0x1af   : > { %5110 = vmatpush3.bf16.msra.mxu1 %v5801_v30  ;;  %v5828_v30 = vld [vmem:[#allocation6 + $0x2a8] sm:$0xff]  }
 0x1b0   : > { %5111 = vmatprep.subr.bf16.mxu1 %v6188_v0 }
 0x1b3   : > { %5112 = vmatpush3.bf16.msra.mxu1 %v5803_v32  ;;  %v5829_v32 = vld [vmem:[#allocation6 + $0x2b0] sm:$0xff]  }
 0x1b4   : > { %5113 = vmatprep.subr.bf16.mxu1 %v6188_v0 }
 0x1b7   : > { %5114 = vmatpush3.bf16.msra.mxu1 %v5805_v33  ;;  %v5830_v33 = vld [vmem:[#allocation6 + $0x2b8] sm:$0xff]  }
 0x1b8   : > { %5115 = vmatprep.subr.bf16.mxu1 %v6188_v0 }
 0x1bb   : > { %5116 = vmatpush3.bf16.msra.mxu1 %v5807_v34  ;;  %v5831_v34 = vld [vmem:[#allocation6 + $0x300] sm:$0xff]  }
 0x1bc   : > { %5117 = vmatprep.subr.bf16.mxu1 %v6188_v0 }
 0x1bf   : > { %5118 = vmatpush3.bf16.msra.mxu1 %v5809_v35  ;;  %v5833_v35 = vld [vmem:[#allocation6 + $0x308] sm:$0xff]  }
 0x1c0   : > { %5119 = vmatprep.subr.bf16.mxu1 %v6188_v0 }
 0x1c3   : > { %5120 = vmatpush3.bf16.msra.mxu1 %v5811_v60  ;;  %v5834_v60 = vld [vmem:[#allocation6 + $0x2c8] sm:$0xff]  }
 0x1c4   : > { %5121 = vmatprep.subr.bf16.mxu1 %v6188_v0 }
 0x1c7   : > { %5122 = vmatpush3.bf16.msra.mxu1 %v5813_v62  ;;  %v5838_v62 = vld [vmem:[#allocation6 + $0x2d8] sm:$0xff]  }
 0x1c8   : > { %5147 = vmatprep.subr.bf16.mxu1 %v6188_v0 }
 0x25d   : > { %v672_v36 = vpop.f32.mrb[4].mxu1 }
 0x25e   : > { %v5045_v37 = vpop.f32.mrb[5].mxu1 }
 0x25f   : > { %v675_v38 = vpop.f32.mrb[6].mxu1  ;;  %v760_v39 = vpop.f32.mrb[8].mxu0  ;;  %v5837_v37 = vld [vmem:[#allocation6 + $0x318] sm:$0xff]  }
 0x260   : > { %v761_v40 = vadd.f32 %v760_v39, %v672_v36  ;;  %v5046_v41 = vpop.f32.mrb[7].mxu1  ;;  %v5065_v42 = vpop.f32.mrb[9].mxu0  ;;  %v5835_v36 = vld [vmem:[#allocation6 + $0x310] sm:$0xff]   ;;  %v5839_v38 = vld [vmem:[#allocation6 + $0x320] sm:$0xff]   ;;  %v5841_v39 = vld [vmem:[#allocation6 + $0x328] sm:$0xff]  }
 0x261   : > { %v763_v43 = vpop.f32.mrb[10].mxu0 }
 0x262   : > { %v5066_v44 = vpop.f32.mrb[11].mxu0 }
 0x27d   : > { %v869_v45 = vpop.f32.mrb[8].mxu1 }
 0x27e   : > { %v875_v47 = vadd.f32 %v869_v45, %v761_v40  ;;  %v5085_v48 = vpop.f32.mrb[9].mxu1  ;;  %v5843_v40 = vld [vmem:[#allocation6 + $0x330] sm:$0xff]  }
 0x27f   : > { %v872_v49 = vpop.f32.mrb[10].mxu1 }
 0x280   : > { %v881_v50 = vadd.f32 %v4342_v46, %v875_v47  ;;  %v5086_v51 = vpop.f32.mrb[11].mxu1 }
 0x281   : > { %v4384_v51 = vld [vmem:[#allocation8 + $0x3] ss:$0 sm:$0xff] }
 0x282   : > { %v882_v52 = vmax.f32 %v881_v50, 0.0 }
 0x284   : > { %v899_v54 = vpack.c.bf16 %v882_v52, %v882_v52 }
 0x286   : > { %5104 = vmatmul.mubr.bf16.vlgmr.msra.gmra.mrb[12].mxu0 %v899_v54 }
 0x287   : > { %5128 = vmatpush3.bf16.msra.mxu0 %v5800_v53  ;;  %5143 = vmatprep.mubr.msk.bf16.mxu0 %vm6189_vm0, %v6188_v0 }
 0x288   : > { %5129 = vmatprep.subr.bf16.mxu0 %v6188_v0 }
 0x28b   : > { %5130 = vmatpush3.bf16.msra.mxu0 %v5802_v55 }
 0x28c   : > { %5131 = vmatprep.subr.bf16.mxu0 %v6188_v0 }
 0x28f   : > { %5132 = vmatpush3.bf16.msra.mxu0 %v5804_v56 }
 0x290   : > { %5133 = vmatprep.subr.bf16.mxu0 %v6188_v0 }
 0x293   : > { %5134 = vmatpush3.bf16.msra.mxu0 %v5806_v57 }
 0x294   : > { %5135 = vmatprep.subr.bf16.mxu0 %v6188_v0 }
 0x297   : > { %5136 = vmatpush3.bf16.msra.mxu0 %v5808_v58  ;;  %v5832_v58 = vld [vmem:[#allocation6 + $0x2c0] sm:$0xff]  }
 0x298   : > { %5137 = vmatprep.subr.bf16.mxu0 %v6188_v0 }
 0x29b   : > { %5138 = vmatpush3.bf16.msra.mxu0 %v5810_v59 }
 0x29c   : > { %5139 = vmatprep.subr.bf16.mxu0 %v6188_v0 }
 0x29f   : > { %5140 = vmatpush3.bf16.msra.mxu0 %v5812_v61  ;;  %v5836_v61 = vld [vmem:[#allocation6 + $0x2d0] sm:$0xff]  }
 0x2a0   : > { %5141 = vmatprep.subr.bf16.mxu0 %v6188_v0 }
 0x2a3   : > { %5142 = vmatpush3.bf16.msra.mxu0 %v5814_v63  ;;  %v5840_v63 = vld [vmem:[#allocation6 + $0x2e0] sm:$0xff]  }
 0x2a4   : > { %5167 = vmatprep.subr.bf16.mxu0 %v6188_v0 }
 0x359   : > { %v987_v4 = vpop.f32.mrb[12].mxu0 }
 0x35a   : > { %v988_v6 = vadd.f32 %v4343_v2, %v987_v4  ;;  %v5105_v7 = vpop.f32.mrb[13].mxu0  ;;  %v5842_v2 = vld [vmem:[#allocation6 + $0x2e8] sm:$0xff]   ;;  %v5844_v4 = vld [vmem:[#allocation6 + $0x2f0] sm:$0xff]  }
 0x35b   : > { %v990_v8 = vpop.f32.mrb[14].mxu0  ;;  %v5846_v7 = vld [vmem:[#allocation6 + $0x2f8] sm:$0xff]  }
 0x35c   : > { %v6529_v9 = vadd.f32 %v988_v6, %v549_v3  ;;  %v5106_v10 = vpop.f32.mrb[15].mxu0  ;;  %v5818_v3 = vld [vmem:[#allocation6 + $0x258] sm:$0xff]   ;;  %v4385_v8 = vld [vmem:[#allocation8 + $0x4] ss:$0 sm:$0xff] }
 0x35d   : > { %v5845_v6 = vld [vmem:[#allocation6 + $0x338] sm:$0xff]  }
 0x35e   : > { %v994_v11 = vmax.f32 %v6529_v9, 0.0 }
 0x360   : > { %v996_v14 = vrot.slane %v994_v11, 7  ;;  %v1032_v15 = vpack.c.bf16 %v994_v11, %v994_v11  ;;  %v1209_v23 = vrot.slane %v994_v11, 1 }
 0x362   : > { %v4371_v16 = vpack.c.bf16 %v996_v14, %v996_v14  ;;  %5124 = vmatmul.mubr.bf16.vlgmr.msra.gmra.mrb[12].mxu1 %v1032_v15  ;;  %v4382_v24 = vpack.c.bf16 %v1209_v23, %v1209_v23  ;;  %v5852_v23 = vld [vmem:[#allocation6 + $0x368] sm:$0xff]  }
 0x363   : > { %5148 = vmatpush3.bf16.msra.mxu1 %v5815_v12  ;;  %5163 = vmatprep.mubr.msk.bf16.mxu1 %vm6189_vm0, %v6188_v0 }
 0x364   : > { %5144 = vmatmul.mubr.msk.bf16.vlgmr.msra.gmra.mrb[16].mxu0 %vm6424_vm3, %v4371_v16  ;;  %5149 = vmatprep.subr.bf16.mxu1 %v6188_v0 }
 0x365   : > { %5183 = vmatprep.mubr.msk.bf16.mxu0 %vm6189_vm0, %v6188_v0  ;;  %5168 = vmatpush3.bf16.msra.mxu0 %v5823_v25  ;;  %v5854_v25 = vld [vmem:[#allocation6 + $0x378] sm:$0xff]  }
 0x366   : > { %5169 = vmatprep.subr.bf16.mxu0 %v6188_v0 }
 0x367   : > { %5150 = vmatpush3.bf16.msra.mxu1 %v5816_v17  ;;  %v5847_v17 = vld [vmem:[#allocation6 + $0x340] sm:$0xff]  }
 0x368   : > { %5151 = vmatprep.subr.bf16.mxu1 %v6188_v0 }
 0x369   : > { %5170 = vmatpush3.bf16.msra.mxu0 %v5824_v26 }
 0x36a   : > { %5171 = vmatprep.subr.bf16.mxu0 %v6188_v0 }
 0x36b   : > { %5152 = vmatpush3.bf16.msra.mxu1 %v5817_v1 }
 0x36c   : > { %5153 = vmatprep.subr.bf16.mxu1 %v6188_v0 }
 0x36d   : > { %5172 = vmatpush3.bf16.msra.mxu0 %v5825_v27 }
 0x36e   : > { %5173 = vmatprep.subr.bf16.mxu0 %v6188_v0 }
 0x36f   : > { %5154 = vmatpush3.bf16.msra.mxu1 %v5818_v3 }
 0x370   : > { %5155 = vmatprep.subr.bf16.mxu1 %v6188_v0 }
 0x371   : > { %5174 = vmatpush3.bf16.msra.mxu0 %v5826_v28  ;;  %v5855_v28 = vld [vmem:[#allocation6 + $0x3c0] sm:$0xff]  }
 0x372   : > { %5175 = vmatprep.subr.bf16.mxu0 %v6188_v0 }
 0x373   : > { %5156 = vmatpush3.bf16.msra.mxu1 %v5819_v18 }
 0x374   : > { %5157 = vmatprep.subr.bf16.mxu1 %v6188_v0 }
 0x375   : > { %5176 = vmatpush3.bf16.msra.mxu0 %v5827_v29  ;;  %v5856_v29 = vld [vmem:[#allocation6 + $0x440] sm:$0xff]  }
 0x376   : > { %5177 = vmatprep.subr.bf16.mxu0 %v6188_v0 }
 0x377   : > { %5158 = vmatpush3.bf16.msra.mxu1 %v5820_v19  ;;  %v5848_v19 = vld [vmem:[#allocation6 + $0x348] sm:$0xff]  }
 0x378   : > { %5159 = vmatprep.subr.bf16.mxu1 %v6188_v0 }
 0x379   : > { %5178 = vmatpush3.bf16.msra.mxu0 %v5828_v30  ;;  %v5857_v30 = vld [vmem:[#allocation6 + $0x3c8] sm:$0xff]  }
 0x37a   : > { %5179 = vmatprep.subr.bf16.mxu0 %v6188_v0 }
 0x37b   : > { %5160 = vmatpush3.bf16.msra.mxu1 %v5821_v21  ;;  %v5850_v21 = vld [vmem:[#allocation6 + $0x358] sm:$0xff]  }
 0x37c   : > { %5161 = vmatprep.subr.bf16.mxu1 %v6188_v0 }
 0x37d   : > { %5180 = vmatpush3.bf16.msra.mxu0 %v5829_v32  ;;  %v5858_v32 = vld [vmem:[#allocation6 + $0x448] sm:$0xff]  }
 0x37e   : > { %5181 = vmatprep.subr.bf16.mxu0 %v6188_v0 }
 0x37f   : > { %5162 = vmatpush3.bf16.msra.mxu1 %v5822_v22  ;;  %v5851_v22 = vld [vmem:[#allocation6 + $0x360] sm:$0xff]  }
 0x380   : > { %5187 = vmatprep.subr.bf16.mxu1 %v6188_v0 }
 0x381   : > { %5182 = vmatpush3.bf16.msra.mxu0 %v5830_v33  ;;  %v5859_v33 = vld [vmem:[#allocation6 + $0x3d0] sm:$0xff]  }
 0x382   : > { %5164 = vmatmul.mubr.msk.bf16.vlgmr.msra.gmra.mrb[16].mxu1 %vm6445_vm5, %v4382_v24  ;;  %5207 = vmatprep.subr.bf16.mxu0 %v6188_v0  ;;  %v5853_v24 = vld [vmem:[#allocation6 + $0x370] sm:$0xff]  }
 0x383   : > { %5203 = vmatprep.mubr.msk.bf16.mxu1 %vm6189_vm0, %v6188_v0  ;;  %5188 = vmatpush3.bf16.msra.mxu1 %v5831_v34  ;;  %v5860_v34 = vld [vmem:[#allocation6 + $0x450] sm:$0xff]  }
 0x384   : > { %5189 = vmatprep.subr.bf16.mxu1 %v6188_v0 }
 0x387   : > { %5190 = vmatpush3.bf16.msra.mxu1 %v5833_v35  ;;  %v5861_v35 = vld [vmem:[#allocation6 + $0x3d8] sm:$0xff]  }
 0x388   : > { %5191 = vmatprep.subr.bf16.mxu1 %v6188_v0 }
 0x38b   : > { %5192 = vmatpush3.bf16.msra.mxu1 %v5835_v36  ;;  %v5862_v36 = vld [vmem:[#allocation6 + $0x458] sm:$0xff]  }
 0x38c   : > { %5193 = vmatprep.subr.bf16.mxu1 %v6188_v0 }
 0x38f   : > { %5194 = vmatpush3.bf16.msra.mxu1 %v5837_v37  ;;  %v5863_v37 = vld [vmem:[#allocation6 + $0x3e0] sm:$0xff]  }
 0x390   : > { %5195 = vmatprep.subr.bf16.mxu1 %v6188_v0 }
 0x393   : > { %5196 = vmatpush3.bf16.msra.mxu1 %v5839_v38  ;;  %v5864_v38 = vld [vmem:[#allocation6 + $0x460] sm:$0xff]  }
 0x394   : > { %5197 = vmatprep.subr.bf16.mxu1 %v6188_v0 }
 0x397   : > { %5198 = vmatpush3.bf16.msra.mxu1 %v5841_v39  ;;  %v5865_v39 = vld [vmem:[#allocation6 + $0x3e8] sm:$0xff]  }
 0x398   : > { %5199 = vmatprep.subr.bf16.mxu1 %v6188_v0 }
 0x39b   : > { %5200 = vmatpush3.bf16.msra.mxu1 %v5843_v40  ;;  %v5866_v40 = vld [vmem:[#allocation6 + $0x468] sm:$0xff]  }
 0x39c   : > { %5201 = vmatprep.subr.bf16.mxu1 %v6188_v0 }
 0x39f   : > { %5202 = vmatpush3.bf16.msra.mxu1 %v5845_v6  ;;  %v5873_v6 = vld [vmem:[#allocation6 + $0x408] sm:$0xff]  }
 0x3a0   : > { %5227 = vmatprep.subr.bf16.mxu1 %v6188_v0 }
 0x435   : > { %v1115_v41 = vpop.f32.mrb[12].mxu1 }
 0x436   : > { %v5125_v42 = vpop.f32.mrb[13].mxu1 }
 0x437   : > { %v1118_v43 = vpop.f32.mrb[14].mxu1  ;;  %v1203_v44 = vpop.f32.mrb[16].mxu0  ;;  %v5868_v42 = vld [vmem:[#allocation6 + $0x470] sm:$0xff]  }
 0x438   : > { %v1204_v45 = vadd.f32 %v1203_v44, %v1115_v41  ;;  %v5126_v46 = vpop.f32.mrb[15].mxu1  ;;  %v5145_v47 = vpop.f32.mrb[17].mxu0  ;;  %v5867_v41 = vld [vmem:[#allocation6 + $0x3f0] sm:$0xff]   ;;  %v5869_v43 = vld [vmem:[#allocation6 + $0x3f8] sm:$0xff]  }
 0x439   : > { %v1206_v48 = vpop.f32.mrb[18].mxu0  ;;  %v5870_v44 = vld [vmem:[#allocation6 + $0x478] sm:$0xff]  }
 0x43a   : > { %v5146_v49 = vpop.f32.mrb[19].mxu0 }
 0x455   : > { %v1311_v50 = vpop.f32.mrb[16].mxu1 }
 0x456   : > { %v1317_v52 = vadd.f32 %v1311_v50, %v1204_v45  ;;  %v5165_v53 = vpop.f32.mrb[17].mxu1 }
 0x457   : > { %v1314_v54 = vpop.f32.mrb[18].mxu1 }
 0x458   : > { %v1323_v55 = vadd.f32 %v4384_v51, %v1317_v52  ;;  %v5166_v56 = vpop.f32.mrb[19].mxu1 }
 0x45a   : > { %v1324_v57 = vmax.f32 %v1323_v55, 0.0  ;;  %v4426_v55 = vld [vmem:[#allocation8 + $0x5] ss:$0 sm:$0xff] }
 0x45c   : > { %v1341_v59 = vpack.c.bf16 %v1324_v57, %v1324_v57 }
 0x45e   : > { %5184 = vmatmul.mubr.bf16.vlgmr.msra.gmra.mrb[20].mxu0 %v1341_v59 }
 0x45f   : > { %5208 = vmatpush3.bf16.msra.mxu0 %v5832_v58  ;;  %5223 = vmatprep.mubr.msk.bf16.mxu0 %vm6189_vm0, %v6188_v0 }
 0x460   : > { %5209 = vmatprep.subr.bf16.mxu0 %v6188_v0 }
 0x463   : > { %5210 = vmatpush3.bf16.msra.mxu0 %v5834_v60 }
 0x464   : > { %5211 = vmatprep.subr.bf16.mxu0 %v6188_v0 }
 0x467   : > { %5212 = vmatpush3.bf16.msra.mxu0 %v5836_v61  ;;  %v5871_v61 = vld [vmem:[#allocation6 + $0x400] sm:$0xff]  }
 0x468   : > { %5213 = vmatprep.subr.bf16.mxu0 %v6188_v0 }
 0x46b   : > { %5214 = vmatpush3.bf16.msra.mxu0 %v5838_v62 }
 0x46c   : > { %5215 = vmatprep.subr.bf16.mxu0 %v6188_v0 }
 0x46f   : > { %5216 = vmatpush3.bf16.msra.mxu0 %v5840_v63 }
 0x470   : > { %5217 = vmatprep.subr.bf16.mxu0 %v6188_v0 }
 0x473   : > { %5218 = vmatpush3.bf16.msra.mxu0 %v5842_v2  ;;  %v5872_v2 = vld [vmem:[#allocation6 + $0x380] sm:$0xff]  }
 0x474   : > { %5219 = vmatprep.subr.bf16.mxu0 %v6188_v0 }
 0x477   : > { %5220 = vmatpush3.bf16.msra.mxu0 %v5844_v4 }
 0x478   : > { %5221 = vmatprep.subr.bf16.mxu0 %v6188_v0 }
 0x47b   : > { %5222 = vmatpush3.bf16.msra.mxu0 %v5846_v7  ;;  %v5874_v7 = vld [vmem:[#allocation6 + $0x388] sm:$0xff]  }
 0x47c   : > { %5247 = vmatprep.subr.bf16.mxu0 %v6188_v0 }
 0x531   : > { %v1429_v10 = vpop.f32.mrb[20].mxu0 }
 0x532   : > { %v1430_v11 = vadd.f32 %v4385_v8, %v1429_v10  ;;  %v5185_v12 = vpop.f32.mrb[21].mxu0  ;;  %v5875_v8 = vld [vmem:[#allocation6 + $0x410] sm:$0xff]  }
 0x533   : > { %v1432_v14 = vpop.f32.mrb[22].mxu0  ;;  %v5876_v10 = vld [vmem:[#allocation6 + $0x390] sm:$0xff]   ;;  %v5879_v12 = vld [vmem:[#allocation6 + $0x420] sm:$0xff]  }
 0x534   : > { %v1435_v15 = vadd.f32 %v1430_v11, %v6529_v9  ;;  %v5186_v16 = vpop.f32.mrb[23].mxu0  ;;  %v5849_v9 = vld [vmem:[#allocation6 + $0x350] sm:$0xff]   ;;  %v5878_v11 = vld [vmem:[#allocation6 + $0x398] sm:$0xff]   ;;  %v5880_v14 = vld [vmem:[#allocation6 + $0x3a0] sm:$0xff]  }
 0x535   : > { %v5882_v16 = vld [vmem:[#allocation6 + $0x3a8] sm:$0xff]  }
 0x536   : > { %v1437_v1 = vrot.slane %v1435_v15, 7  ;;  %v1473_v3 = vpack.c.bf16 %v1435_v15, %v1435_v15  ;;  %v1650_v26 = vrot.slane %v1435_v15, 1  ;;  %v5881_v15 = vld [vmem:[#allocation6 + $0x428] sm:$0xff]  }
 0x538   : > { %v4413_v18 = vpack.c.bf16 %v1437_v1, %v1437_v1  ;;  %5204 = vmatmul.mubr.bf16.vlgmr.msra.gmra.mrb[20].mxu1 %v1473_v3  ;;  %v4424_v27 = vpack.c.bf16 %v1650_v26, %v1650_v26  ;;  %v5884_v1 = vld [vmem:[#allocation6 + $0x3b0] sm:$0xff]   ;;  %v5885_v3 = vld [vmem:[#allocation6 + $0x438] sm:$0xff]  }
 0x539   : > { %5228 = vmatpush3.bf16.msra.mxu1 %v5847_v17  ;;  %5243 = vmatprep.mubr.msk.bf16.mxu1 %vm6189_vm0, %v6188_v0  ;;  %v5883_v17 = vld [vmem:[#allocation6 + $0x430] sm:$0xff]  }
 0x53a   : > { %5224 = vmatmul.mubr.msk.bf16.vlgmr.msra.gmra.mrb[24].mxu0 %vm6424_vm3, %v4413_v18  ;;  %5229 = vmatprep.subr.bf16.mxu1 %v6188_v0  ;;  %v5886_v18 = vld [vmem:[#allocation6 + $0x3b8] sm:$0xff]   ;;  %v5893_v26 = vld [vmem:[#allocation6 + $0x490] sm:$0xff]  }
 0x53b   : > { %5263 = vmatprep.mubr.msk.bf16.mxu0 %vm6189_vm0, %v6188_v0  ;;  %5248 = vmatpush3.bf16.msra.mxu0 %v5856_v29  ;;  %v5896_v29 = vld [vmem:[#allocation6 + $0x4e8] sm:$0xff]  }
 0x53c   : > { %5249 = vmatprep.subr.bf16.mxu0 %v6188_v0 }
 0x53d   : > { %5230 = vmatpush3.bf16.msra.mxu1 %v5848_v19 }
 0x53e   : > { %5231 = vmatprep.subr.bf16.mxu1 %v6188_v0 }
 0x53f   : > { %5250 = vmatpush3.bf16.msra.mxu0 %v5858_v32  ;;  %v5898_v32 = vld [vmem:[#allocation6 + $0x4f0] sm:$0xff]  }
 0x540   : > { %5251 = vmatprep.subr.bf16.mxu0 %v6188_v0 }
 0x541   : > { %5232 = vmatpush3.bf16.msra.mxu1 %v5849_v9 }
 0x542   : > { %5233 = vmatprep.subr.bf16.mxu1 %v6188_v0 }
 0x543   : > { %5252 = vmatpush3.bf16.msra.mxu0 %v5860_v34  ;;  %v5900_v34 = vld [vmem:[#allocation6 + $0x4f8] sm:$0xff]  }
 0x544   : > { %5253 = vmatprep.subr.bf16.mxu0 %v6188_v0 }
 0x545   : > { %5234 = vmatpush3.bf16.msra.mxu1 %v5850_v21  ;;  %v5887_v21 = vld [vmem:[#allocation6 + $0x4c0] sm:$0xff]  }
 0x546   : > { %5235 = vmatprep.subr.bf16.mxu1 %v6188_v0 }
 0x547   : > { %5254 = vmatpush3.bf16.msra.mxu0 %v5862_v36  ;;  %v5902_v36 = vld [vmem:[#allocation6 + $0x4b8] sm:$0xff]  }
 0x548   : > { %5255 = vmatprep.subr.bf16.mxu0 %v6188_v0 }
 0x549   : > { %5236 = vmatpush3.bf16.msra.mxu1 %v5851_v22  ;;  %v5889_v22 = vld [vmem:[#allocation6 + $0x480] sm:$0xff]  }
 0x54a   : > { %5237 = vmatprep.subr.bf16.mxu1 %v6188_v0 }
 0x54b   : > { %5256 = vmatpush3.bf16.msra.mxu0 %v5864_v38 }
 0x54c   : > { %5257 = vmatprep.subr.bf16.mxu0 %v6188_v0 }
 0x54d   : > { %5238 = vmatpush3.bf16.msra.mxu1 %v5852_v23  ;;  %v5888_v23 = vld [vmem:[#allocation6 + $0x4c8] sm:$0xff]  }
 0x54e   : > { %5239 = vmatprep.subr.bf16.mxu1 %v6188_v0 }
 0x54f   : > { %5258 = vmatpush3.bf16.msra.mxu0 %v5866_v40 }
 0x550   : > { %5259 = vmatprep.subr.bf16.mxu0 %v6188_v0 }
 0x551   : > { %5240 = vmatpush3.bf16.msra.mxu1 %v5853_v24  ;;  %v5891_v24 = vld [vmem:[#allocation6 + $0x488] sm:$0xff]  }
 0x552   : > { %5241 = vmatprep.subr.bf16.mxu1 %v6188_v0 }
 0x553   : > { %5260 = vmatpush3.bf16.msra.mxu0 %v5868_v42 }
 0x554   : > { %5261 = vmatprep.subr.bf16.mxu0 %v6188_v0 }
 0x555   : > { %5242 = vmatpush3.bf16.msra.mxu1 %v5854_v25  ;;  %v5890_v25 = vld [vmem:[#allocation6 + $0x4d0] sm:$0xff]  }
 0x556   : > { %5267 = vmatprep.subr.bf16.mxu1 %v6188_v0 }
 0x557   : > { %5262 = vmatpush3.bf16.msra.mxu0 %v5870_v44 }
 0x558   : > { %5244 = vmatmul.mubr.msk.bf16.vlgmr.msra.gmra.mrb[24].mxu1 %vm6445_vm5, %v4424_v27  ;;  %5287 = vmatprep.subr.bf16.mxu0 %v6188_v0  ;;  %v5894_v27 = vld [vmem:[#allocation6 + $0x4e0] sm:$0xff]  }
 0x559   : > { %5283 = vmatprep.mubr.msk.bf16.mxu1 %vm6189_vm0, %v6188_v0  ;;  %5268 = vmatpush3.bf16.msra.mxu1 %v5855_v28  ;;  %v5895_v28 = vld [vmem:[#allocation6 + $0x498] sm:$0xff]  }
 0x55a   : > { %5269 = vmatprep.subr.bf16.mxu1 %v6188_v0 }
 0x55d   : > { %5270 = vmatpush3.bf16.msra.mxu1 %v5857_v30  ;;  %v5897_v30 = vld [vmem:[#allocation6 + $0x4a0] sm:$0xff]  }
 0x55e   : > { %5271 = vmatprep.subr.bf16.mxu1 %v6188_v0 }
 0x561   : > { %5272 = vmatpush3.bf16.msra.mxu1 %v5859_v33  ;;  %v5899_v33 = vld [vmem:[#allocation6 + $0x4a8] sm:$0xff]  }
 0x562   : > { %5273 = vmatprep.subr.bf16.mxu1 %v6188_v0 }
 0x565   : > { %5274 = vmatpush3.bf16.msra.mxu1 %v5861_v35  ;;  %v5901_v35 = vld [vmem:[#allocation6 + $0x4b0] sm:$0xff]  }
 0x566   : > { %5275 = vmatprep.subr.bf16.mxu1 %v6188_v0 }
 0x569   : > { %5276 = vmatpush3.bf16.msra.mxu1 %v5863_v37 }
 0x56a   : > { %5277 = vmatprep.subr.bf16.mxu1 %v6188_v0 }
 0x56d   : > { %5278 = vmatpush3.bf16.msra.mxu1 %v5865_v39  ;;  %v4448_v39 = vld [vmem:[#allocation8 + $0x6] ss:$0 sm:$0xff] }
 0x56e   : > { %5279 = vmatprep.subr.bf16.mxu1 %v6188_v0 }
 0x571   : > { %5280 = vmatpush3.bf16.msra.mxu1 %v5867_v41 }
 0x572   : > { %5281 = vmatprep.subr.bf16.mxu1 %v6188_v0 }
 0x575   : > { %5282 = vmatpush3.bf16.msra.mxu1 %v5869_v43 }
 0x576   : > { %5307 = vmatprep.subr.bf16.mxu1 %v6188_v0 }
 0x60b   : > { %v1556_v45 = vpop.f32.mrb[20].mxu1 }
 0x60c   : > { %v5205_v46 = vpop.f32.mrb[21].mxu1 }
 0x60d   : > { %v1559_v47 = vpop.f32.mrb[22].mxu1  ;;  %v1644_v48 = vpop.f32.mrb[24].mxu0 }
 0x60e   : > { %v1645_v49 = vadd.f32 %v1644_v48, %v1556_v45  ;;  %v5206_v50 = vpop.f32.mrb[23].mxu1  ;;  %v5225_v51 = vpop.f32.mrb[25].mxu0 }
 0x60f   : > { %v1647_v52 = vpop.f32.mrb[26].mxu0 }
 0x610   : > { %v5226_v53 = vpop.f32.mrb[27].mxu0 }
 0x62b   : > { %v1752_v54 = vpop.f32.mrb[24].mxu1 }
 0x62c   : > { %v1758_v56 = vadd.f32 %v1752_v54, %v1645_v49  ;;  %v5245_v57 = vpop.f32.mrb[25].mxu1 }
 0x62d   : > { %v1755_v58 = vpop.f32.mrb[26].mxu1 }
 0x62e   : > { %v1764_v59 = vadd.f32 %v4426_v55, %v1758_v56  ;;  %v5246_v60 = vpop.f32.mrb[27].mxu1 }
 0x630   : > { %v1782_v62 = vpack.c.bf16 %v1764_v59, %v1764_v59  ;;  %v1784_v63 = vrot.slane %v1764_v59, 7  ;;  %v2001_v19 = vrot.slane %v1764_v59, 1 }
 0x632   : > { %v4438_v4 = vpack.c.bf16 %v1784_v63, %v1784_v63  ;;  %5284 = vmatmul.mubr.bf16.vlgmr.msra.gmra.mrb[28].mxu1 %v1782_v62  ;;  %v4458_v9 = vpack.c.bf16 %v2001_v19, %v2001_v19  ;;  %v5913_v19 = vld [vmem:[#allocation6 + $0x550] sm:$0xff]  }
 0x633   : > { %5308 = vmatpush3.bf16.msra.mxu1 %v5871_v61  ;;  %5323 = vmatprep.mubr.msk.bf16.mxu1 %vm6189_vm0, %v6188_v0 }
 0x634   : > { %5264 = vmatmul.mubr.msk.bf16.vlgmr.msra.gmra.mrb[28].mxu0 %vm6424_vm3, %v4438_v4  ;;  %5309 = vmatprep.subr.bf16.mxu1 %v6188_v0 }
 0x635   : > { %5288 = vmatpush3.bf16.msra.mxu0 %v5872_v2  ;;  %5303 = vmatprep.mubr.msk.bf16.mxu0 %vm6189_vm0, %v6188_v0 }
 0x636   : > { %5289 = vmatprep.subr.bf16.mxu0 %v6188_v0 }
 0x637   : > { %5310 = vmatpush3.bf16.msra.mxu1 %v5873_v6 }
 0x638   : > { %5311 = vmatprep.subr.bf16.mxu1 %v6188_v0 }
 0x639   : > { %5290 = vmatpush3.bf16.msra.mxu0 %v5874_v7 }
 0x63a   : > { %5291 = vmatprep.subr.bf16.mxu0 %v6188_v0 }
 0x63b   : > { %5312 = vmatpush3.bf16.msra.mxu1 %v5875_v8  ;;  %v5904_v8 = vld [vmem:[#allocation6 + $0x508] sm:$0xff]  }
 0x63c   : > { %5313 = vmatprep.subr.bf16.mxu1 %v6188_v0 }
 0x63d   : > { %5292 = vmatpush3.bf16.msra.mxu0 %v5876_v10  ;;  %v5905_v10 = vld [vmem:[#allocation6 + $0x510] sm:$0xff]  }
 0x63e   : > { %5293 = vmatprep.subr.bf16.mxu0 %v6188_v0 }
 0x63f   : > { %5314 = vmatpush3.bf16.msra.mxu1 %v5877_v20  ;;  %v5907_v20 = vld [vmem:[#allocation6 + $0x520] sm:$0xff]  }
 0x640   : > { %5315 = vmatprep.subr.bf16.mxu1 %v6188_v0 }
 0x641   : > { %5294 = vmatpush3.bf16.msra.mxu0 %v5878_v11  ;;  %v5908_v11 = vld [vmem:[#allocation6 + $0x528] sm:$0xff]  }
 0x642   : > { %5295 = vmatprep.subr.bf16.mxu0 %v6188_v0 }
 0x643   : > { %5316 = vmatpush3.bf16.msra.mxu1 %v5879_v12  ;;  %v5909_v12 = vld [vmem:[#allocation6 + $0x530] sm:$0xff]  }
 0x644   : > { %5317 = vmatprep.subr.bf16.mxu1 %v6188_v0 }
 0x645   : > { %5296 = vmatpush3.bf16.msra.mxu0 %v5880_v14 }
 0x646   : > { %5297 = vmatprep.subr.bf16.mxu0 %v6188_v0 }
 0x647   : > { %5318 = vmatpush3.bf16.msra.mxu1 %v5881_v15 }
 0x648   : > { %5319 = vmatprep.subr.bf16.mxu1 %v6188_v0 }
 0x649   : > { %5298 = vmatpush3.bf16.msra.mxu0 %v5882_v16  ;;  %v5910_v16 = vld [vmem:[#allocation6 + $0x538] sm:$0xff]  }
 0x64a   : > { %5299 = vmatprep.subr.bf16.mxu0 %v6188_v0 }
 0x64b   : > { %5320 = vmatpush3.bf16.msra.mxu1 %v5883_v17 }
 0x64c   : > { %5321 = vmatprep.subr.bf16.mxu1 %v6188_v0 }
 0x64d   : > { %5300 = vmatpush3.bf16.msra.mxu0 %v5884_v1 }
 0x64e   : > { %5301 = vmatprep.subr.bf16.mxu0 %v6188_v0 }
 0x64f   : > { %5322 = vmatpush3.bf16.msra.mxu1 %v5885_v3  ;;  %v5911_v3 = vld [vmem:[#allocation6 + $0x540] sm:$0xff]  }
 0x650   : > { %5347 = vmatprep.subr.bf16.mxu1 %v6188_v0 }
 0x651   : > { %5302 = vmatpush3.bf16.msra.mxu0 %v5886_v18  ;;  %v5912_v18 = vld [vmem:[#allocation6 + $0x548] sm:$0xff]  }
 0x652   : > { %5324 = vmatmul.mubr.bf16.vlgmr.msra.gmra.mrb[32].mxu1 %v1782_v62  ;;  %5327 = vmatprep.subr.bf16.mxu0 %v6188_v0  ;;  %v5903_v62 = vld [vmem:[#allocation6 + $0x500] sm:$0xff]  }
 0x653   : > { %5363 = vmatprep.mubr.msk.bf16.mxu1 %vm6189_vm0, %v6188_v0  ;;  %5348 = vmatpush3.bf16.msra.mxu1 %v5889_v22  ;;  %v5916_v22 = vld [vmem:[#allocation6 + $0x568] sm:$0xff]  }
 0x654   : > { %5304 = vmatmul.mubr.msk.bf16.vlgmr.msra.gmra.mrb[32].mxu0 %vm6445_vm5, %v4458_v9  ;;  %5349 = vmatprep.subr.bf16.mxu1 %v6188_v0  ;;  %v5914_v9 = vld [vmem:[#allocation6 + $0x558] sm:$0xff]  }
 0x655   : > { %5343 = vmatprep.mubr.msk.bf16.mxu0 %vm6189_vm0, %v6188_v0  ;;  %5328 = vmatpush3.bf16.msra.mxu0 %v5887_v21  ;;  %v5915_v21 = vld [vmem:[#allocation6 + $0x560] sm:$0xff]  }
 0x656   : > { %5329 = vmatprep.subr.bf16.mxu0 %v6188_v0 }
 0x657   : > { %5350 = vmatpush3.bf16.msra.mxu1 %v5891_v24  ;;  %v5918_v24 = vld [vmem:[#allocation6 + $0x578] sm:$0xff]  }
 0x658   : > { %5351 = vmatprep.subr.bf16.mxu1 %v6188_v0 }
 0x659   : > { %5330 = vmatpush3.bf16.msra.mxu0 %v5888_v23  ;;  %v5917_v23 = vld [vmem:[#allocation6 + $0x570] sm:$0xff]  }
 0x65a   : > { %5331 = vmatprep.subr.bf16.mxu0 %v6188_v0 }
 0x65b   : > { %5352 = vmatpush3.bf16.msra.mxu1 %v5893_v26  ;;  %v5920_v26 = vld [vmem:[#allocation6 + $0x5c8] sm:$0xff]  }
 0x65c   : > { %5353 = vmatprep.subr.bf16.mxu1 %v6188_v0 }
 0x65d   : > { %5332 = vmatpush3.bf16.msra.mxu0 %v5890_v25  ;;  %v5919_v25 = vld [vmem:[#allocation6 + $0x5c0] sm:$0xff]  }
 0x65e   : > { %5333 = vmatprep.subr.bf16.mxu0 %v6188_v0 }
 0x65f   : > { %5354 = vmatpush3.bf16.msra.mxu1 %v5895_v28  ;;  %v5926_v28 = vld [vmem:[#allocation6 + $0x5e0] sm:$0xff]  }
 0x660   : > { %5355 = vmatprep.subr.bf16.mxu1 %v6188_v0 }
 0x661   : > { %5334 = vmatpush3.bf16.msra.mxu0 %v5892_v31  ;;  %v5922_v31 = vld [vmem:[#allocation6 + $0x5d0] sm:$0xff]  }
 0x662   : > { %5335 = vmatprep.subr.bf16.mxu0 %v6188_v0 }
 0x663   : > { %5356 = vmatpush3.bf16.msra.mxu1 %v5897_v30 }
 0x664   : > { %5357 = vmatprep.subr.bf16.mxu1 %v6188_v0 }
 0x665   : > { %5336 = vmatpush3.bf16.msra.mxu0 %v5894_v27  ;;  %v5924_v27 = vld [vmem:[#allocation6 + $0x5d8] sm:$0xff]  }
 0x666   : > { %5337 = vmatprep.subr.bf16.mxu0 %v6188_v0 }
 0x667   : > { %5358 = vmatpush3.bf16.msra.mxu1 %v5899_v33 }
 0x668   : > { %5359 = vmatprep.subr.bf16.mxu1 %v6188_v0 }
 0x669   : > { %5338 = vmatpush3.bf16.msra.mxu0 %v5896_v29  ;;  %v5928_v29 = vld [vmem:[#allocation6 + $0x5e8] sm:$0xff]  }
 0x66a   : > { %5339 = vmatprep.subr.bf16.mxu0 %v6188_v0 }
 0x66b   : > { %5360 = vmatpush3.bf16.msra.mxu1 %v5901_v35 }
 0x66c   : > { %5361 = vmatprep.subr.bf16.mxu1 %v6188_v0 }
 0x66d   : > { %5340 = vmatpush3.bf16.msra.mxu0 %v5898_v32 }
 0x66e   : > { %5341 = vmatprep.subr.bf16.mxu0 %v6188_v0 }
 0x66f   : > { %5362 = vmatpush3.bf16.msra.mxu1 %v5902_v36 }
 0x670   : > { %5387 = vmatprep.subr.bf16.mxu1 %v6188_v0 }
 0x671   : > { %5342 = vmatpush3.bf16.msra.mxu0 %v5900_v34 }
 0x672   : > { %5367 = vmatprep.subr.bf16.mxu0 %v6188_v0 }
 0x705   : > { %v1974_v37 = vpop.f32.mrb[28].mxu1 }
 0x706   : > { %v5285_v38 = vpop.f32.mrb[29].mxu1 }
 0x707   : > { %v1886_v40 = vpop.f32.mrb[28].mxu0  ;;  %v1977_v41 = vpop.f32.mrb[30].mxu1 }
 0x708   : > { %v1975_v42 = vadd.f32 %v1974_v37, %v1886_v40  ;;  %v5265_v43 = vpop.f32.mrb[29].mxu0  ;;  %v5286_v44 = vpop.f32.mrb[31].mxu1 }
 0x709   : > { %v1889_v45 = vpop.f32.mrb[30].mxu0 }
 0x70a   : > { %v1984_v46 = vadd.f32 %v4448_v39, %v1975_v42  ;;  %v5266_v47 = vpop.f32.mrb[31].mxu0  ;;  %v4499_v42 = vld [vmem:[#allocation8 + $0x7] ss:$0 sm:$0xff] }
 0x70c   : > { %2198 = vst [vmem:[#allocation2] ss:$8 sps:$4 sm:$0x11] %v1984_v46   ;;  %2200 = vst [vmem:[#allocation2 + $0x1] ss:$8 sps:$4 sm:$0x22] %v1984_v46  }
 0x70d   : > { %2202 = vst [vmem:[#allocation2 + $0x2] ss:$8 sps:$4 sm:$0x44] %v1984_v46   ;;  %2204 = vst [vmem:[#allocation2 + $0x3] ss:$8 sps:$4 sm:$0x88] %v1984_v46  }
 0x725   : > { %v2191_v48 = vpop.f32.mrb[32].mxu1 }
 0x726   : > { %v5325_v49 = vpop.f32.mrb[33].mxu1 }
 0x727   : > { %v2103_v50 = vpop.f32.mrb[32].mxu0  ;;  %v2194_v51 = vpop.f32.mrb[34].mxu1 }
 0x728   : > { %v2192_v52 = vadd.f32 %v2191_v48, %v2103_v50  ;;  %v5305_v53 = vpop.f32.mrb[33].mxu0  ;;  %v5326_v54 = vpop.f32.mrb[35].mxu1 }
 0x729   : > { %v2106_v55 = vpop.f32.mrb[34].mxu0  ;;  %v5923_v54 = vld [vmem:[#allocation6 + $0x588] sm:$0xff]  }
 0x72a   : > { %v2197_v56 = vadd.f32 %v4448_v39, %v2192_v52  ;;  %v5306_v57 = vpop.f32.mrb[35].mxu0  ;;  %v5921_v52 = vld [vmem:[#allocation6 + $0x580] sm:$0xff]   ;;  %v5925_v55 = vld [vmem:[#allocation6 + $0x590] sm:$0xff]  }
 0x72b   : > { %v5929_v57 = vld [vmem:[#allocation6 + $0x5a0] sm:$0xff]  }
 0x72c   : > { %2199 = vst [vmem:[#allocation2 + $0x1] ss:$8 sps:$4 sm:$0x11] %v2197_v56   ;;  %2201 = vst [vmem:[#allocation2 + $0x2] ss:$8 sps:$4 sm:$0x22] %v2197_v56  }
 0x72d   : > { %2203 = vst [vmem:[#allocation2 + $0x3] ss:$8 sps:$4 sm:$0x44] %v2197_v56   ;;  %2205 = vst [vmem:[#allocation2 + $0x4] ss:$8 sps:$4 sm:$0x88] %v2197_v56  }
 0x72e   : > { %v5927_v56 = vld [vmem:[#allocation6 + $0x598] sm:$0xff]  }
 0x734   : > { %v6655_v58 = vld [vmem:[#allocation2] sm:$0xff]  ;;  %v6657_v59 = vld [vmem:[#allocation2 + $0x8] sm:$0xff] }
 0x735   : > { %v2216_v60 = vmax.f32 %v6655_v58, 0.0  ;;  %v2217_v61 = vmax.f32 %v6657_v59, 0.0 }
 0x737   : > { %v2221_v63 = vrot.slane %v2217_v61, 6  ;;  %v2259_v2 = vpack.c.bf16 %v2217_v61, %v2216_v60  ;;  %v2220_v4 = vrot.slane %v2216_v60, 6  ;;  %v2438_v14 = vrot.slane %v2216_v60, 2  ;;  %v5930_v60 = vld [vmem:[#allocation6 + $0x5f0] sm:$0xff]  }
 0x738   : > { %v2439_v15 = vrot.slane %v2217_v61, 2  ;;  %v5931_v61 = vld [vmem:[#allocation6 + $0x5a8] sm:$0xff]  }
 0x739   : > { %5344 = vmatmul.mubr.bf16.vlgmr.msra.gmra.mrb[36].mxu0 %v2259_v2  ;;  %v2222_v6 = vsel %vm554_vm6, %v2220_v4, %v2221_v63  ;;  %v5933_v63 = vld [vmem:[#allocation6 + $0x5b0] sm:$0xff]   ;;  %v5934_v2 = vld [vmem:[#allocation6 + $0x5b8] sm:$0xff]  }
 0x73a   : > { %5368 = vmatpush3.bf16.msra.mxu0 %v5903_v62  ;;  %v4486_v7 = vpack.c.bf16 %v2222_v6, %v2220_v4  ;;  %5383 = vmatprep.mubr.msk.bf16.mxu0 %vm6189_vm0, %v6188_v0  ;;  %v2440_v17 = vsel %vm768_vm9, %v2438_v14, %v2439_v15  ;;  %v5932_v62 = vld [vmem:[#allocation6 + $0x5f8] sm:$0xff]   ;;  %v4500_v4 = vld [vmem:[#allocation8 + $0x8] ss:$0 sm:$0xff] }
 0x73b   : > { %5369 = vmatprep.subr.bf16.mxu0 %v6188_v0  ;;  %v4497_v1 = vpack.c.bf16 %v2439_v15, %v2440_v17 }
 0x73c   : > { %5364 = vmatmul.mubr.msk.bf16.vlgmr.msra.gmra.mrb[36].mxu1 %vm4485_vm12, %v4486_v7 }
 0x73d   : > { %5403 = vmatprep.mubr.msk.bf16.mxu1 %vm6189_vm0, %v6188_v0  ;;  %5388 = vmatpush3.bf16.msra.mxu1 %v5911_v3 }
 0x73e   : > { %5370 = vmatpush3.bf16.msra.mxu0 %v5904_v8  ;;  %5389 = vmatprep.subr.bf16.mxu1 %v6188_v0 }
 0x73f   : > { %5371 = vmatprep.subr.bf16.mxu0 %v6188_v0 }
 0x741   : > { %5390 = vmatpush3.bf16.msra.mxu1 %v5912_v18  ;;  %v6022_v18 = vld [vmem:[#allocation6 + $0x8b8] sm:$0xff]  }
 0x742   : > { %5372 = vmatpush3.bf16.msra.mxu0 %v5905_v10  ;;  %5391 = vmatprep.subr.bf16.mxu1 %v6188_v0 }
 0x743   : > { %5373 = vmatprep.subr.bf16.mxu0 %v6188_v0 }
 0x745   : > { %5392 = vmatpush3.bf16.msra.mxu1 %v5913_v19 }
 0x746   : > { %5374 = vmatpush3.bf16.msra.mxu0 %v5906_v5  ;;  %5393 = vmatprep.subr.bf16.mxu1 %v6188_v0 }
 0x747   : > { %5375 = vmatprep.subr.bf16.mxu0 %v6188_v0 }
 0x749   : > { %5394 = vmatpush3.bf16.msra.mxu1 %v5914_v9  ;;  %v5938_v9 = vld [vmem:[#allocation6 + $0x618] sm:$0xff]  }
 0x74a   : > { %5376 = vmatpush3.bf16.msra.mxu0 %v5907_v20  ;;  %5395 = vmatprep.subr.bf16.mxu1 %v6188_v0 }
 0x74b   : > { %5377 = vmatprep.subr.bf16.mxu0 %v6188_v0 }
 0x74d   : > { %5396 = vmatpush3.bf16.msra.mxu1 %v5915_v21  ;;  %v5939_v21 = vld [vmem:[#allocation6 + $0x620] sm:$0xff]  }
 0x74e   : > { %5378 = vmatpush3.bf16.msra.mxu0 %v5908_v11  ;;  %5397 = vmatprep.subr.bf16.mxu1 %v6188_v0 }
 0x74f   : > { %5379 = vmatprep.subr.bf16.mxu0 %v6188_v0 }
 0x751   : > { %5398 = vmatpush3.bf16.msra.mxu1 %v5916_v22  ;;  %v5940_v22 = vld [vmem:[#allocation6 + $0x628] sm:$0xff]  }
 0x752   : > { %5380 = vmatpush3.bf16.msra.mxu0 %v5909_v12  ;;  %5399 = vmatprep.subr.bf16.mxu1 %v6188_v0 }
 0x753   : > { %5381 = vmatprep.subr.bf16.mxu0 %v6188_v0 }
 0x755   : > { %5400 = vmatpush3.bf16.msra.mxu1 %v5917_v23  ;;  %v5941_v23 = vld [vmem:[#allocation6 + $0x630] sm:$0xff]  }
 0x756   : > { %5382 = vmatpush3.bf16.msra.mxu0 %v5910_v16  ;;  %5401 = vmatprep.subr.bf16.mxu1 %v6188_v0  ;;  %v5935_v16 = vld [vmem:[#allocation6 + $0x600] sm:$0xff]  }
 0x757   : > { %5407 = vmatprep.subr.bf16.mxu0 %v6188_v0 }
 0x759   : > { %5384 = vmatmul.mubr.msk.bf16.vlgmr.msra.gmra.mrb[40].mxu0 %vm4496_vm13, %v4497_v1  ;;  %5402 = vmatpush3.bf16.msra.mxu1 %v5918_v24 }
 0x75a   : > { %5423 = vmatprep.mubr.msk.bf16.mxu0 %vm6189_vm0, %v6188_v0  ;;  %5427 = vmatprep.subr.bf16.mxu1 %v6188_v0 }
 0x75b   : > { %5408 = vmatpush3.bf16.msra.mxu0 %v5919_v25 }
 0x75c   : > { %5409 = vmatprep.subr.bf16.mxu0 %v6188_v0 }
 0x75f   : > { %5410 = vmatpush3.bf16.msra.mxu0 %v5920_v26  ;;  %v5942_v26 = vld [vmem:[#allocation6 + $0x638] sm:$0xff]  }
 0x760   : > { %5411 = vmatprep.subr.bf16.mxu0 %v6188_v0 }
 0x763   : > { %5412 = vmatpush3.bf16.msra.mxu0 %v5922_v31 }
 0x764   : > { %5413 = vmatprep.subr.bf16.mxu0 %v6188_v0 }
 0x767   : > { %5414 = vmatpush3.bf16.msra.mxu0 %v5924_v27 }
 0x768   : > { %5415 = vmatprep.subr.bf16.mxu0 %v6188_v0 }
 0x76b   : > { %5416 = vmatpush3.bf16.msra.mxu0 %v5926_v28 }
 0x76c   : > { %5417 = vmatprep.subr.bf16.mxu0 %v6188_v0 }
 0x76f   : > { %5418 = vmatpush3.bf16.msra.mxu0 %v5928_v29  ;;  %v5943_v29 = vld [vmem:[#allocation6 + $0x640] sm:$0xff]  }
 0x770   : > { %5419 = vmatprep.subr.bf16.mxu0 %v6188_v0 }
 0x773   : > { %5420 = vmatpush3.bf16.msra.mxu0 %v5930_v60 }
 0x774   : > { %5421 = vmatprep.subr.bf16.mxu0 %v6188_v0 }
 0x777   : > { %5422 = vmatpush3.bf16.msra.mxu0 %v5932_v62 }
 0x778   : > { %5447 = vmatprep.subr.bf16.mxu0 %v6188_v0 }
 0x80c   : > { %v2342_v30 = vpop.f32.mrb[36].mxu0 }
 0x80d   : > { %v5345_v32 = vpop.f32.mrb[37].mxu0 }
 0x80e   : > { %v2345_v33 = vpop.f32.mrb[38].mxu0  ;;  %v5945_v32 = vld [vmem:[#allocation6 + $0x650] sm:$0xff]  }
 0x80f   : > { %v5346_v34 = vpop.f32.mrb[39].mxu0  ;;  %v2431_v35 = vpop.f32.mrb[36].mxu1 }
 0x810   : > { %v2432_v36 = vadd.f32 %v2431_v35, %v2342_v30  ;;  %v5365_v37 = vpop.f32.mrb[37].mxu1  ;;  %v5944_v30 = vld [vmem:[#allocation6 + $0x648] sm:$0xff]   ;;  %v5947_v34 = vld [vmem:[#allocation6 + $0x660] sm:$0xff]  }
 0x811   : > { %v2434_v38 = vpop.f32.mrb[38].mxu1  ;;  %v5948_v35 = vld [vmem:[#allocation6 + $0x668] sm:$0xff]   ;;  %v5950_v37 = vld [vmem:[#allocation6 + $0x678] sm:$0xff]  }
 0x812   : > { %v2435_v39 = vadd.f32 %v2434_v38, %v2345_v33  ;;  %v5366_v40 = vpop.f32.mrb[39].mxu1  ;;  %v5946_v33 = vld [vmem:[#allocation6 + $0x658] sm:$0xff]   ;;  %v5951_v38 = vld [vmem:[#allocation6 + $0x6c0] sm:$0xff]  }
 0x813   : > { %v5954_v40 = vld [vmem:[#allocation6 + $0x6d0] sm:$0xff]  }
 0x82c   : > { %v2543_v41 = vpop.f32.mrb[40].mxu0 }
 0x82d   : > { %v2550_v43 = vadd.f32 %v2543_v41, %v2432_v36  ;;  %v5385_v44 = vpop.f32.mrb[41].mxu0  ;;  %v5949_v36 = vld [vmem:[#allocation6 + $0x670] sm:$0xff]   ;;  %v5956_v41 = vld [vmem:[#allocation6 + $0x6d8] sm:$0xff]  }
 0x82e   : > { %v2546_v45 = vpop.f32.mrb[42].mxu0 }
 0x82f   : > { %v2557_v46 = vadd.f32 %v4499_v42, %v2550_v43  ;;  %v2551_v47 = vadd.f32 %v2546_v45, %v2435_v39  ;;  %v5386_v48 = vpop.f32.mrb[43].mxu0  ;;  %v5952_v39 = vld [vmem:[#allocation6 + $0x6c8] sm:$0xff]  }
 0x830   : > { %v5960_v43 = vld [vmem:[#allocation6 + $0x6e8] sm:$0xff]  }
 0x831   : > { %v2558_v49 = vadd.f32 %v4499_v42, %v2551_v47  ;;  %v2559_v50 = vmax.f32 %v2557_v46, 0.0  ;;  %v5958_v42 = vld [vmem:[#allocation6 + $0x6e0] sm:$0xff]  }
 0x833   : > { %v2560_v51 = vmax.f32 %v2558_v49, 0.0 }
 0x835   : > { %v2577_v53 = vpack.c.bf16 %v2560_v51, %v2559_v50 }
 0x837   : > { %5404 = vmatmul.mubr.bf16.vlgmr.msra.gmra.mrb[40].mxu1 %v2577_v53 }
 0x838   : > { %5428 = vmatpush3.bf16.msra.mxu1 %v5921_v52  ;;  %5443 = vmatprep.mubr.msk.bf16.mxu1 %vm6189_vm0, %v6188_v0 }
 0x839   : > { %5429 = vmatprep.subr.bf16.mxu1 %v6188_v0 }
 0x83c   : > { %5430 = vmatpush3.bf16.msra.mxu1 %v5923_v54 }
 0x83d   : > { %5431 = vmatprep.subr.bf16.mxu1 %v6188_v0 }
 0x840   : > { %5432 = vmatpush3.bf16.msra.mxu1 %v5925_v55  ;;  %v4540_v55 = vld [vmem:[#allocation8 + $0x9] ss:$0 sm:$0xff] }
 0x841   : > { %5433 = vmatprep.subr.bf16.mxu1 %v6188_v0 }
 0x844   : > { %5434 = vmatpush3.bf16.msra.mxu1 %v5927_v56 }
 0x845   : > { %5435 = vmatprep.subr.bf16.mxu1 %v6188_v0 }
 0x848   : > { %5436 = vmatpush3.bf16.msra.mxu1 %v5929_v57 }
 0x849   : > { %5437 = vmatprep.subr.bf16.mxu1 %v6188_v0 }
 0x84c   : > { %5438 = vmatpush3.bf16.msra.mxu1 %v5931_v61 }
 0x84d   : > { %5439 = vmatprep.subr.bf16.mxu1 %v6188_v0 }
 0x850   : > { %5440 = vmatpush3.bf16.msra.mxu1 %v5933_v63 }
 0x851   : > { %5441 = vmatprep.subr.bf16.mxu1 %v6188_v0 }
 0x854   : > { %5442 = vmatpush3.bf16.msra.mxu1 %v5934_v2 }
 0x855   : > { %5467 = vmatprep.subr.bf16.mxu1 %v6188_v0 }
 0x90a   : > { %v2665_v6 = vpop.f32.mrb[40].mxu1 }
 0x90b   : > { %v2666_v7 = vadd.f32 %v4500_v4, %v2665_v6  ;;  %v5405_v8 = vpop.f32.mrb[41].mxu1 }
 0x90c   : > { %v2668_v10 = vpop.f32.mrb[42].mxu1 }
 0x90d   : > { %v6709_v5 = vadd.f32 %v2666_v7, %v6655_v58  ;;  %v2669_v20 = vadd.f32 %v4500_v4, %v2668_v10  ;;  %v5406_v11 = vpop.f32.mrb[43].mxu1  ;;  %v5953_v7 = vld [vmem:[#allocation6 + $0x680] sm:$0xff]   ;;  %v5955_v10 = vld [vmem:[#allocation6 + $0x688] sm:$0xff]  }
 0x90e   : > { %v5959_v11 = vld [vmem:[#allocation6 + $0x698] sm:$0xff]  }
 0x90f   : > { %v2674_v12 = vmax.f32 %v6709_v5, 0.0  ;;  %v6713_v14 = vadd.f32 %v2669_v20, %v6657_v59  ;;  %v5936_v59 = vld [vmem:[#allocation6 + $0x608] sm:$0xff]   ;;  %v5957_v20 = vld [vmem:[#allocation6 + $0x690] sm:$0xff]  }
 0x911   : > { %v2675_v15 = vmax.f32 %v6713_v14, 0.0  ;;  %v2678_v17 = vrot.slane %v2674_v12, 7  ;;  %v2896_v25 = vrot.slane %v2674_v12, 1 }
 0x913   : > { %v2679_v1 = vrot.slane %v2675_v15, 7  ;;  %v2717_v3 = vpack.c.bf16 %v2675_v15, %v2674_v12  ;;  %v2897_v24 = vrot.slane %v2675_v15, 1  ;;  %v5961_v12 = vld [vmem:[#allocation6 + $0x6a0] sm:$0xff]   ;;  %v5962_v15 = vld [vmem:[#allocation6 + $0x6f0] sm:$0xff]  }
 0x915   : > { %5424 = vmatmul.mubr.bf16.vlgmr.msra.gmra.mrb[44].mxu0 %v2717_v3  ;;  %v2680_v58 = vsel %vm221_vm1, %v2678_v17, %v2679_v1  ;;  %v2898_v31 = vsel %vm435_vm4, %v2896_v25, %v2897_v24  ;;  %v5965_v1 = vld [vmem:[#allocation6 + $0x6b0] sm:$0xff]   ;;  %v5966_v3 = vld [vmem:[#allocation6 + $0x6b8] sm:$0xff]  }
 0x916   : > { %5448 = vmatpush3.bf16.msra.mxu0 %v5935_v16  ;;  %v4527_v19 = vpack.c.bf16 %v2680_v58, %v2678_v17  ;;  %5463 = vmatprep.mubr.msk.bf16.mxu0 %vm6189_vm0, %v6188_v0  ;;  %v4538_v28 = vpack.c.bf16 %v2897_v24, %v2898_v31  ;;  %v5963_v16 = vld [vmem:[#allocation6 + $0x6a8] sm:$0xff]   ;;  %v5964_v17 = vld [vmem:[#allocation6 + $0x6f8] sm:$0xff]  }
 0x917   : > { %5449 = vmatprep.subr.bf16.mxu0 %v6188_v0  ;;  %v4541_v58 = vld [vmem:[#allocation8 + $0xa] ss:$0 sm:$0xff] }
 0x918   : > { %5444 = vmatmul.mubr.msk.bf16.vlgmr.msra.gmra.mrb[44].mxu1 %vm6719_vm14, %v4527_v19 }
 0x919   : > { %5483 = vmatprep.mubr.msk.bf16.mxu1 %vm6189_vm0, %v6188_v0  ;;  %5468 = vmatpush3.bf16.msra.mxu1 %v5943_v29 }
 0x91a   : > { %5450 = vmatpush3.bf16.msra.mxu0 %v5936_v59  ;;  %5469 = vmatprep.subr.bf16.mxu1 %v6188_v0 }
 0x91b   : > { %5451 = vmatprep.subr.bf16.mxu0 %v6188_v0 }
 0x91d   : > { %5470 = vmatpush3.bf16.msra.mxu1 %v5944_v30 }
 0x91e   : > { %5452 = vmatpush3.bf16.msra.mxu0 %v5937_v13  ;;  %5471 = vmatprep.subr.bf16.mxu1 %v6188_v0 }
 0x91f   : > { %5453 = vmatprep.subr.bf16.mxu0 %v6188_v0 }
 0x921   : > { %5472 = vmatpush3.bf16.msra.mxu1 %v5945_v32 }
 0x922   : > { %5454 = vmatpush3.bf16.msra.mxu0 %v5938_v9  ;;  %5473 = vmatprep.subr.bf16.mxu1 %v6188_v0 }
 0x923   : > { %5455 = vmatprep.subr.bf16.mxu0 %v6188_v0 }
 0x925   : > { %5474 = vmatpush3.bf16.msra.mxu1 %v5946_v33 }
 0x926   : > { %5456 = vmatpush3.bf16.msra.mxu0 %v5939_v21  ;;  %5475 = vmatprep.subr.bf16.mxu1 %v6188_v0 }
 0x927   : > { %5457 = vmatprep.subr.bf16.mxu0 %v6188_v0 }
 0x929   : > { %5476 = vmatpush3.bf16.msra.mxu1 %v5947_v34 }
 0x92a   : > { %5458 = vmatpush3.bf16.msra.mxu0 %v5940_v22  ;;  %5477 = vmatprep.subr.bf16.mxu1 %v6188_v0 }
 0x92b   : > { %5459 = vmatprep.subr.bf16.mxu0 %v6188_v0 }
 0x92d   : > { %5478 = vmatpush3.bf16.msra.mxu1 %v5948_v35 }
 0x92e   : > { %5460 = vmatpush3.bf16.msra.mxu0 %v5941_v23  ;;  %5479 = vmatprep.subr.bf16.mxu1 %v6188_v0 }
 0x92f   : > { %5461 = vmatprep.subr.bf16.mxu0 %v6188_v0 }
 0x931   : > { %5480 = vmatpush3.bf16.msra.mxu1 %v5949_v36  ;;  %v5968_v36 = vld [vmem:[#allocation6 + $0x708] sm:$0xff]  }
 0x932   : > { %5462 = vmatpush3.bf16.msra.mxu0 %v5942_v26  ;;  %5481 = vmatprep.subr.bf16.mxu1 %v6188_v0  ;;  %v5967_v26 = vld [vmem:[#allocation6 + $0x700] sm:$0xff]  }
 0x933   : > { %5487 = vmatprep.subr.bf16.mxu0 %v6188_v0 }
 0x935   : > { %5464 = vmatmul.mubr.msk.bf16.vlgmr.msra.gmra.mrb[48].mxu0 %vm6740_vm15, %v4538_v28  ;;  %5482 = vmatpush3.bf16.msra.mxu1 %v5950_v37  ;;  %v5971_v37 = vld [vmem:[#allocation6 + $0x720] sm:$0xff]  }
 0x936   : > { %5503 = vmatprep.mubr.msk.bf16.mxu0 %vm6189_vm0, %v6188_v0  ;;  %5507 = vmatprep.subr.bf16.mxu1 %v6188_v0 }
 0x937   : > { %5488 = vmatpush3.bf16.msra.mxu0 %v5951_v38  ;;  %v5972_v38 = vld [vmem:[#allocation6 + $0x728] sm:$0xff]  }
 0x938   : > { %5489 = vmatprep.subr.bf16.mxu0 %v6188_v0 }
 0x93b   : > { %5490 = vmatpush3.bf16.msra.mxu0 %v5952_v39  ;;  %v5973_v39 = vld [vmem:[#allocation6 + $0x730] sm:$0xff]  }
 0x93c   : > { %5491 = vmatprep.subr.bf16.mxu0 %v6188_v0 }
 0x93f   : > { %5492 = vmatpush3.bf16.msra.mxu0 %v5954_v40  ;;  %v5974_v40 = vld [vmem:[#allocation6 + $0x738] sm:$0xff]  }
 0x940   : > { %5493 = vmatprep.subr.bf16.mxu0 %v6188_v0 }
 0x943   : > { %5494 = vmatpush3.bf16.msra.mxu0 %v5956_v41  ;;  %v5975_v41 = vld [vmem:[#allocation6 + $0x780] sm:$0xff]  }
 0x944   : > { %5495 = vmatprep.subr.bf16.mxu0 %v6188_v0 }
 0x947   : > { %5496 = vmatpush3.bf16.msra.mxu0 %v5958_v42  ;;  %v5977_v42 = vld [vmem:[#allocation6 + $0x740] sm:$0xff]  }
 0x948   : > { %5497 = vmatprep.subr.bf16.mxu0 %v6188_v0 }
 0x94b   : > { %5498 = vmatpush3.bf16.msra.mxu0 %v5960_v43  ;;  %v5976_v43 = vld [vmem:[#allocation6 + $0x788] sm:$0xff]  }
 0x94c   : > { %5499 = vmatprep.subr.bf16.mxu0 %v6188_v0 }
 0x94f   : > { %5500 = vmatpush3.bf16.msra.mxu0 %v5962_v15 }
 0x950   : > { %5501 = vmatprep.subr.bf16.mxu0 %v6188_v0 }
 0x953   : > { %5502 = vmatpush3.bf16.msra.mxu0 %v5964_v17 }
 0x954   : > { %5527 = vmatprep.subr.bf16.mxu0 %v6188_v0 }
 0x9e8   : > { %v2800_v44 = vpop.f32.mrb[44].mxu0 }
 0x9e9   : > { %v5425_v45 = vpop.f32.mrb[45].mxu0 }
 0x9ea   : > { %v2803_v46 = vpop.f32.mrb[46].mxu0  ;;  %v5978_v45 = vld [vmem:[#allocation6 + $0x790] sm:$0xff]  }
 0x9eb   : > { %v5426_v47 = vpop.f32.mrb[47].mxu0  ;;  %v2889_v48 = vpop.f32.mrb[44].mxu1 }
 0x9ec   : > { %v2890_v49 = vadd.f32 %v2889_v48, %v2800_v44  ;;  %v5445_v50 = vpop.f32.mrb[45].mxu1  ;;  %v5979_v44 = vld [vmem:[#allocation6 + $0x748] sm:$0xff]   ;;  %v5980_v47 = vld [vmem:[#allocation6 + $0x798] sm:$0xff]  }
 0x9ed   : > { %v2892_v51 = vpop.f32.mrb[46].mxu1  ;;  %v5983_v48 = vld [vmem:[#allocation6 + $0x758] sm:$0xff]   ;;  %v5985_v50 = vld [vmem:[#allocation6 + $0x760] sm:$0xff]  }
 0x9ee   : > { %v2893_v52 = vadd.f32 %v2892_v51, %v2803_v46  ;;  %v5446_v53 = vpop.f32.mrb[47].mxu1  ;;  %v5981_v46 = vld [vmem:[#allocation6 + $0x750] sm:$0xff]   ;;  %v5984_v51 = vld [vmem:[#allocation6 + $0x7a8] sm:$0xff]  }
 0x9ef   : > { %v5987_v53 = vld [vmem:[#allocation6 + $0x768] sm:$0xff]  }
 0xa08   : > { %v3001_v54 = vpop.f32.mrb[48].mxu0 }
 0xa09   : > { %v3008_v56 = vadd.f32 %v3001_v54, %v2890_v49  ;;  %v5465_v57 = vpop.f32.mrb[49].mxu0  ;;  %v5982_v49 = vld [vmem:[#allocation6 + $0x7a0] sm:$0xff]   ;;  %v5988_v54 = vld [vmem:[#allocation6 + $0x7b8] sm:$0xff]  }
 0xa0a   : > { %v3004_v60 = vpop.f32.mrb[50].mxu0 }
 0xa0b   : > { %v3015_v61 = vadd.f32 %v4540_v55, %v3008_v56  ;;  %v3009_v62 = vadd.f32 %v3004_v60, %v2893_v52  ;;  %v5466_v63 = vpop.f32.mrb[51].mxu0  ;;  %v5986_v52 = vld [vmem:[#allocation6 + $0x7b0] sm:$0xff]   ;;  %v5990_v56 = vld [vmem:[#allocation6 + $0x778] sm:$0xff]  }
 0xa0d   : > { %v3016_v2 = vadd.f32 %v4540_v55, %v3009_v62  ;;  %v3017_v4 = vmax.f32 %v3015_v61, 0.0  ;;  %v5989_v55 = vld [vmem:[#allocation6 + $0x770] sm:$0xff]  }
 0xa0f   : > { %v3018_v6 = vmax.f32 %v3016_v2, 0.0 }
 0xa11   : > { %v3035_v8 = vpack.c.bf16 %v3018_v6, %v3017_v4 }
 0xa13   : > { %5484 = vmatmul.mubr.bf16.vlgmr.msra.gmra.mrb[48].mxu1 %v3035_v8 }
 0xa14   : > { %5508 = vmatpush3.bf16.msra.mxu1 %v5953_v7  ;;  %5523 = vmatprep.mubr.msk.bf16.mxu1 %vm6189_vm0, %v6188_v0 }
 0xa15   : > { %5509 = vmatprep.subr.bf16.mxu1 %v6188_v0 }
 0xa18   : > { %5510 = vmatpush3.bf16.msra.mxu1 %v5955_v10 }
 0xa19   : > { %5511 = vmatprep.subr.bf16.mxu1 %v6188_v0 }
 0xa1c   : > { %5512 = vmatpush3.bf16.msra.mxu1 %v5957_v20  ;;  %v4581_v20 = vld [vmem:[#allocation8 + $0xb] ss:$0 sm:$0xff] }
 0xa1d   : > { %5513 = vmatprep.subr.bf16.mxu1 %v6188_v0 }
 0xa20   : > { %5514 = vmatpush3.bf16.msra.mxu1 %v5959_v11 }
 0xa21   : > { %5515 = vmatprep.subr.bf16.mxu1 %v6188_v0 }
 0xa24   : > { %5516 = vmatpush3.bf16.msra.mxu1 %v5961_v12 }
 0xa25   : > { %5517 = vmatprep.subr.bf16.mxu1 %v6188_v0 }
 0xa28   : > { %5518 = vmatpush3.bf16.msra.mxu1 %v5963_v16 }
 0xa29   : > { %5519 = vmatprep.subr.bf16.mxu1 %v6188_v0 }
 0xa2c   : > { %5520 = vmatpush3.bf16.msra.mxu1 %v5965_v1 }
 0xa2d   : > { %5521 = vmatprep.subr.bf16.mxu1 %v6188_v0 }
 0xa30   : > { %5522 = vmatpush3.bf16.msra.mxu1 %v5966_v3 }
 0xa31   : > { %5547 = vmatprep.subr.bf16.mxu1 %v6188_v0 }
 0xae6   : > { %v3123_v19 = vpop.f32.mrb[48].mxu1 }
 0xae7   : > { %v3124_v59 = vadd.f32 %v4541_v58, %v3123_v19  ;;  %v5485_v13 = vpop.f32.mrb[49].mxu1  ;;  %v5991_v19 = vld [vmem:[#allocation6 + $0x7c0] sm:$0xff]  }
 0xae8   : > { %v3126_v9 = vpop.f32.mrb[50].mxu1 }
 0xae9   : > { %v3130_v21 = vadd.f32 %v3124_v59, %v6709_v5  ;;  %v3127_v22 = vadd.f32 %v4541_v58, %v3126_v9  ;;  %v5486_v23 = vpop.f32.mrb[51].mxu1  ;;  %v5969_v5 = vld [vmem:[#allocation6 + $0x710] sm:$0xff]  }
 0xaeb   : > { %v3131_v24 = vadd.f32 %v3127_v22, %v6713_v14  ;;  %v3134_v25 = vrot.slane %v3130_v21, 7  ;;  %v3352_v31 = vrot.slane %v3130_v21, 1  ;;  %v5970_v14 = vld [vmem:[#allocation6 + $0x718] sm:$0xff]  }
 0xaed   : > { %v3135_v28 = vrot.slane %v3131_v24, 7  ;;  %v3173_v29 = vpack.c.bf16 %v3131_v24, %v3130_v21  ;;  %v3353_v30 = vrot.slane %v3131_v24, 1 }
 0xaef   : > { %v3136_v32 = vsel %vm221_vm1, %v3134_v25, %v3135_v28  ;;  %v3354_v33 = vsel %vm435_vm4, %v3352_v31, %v3353_v30  ;;  %5504 = vmatmul.mubr.bf16.vlgmr.msra.gmra.mrb[52].mxu0 %v3173_v29  ;;  %v5993_v31 = vld [vmem:[#allocation6 + $0x7d0] sm:$0xff]   ;;  %v5994_v28 = vld [vmem:[#allocation6 + $0x7d8] sm:$0xff]   ;;  %v5995_v29 = vld [vmem:[#allocation6 + $0x7e0] sm:$0xff]  }
 0xaf0   : > { %v4579_v34 = vpack.c.bf16 %v3353_v30, %v3354_v33  ;;  %5528 = vmatpush3.bf16.msra.mxu0 %v5967_v26  ;;  %v4568_v35 = vpack.c.bf16 %v3136_v32, %v3134_v25  ;;  %5543 = vmatprep.mubr.msk.bf16.mxu0 %vm6189_vm0, %v6188_v0  ;;  %v5992_v26 = vld [vmem:[#allocation6 + $0x7c8] sm:$0xff]   ;;  %v5997_v32 = vld [vmem:[#allocation6 + $0x7f0] sm:$0xff]   ;;  %v5998_v33 = vld [vmem:[#allocation6 + $0x7f8] sm:$0xff]  }
 0xaf1   : > { %5529 = vmatprep.subr.bf16.mxu0 %v6188_v0  ;;  %v5996_v30 = vld [vmem:[#allocation6 + $0x7e8] sm:$0xff]  }
 0xaf2   : > { %5524 = vmatmul.mubr.msk.bf16.vlgmr.msra.gmra.mrb[52].mxu1 %vm6719_vm14, %v4568_v35  ;;  %v6001_v35 = vld [vmem:[#allocation6 + $0x800] sm:$0xff]  }
 0xaf3   : > { %5563 = vmatprep.mubr.msk.bf16.mxu1 %vm6189_vm0, %v6188_v0  ;;  %5548 = vmatpush3.bf16.msra.mxu1 %v5975_v41  ;;  %v6009_v41 = vld [vmem:[#allocation6 + $0x820] sm:$0xff]  }
 0xaf4   : > { %5530 = vmatpush3.bf16.msra.mxu0 %v5968_v36  ;;  %5549 = vmatprep.subr.bf16.mxu1 %v6188_v0  ;;  %v6000_v36 = vld [vmem:[#allocation6 + $0x848] sm:$0xff]  }
 0xaf5   : > { %5531 = vmatprep.subr.bf16.mxu0 %v6188_v0 }
 0xaf7   : > { %5550 = vmatpush3.bf16.msra.mxu1 %v5976_v43  ;;  %v6010_v43 = vld [vmem:[#allocation6 + $0x870] sm:$0xff]  }
 0xaf8   : > { %5532 = vmatpush3.bf16.msra.mxu0 %v5969_v5  ;;  %5551 = vmatprep.subr.bf16.mxu1 %v6188_v0  ;;  %v6003_v5 = vld [vmem:[#allocation6 + $0x808] sm:$0xff]  }
 0xaf9   : > { %5533 = vmatprep.subr.bf16.mxu0 %v6188_v0 }
 0xafb   : > { %5552 = vmatpush3.bf16.msra.mxu1 %v5978_v45  ;;  %v6012_v45 = vld [vmem:[#allocation6 + $0x878] sm:$0xff]  }
 0xafc   : > { %5534 = vmatpush3.bf16.msra.mxu0 %v5970_v14  ;;  %5553 = vmatprep.subr.bf16.mxu1 %v6188_v0  ;;  %v6002_v14 = vld [vmem:[#allocation6 + $0x850] sm:$0xff]  }
 0xafd   : > { %5535 = vmatprep.subr.bf16.mxu0 %v6188_v0 }
 0xaff   : > { %5554 = vmatpush3.bf16.msra.mxu1 %v5980_v47  ;;  %v6014_v47 = vld [vmem:[#allocation6 + $0x838] sm:$0xff]  }
 0xb00   : > { %5536 = vmatpush3.bf16.msra.mxu0 %v5971_v37  ;;  %5555 = vmatprep.subr.bf16.mxu1 %v6188_v0  ;;  %v6005_v37 = vld [vmem:[#allocation6 + $0x810] sm:$0xff]  }
 0xb01   : > { %5537 = vmatprep.subr.bf16.mxu0 %v6188_v0 }
 0xb03   : > { %5556 = vmatpush3.bf16.msra.mxu1 %v5982_v49 }
 0xb04   : > { %5538 = vmatpush3.bf16.msra.mxu0 %v5972_v38  ;;  %5557 = vmatprep.subr.bf16.mxu1 %v6188_v0  ;;  %v6004_v38 = vld [vmem:[#allocation6 + $0x858] sm:$0xff]  }
 0xb05   : > { %5539 = vmatprep.subr.bf16.mxu0 %v6188_v0 }
 0xb07   : > { %5558 = vmatpush3.bf16.msra.mxu1 %v5984_v51 }
 0xb08   : > { %5540 = vmatpush3.bf16.msra.mxu0 %v5973_v39  ;;  %5559 = vmatprep.subr.bf16.mxu1 %v6188_v0  ;;  %v6007_v39 = vld [vmem:[#allocation6 + $0x818] sm:$0xff]  }
 0xb09   : > { %5541 = vmatprep.subr.bf16.mxu0 %v6188_v0 }
 0xb0b   : > { %5560 = vmatpush3.bf16.msra.mxu1 %v5986_v52 }
 0xb0c   : > { %5542 = vmatpush3.bf16.msra.mxu0 %v5974_v40  ;;  %5561 = vmatprep.subr.bf16.mxu1 %v6188_v0  ;;  %v6006_v40 = vld [vmem:[#allocation6 + $0x860] sm:$0xff]  }
 0xb0d   : > { %5567 = vmatprep.subr.bf16.mxu0 %v6188_v0 }
 0xb0f   : > { %5544 = vmatmul.mubr.msk.bf16.vlgmr.msra.gmra.mrb[56].mxu0 %vm6740_vm15, %v4579_v34  ;;  %5562 = vmatpush3.bf16.msra.mxu1 %v5988_v54  ;;  %v5999_v34 = vld [vmem:[#allocation6 + $0x840] sm:$0xff]  }
 0xb10   : > { %5583 = vmatprep.mubr.msk.bf16.mxu0 %vm6189_vm0, %v6188_v0  ;;  %5568 = vmatpush3.bf16.msra.mxu0 %v5977_v42  ;;  %v6008_v42 = vld [vmem:[#allocation6 + $0x868] sm:$0xff]  }
 0xb11   : > { %5569 = vmatprep.subr.bf16.mxu0 %v6188_v0  ;;  %5587 = vmatprep.subr.bf16.mxu1 %v6188_v0 }
 0xb14   : > { %5570 = vmatpush3.bf16.msra.mxu0 %v5979_v44  ;;  %v6011_v44 = vld [vmem:[#allocation6 + $0x828] sm:$0xff]  }
 0xb15   : > { %5571 = vmatprep.subr.bf16.mxu0 %v6188_v0 }
 0xb18   : > { %5572 = vmatpush3.bf16.msra.mxu0 %v5981_v46  ;;  %v6013_v46 = vld [vmem:[#allocation6 + $0x830] sm:$0xff]  }
 0xb19   : > { %5573 = vmatprep.subr.bf16.mxu0 %v6188_v0 }
 0xb1c   : > { %5574 = vmatpush3.bf16.msra.mxu0 %v5983_v48 }
 0xb1d   : > { %5575 = vmatprep.subr.bf16.mxu0 %v6188_v0 }
 0xb20   : > { %5576 = vmatpush3.bf16.msra.mxu0 %v5985_v50 }
 0xb21   : > { %5577 = vmatprep.subr.bf16.mxu0 %v6188_v0 }
 0xb24   : > { %5578 = vmatpush3.bf16.msra.mxu0 %v5987_v53 }
 0xb25   : > { %5579 = vmatprep.subr.bf16.mxu0 %v6188_v0 }
 0xb28   : > { %5580 = vmatpush3.bf16.msra.mxu0 %v5989_v55 }
 0xb29   : > { %5581 = vmatprep.subr.bf16.mxu0 %v6188_v0 }
 0xb2c   : > { %5582 = vmatpush3.bf16.msra.mxu0 %v5990_v56 }
 0xb2d   : > { %5607 = vmatprep.subr.bf16.mxu0 %v6188_v0 }
 0xbc2   : > { %v3256_v57 = vpop.f32.mrb[52].mxu0 }
 0xbc3   : > { %v5505_v60 = vpop.f32.mrb[53].mxu0 }
 0xbc4   : > { %v3259_v61 = vpop.f32.mrb[54].mxu0 }
 0xbc5   : > { %v5506_v62 = vpop.f32.mrb[55].mxu0  ;;  %v3345_v63 = vpop.f32.mrb[52].mxu1 }
 0xbc6   : > { %v3346_v2 = vadd.f32 %v3345_v63, %v3256_v57  ;;  %v5525_v4 = vpop.f32.mrb[53].mxu1 }
 0xbc7   : > { %v3348_v6 = vpop.f32.mrb[54].mxu1 }
 0xbc8   : > { %v3349_v7 = vadd.f32 %v3348_v6, %v3259_v61  ;;  %v5526_v8 = vpop.f32.mrb[55].mxu1  ;;  %v4613_v61 = vld [vmem:[#allocation8 + $0xc] ss:$0 sm:$0xff] }
 0xbe2   : > { %v3457_v10 = vpop.f32.mrb[56].mxu0 }
 0xbe3   : > { %v3464_v11 = vadd.f32 %v3457_v10, %v3346_v2  ;;  %v5545_v12 = vpop.f32.mrb[57].mxu0 }
 0xbe4   : > { %v3460_v15 = vpop.f32.mrb[58].mxu0  ;;  %v6015_v12 = vld [vmem:[#allocation6 + $0x880] sm:$0xff]  }
 0xbe5   : > { %v3471_v16 = vadd.f32 %v4581_v20, %v3464_v11  ;;  %v3465_v17 = vadd.f32 %v3460_v15, %v3349_v7  ;;  %v5546_v1 = vpop.f32.mrb[59].mxu0 }
 0xbe7   : > { %v3472_v3 = vadd.f32 %v4581_v20, %v3465_v17  ;;  %v3475_v58 = vrot.slane %v3471_v16, 7  ;;  %v3693_v59 = vrot.slane %v3471_v16, 1 }
 0xbe9   : > { %v3476_v13 = vrot.slane %v3472_v3, 7  ;;  %v3514_v9 = vpack.c.bf16 %v3472_v3, %v3471_v16  ;;  %v3694_v21 = vrot.slane %v3472_v3, 1 }
 0xbeb   : > { %v3477_v22 = vsel %vm221_vm1, %v3475_v58, %v3476_v13  ;;  %v3695_v23 = vsel %vm435_vm4, %v3693_v59, %v3694_v21  ;;  %5564 = vmatmul.mubr.bf16.vlgmr.msra.gmra.mrb[56].mxu1 %v3514_v9  ;;  %v6016_v13 = vld [vmem:[#allocation6 + $0x888] sm:$0xff]   ;;  %v6017_v9 = vld [vmem:[#allocation6 + $0x890] sm:$0xff]  }
 0xbec   : > { %v4611_v24 = vpack.c.bf16 %v3694_v21, %v3695_v23  ;;  %5588 = vmatpush3.bf16.msra.mxu1 %v5991_v19  ;;  %v4600_v25 = vpack.c.bf16 %v3477_v22, %v3475_v58  ;;  %5603 = vmatprep.mubr.msk.bf16.mxu1 %vm6189_vm0, %v6188_v0  ;;  %v6018_v21 = vld [vmem:[#allocation6 + $0x898] sm:$0xff]   ;;  %v6019_v22 = vld [vmem:[#allocation6 + $0x8a0] sm:$0xff]   ;;  %v6020_v23 = vld [vmem:[#allocation6 + $0x8a8] sm:$0xff]  }
 0xbed   : > { %5589 = vmatprep.subr.bf16.mxu1 %v6188_v0 }
 0xbee   : > { %5584 = vmatmul.mubr.msk.bf16.vlgmr.msra.gmra.mrb[60].mxu0 %vm6719_vm14, %v4600_v25 }
 0xbef   : > { %5623 = vmatprep.mubr.msk.bf16.mxu0 %vm6189_vm0, %v6188_v0  ;;  %5608 = vmatpush3.bf16.msra.mxu0 %v5999_v34 }
 0xbf0   : > { %5590 = vmatpush3.bf16.msra.mxu1 %v5992_v26  ;;  %5609 = vmatprep.subr.bf16.mxu0 %v6188_v0 }
 0xbf1   : > { %5591 = vmatprep.subr.bf16.mxu1 %v6188_v0 }
 0xbf3   : > { %5610 = vmatpush3.bf16.msra.mxu0 %v6000_v36 }
 0xbf4   : > { %5592 = vmatpush3.bf16.msra.mxu1 %v5993_v31  ;;  %5611 = vmatprep.subr.bf16.mxu0 %v6188_v0 }
 0xbf5   : > { %5593 = vmatprep.subr.bf16.mxu1 %v6188_v0 }
 0xbf7   : > { %5612 = vmatpush3.bf16.msra.mxu0 %v6002_v14 }
 0xbf8   : > { %5594 = vmatpush3.bf16.msra.mxu1 %v5994_v28  ;;  %5613 = vmatprep.subr.bf16.mxu0 %v6188_v0 }
 0xbf9   : > { %5595 = vmatprep.subr.bf16.mxu1 %v6188_v0 }
 0xbfb   : > { %5614 = vmatpush3.bf16.msra.mxu0 %v6004_v38 }
 0xbfc   : > { %5596 = vmatpush3.bf16.msra.mxu1 %v5995_v29  ;;  %5615 = vmatprep.subr.bf16.mxu0 %v6188_v0 }
 0xbfd   : > { %5597 = vmatprep.subr.bf16.mxu1 %v6188_v0 }
 0xbff   : > { %5616 = vmatpush3.bf16.msra.mxu0 %v6006_v40 }
 0xc00   : > { %5598 = vmatpush3.bf16.msra.mxu1 %v5996_v30  ;;  %5617 = vmatprep.subr.bf16.mxu0 %v6188_v0 }
 0xc01   : > { %5599 = vmatprep.subr.bf16.mxu1 %v6188_v0 }
 0xc03   : > { %5618 = vmatpush3.bf16.msra.mxu0 %v6008_v42 }
 0xc04   : > { %5600 = vmatpush3.bf16.msra.mxu1 %v5997_v32  ;;  %5619 = vmatprep.subr.bf16.mxu0 %v6188_v0 }
 0xc05   : > { %5601 = vmatprep.subr.bf16.mxu1 %v6188_v0 }
 0xc07   : > { %5620 = vmatpush3.bf16.msra.mxu0 %v6010_v43 }
 0xc08   : > { %5602 = vmatpush3.bf16.msra.mxu1 %v5998_v33  ;;  %5621 = vmatprep.subr.bf16.mxu0 %v6188_v0 }
 0xc09   : > { %5627 = vmatprep.subr.bf16.mxu1 %v6188_v0 }
 0xc0b   : > { %5604 = vmatmul.mubr.msk.bf16.vlgmr.msra.gmra.mrb[60].mxu1 %vm6740_vm15, %v4611_v24  ;;  %5622 = vmatpush3.bf16.msra.mxu0 %v6012_v45  ;;  %v6021_v24 = vld [vmem:[#allocation6 + $0x8b0] sm:$0xff]  }
 0xc0c   : > { %5643 = vmatprep.mubr.msk.bf16.mxu1 %vm6189_vm0, %v6188_v0  ;;  %5628 = vmatpush3.bf16.msra.mxu1 %v6001_v35 }
 0xc0d   : > { %5629 = vmatprep.subr.bf16.mxu1 %v6188_v0  ;;  %5647 = vmatprep.subr.bf16.mxu0 %v6188_v0 }
 0xc10   : > { %5630 = vmatpush3.bf16.msra.mxu1 %v6003_v5  ;;  %v4645_v5 = vld [vmem:[#allocation8 + $0xd] ss:$0 sm:$0xff] }
 0xc11   : > { %5631 = vmatprep.subr.bf16.mxu1 %v6188_v0 }
 0xc14   : > { %5632 = vmatpush3.bf16.msra.mxu1 %v6005_v37 }
 0xc15   : > { %5633 = vmatprep.subr.bf16.mxu1 %v6188_v0 }
 0xc18   : > { %5634 = vmatpush3.bf16.msra.mxu1 %v6007_v39 }
 0xc19   : > { %5635 = vmatprep.subr.bf16.mxu1 %v6188_v0 }
 0xc1c   : > { %5636 = vmatpush3.bf16.msra.mxu1 %v6009_v41 }
 0xc1d   : > { %5637 = vmatprep.subr.bf16.mxu1 %v6188_v0 }
 0xc20   : > { %5638 = vmatpush3.bf16.msra.mxu1 %v6011_v44 }
 0xc21   : > { %5639 = vmatprep.subr.bf16.mxu1 %v6188_v0 }
 0xc24   : > { %5640 = vmatpush3.bf16.msra.mxu1 %v6013_v46 }
 0xc25   : > { %5641 = vmatprep.subr.bf16.mxu1 %v6188_v0 }
 0xc28   : > { %5642 = vmatpush3.bf16.msra.mxu1 %v6014_v47 }
 0xcbe   : > { %v3597_v48 = vpop.f32.mrb[56].mxu1 }
 0xcbf   : > { %v5565_v49 = vpop.f32.mrb[57].mxu1 }
 0xcc0   : > { %v3600_v50 = vpop.f32.mrb[58].mxu1 }
 0xcc1   : > { %v5566_v51 = vpop.f32.mrb[59].mxu1  ;;  %v3686_v52 = vpop.f32.mrb[60].mxu0 }
 0xcc2   : > { %v3687_v53 = vadd.f32 %v3686_v52, %v3597_v48  ;;  %v5585_v54 = vpop.f32.mrb[61].mxu0 }
 0xcc3   : > { %v3689_v55 = vpop.f32.mrb[62].mxu0 }
 0xcc4   : > { %v3690_v56 = vadd.f32 %v3689_v55, %v3600_v50  ;;  %v5586_v57 = vpop.f32.mrb[63].mxu0 }
 0xcde   : > { %v3798_v60 = vpop.f32.mrb[60].mxu1 }
 0xcdf   : > { %v3805_v62 = vadd.f32 %v3798_v60, %v3687_v53  ;;  %v5605_v63 = vpop.f32.mrb[61].mxu1 }
 0xce0   : > { %v3801_v2 = vpop.f32.mrb[62].mxu1 }
 0xce1   : > { %v3812_v4 = vadd.f32 %v4613_v61, %v3805_v62  ;;  %v3806_v6 = vadd.f32 %v3801_v2, %v3690_v56  ;;  %v5606_v7 = vpop.f32.mrb[63].mxu1 }
 0xce3   : > { %v3814_v8 = vmax.f32 %v3812_v4, 0.0  ;;  %v3813_v10 = vadd.f32 %v4613_v61, %v3806_v6 }
 0xce5   : > { %v3815_v20 = vmax.f32 %v3813_v10, 0.0  ;;  %v3818_v11 = vrot.slane %v3814_v8, 7  ;;  %v4036_v15 = vrot.slane %v3814_v8, 1 }
 0xce7   : > { %v3819_v16 = vrot.slane %v3815_v20, 7  ;;  %v4037_v17 = vrot.slane %v3815_v20, 1  ;;  %v3857_v1 = vpack.c.bf16 %v3815_v20, %v3814_v8 }
 0xce9   : > { %v3820_v3 = vsel %vm221_vm1, %v3818_v11, %v3819_v16  ;;  %v4038_v58 = vsel %vm435_vm4, %v4036_v15, %v4037_v17  ;;  %5624 = vmatmul.mubr.bf16.vlgmr.msra.gmra.mrb[64].mxu0 %v3857_v1 }
 0xcea   : > { %v4643_v19 = vpack.c.bf16 %v4037_v17, %v4038_v58  ;;  %5648 = vmatpush3.bf16.msra.mxu0 %v6015_v12  ;;  %v4632_v59 = vpack.c.bf16 %v3820_v3, %v3818_v11  ;;  %5663 = vmatprep.mubr.msk.bf16.mxu0 %vm6189_vm0, %v6188_v0 }
 0xceb   : > { %5649 = vmatprep.subr.bf16.mxu0 %v6188_v0 }
 0xcec   : > { %5644 = vmatmul.mubr.msk.bf16.vlgmr.msra.gmra.mrb[64].mxu1 %vm6719_vm14, %v4632_v59 }
 0xcee   : > { %5650 = vmatpush3.bf16.msra.mxu0 %v6016_v13 }
 0xcef   : > { %5651 = vmatprep.subr.bf16.mxu0 %v6188_v0 }
 0xcf2   : > { %5652 = vmatpush3.bf16.msra.mxu0 %v6017_v9 }
 0xcf3   : > { %5653 = vmatprep.subr.bf16.mxu0 %v6188_v0 }
 0xcf6   : > { %5654 = vmatpush3.bf16.msra.mxu0 %v6018_v21 }
 0xcf7   : > { %5655 = vmatprep.subr.bf16.mxu0 %v6188_v0 }
 0xcfa   : > { %5656 = vmatpush3.bf16.msra.mxu0 %v6019_v22 }
 0xcfb   : > { %5657 = vmatprep.subr.bf16.mxu0 %v6188_v0 }
 0xcfe   : > { %5658 = vmatpush3.bf16.msra.mxu0 %v6020_v23 }
 0xcff   : > { %5659 = vmatprep.subr.bf16.mxu0 %v6188_v0 }
 0xd02   : > { %5660 = vmatpush3.bf16.msra.mxu0 %v6021_v24 }
 0xd03   : > { %5661 = vmatprep.subr.bf16.mxu0 %v6188_v0 }
 0xd06   : > { %5662 = vmatpush3.bf16.msra.mxu0 %v6022_v18 }
 0xd09   : > { %5664 = vmatmul.mubr.msk.bf16.vlgmr.msra.gmra.mrb[68].mxu0 %vm6740_vm15, %v4643_v19 }
 0xdbc   : > { %v3940_v25 = vpop.f32.mrb[64].mxu0 }
 0xdbd   : > { %v5625_v26 = vpop.f32.mrb[65].mxu0 }
 0xdbe   : > { %v3943_v31 = vpop.f32.mrb[66].mxu0 }
 0xdbf   : > { %v5626_v28 = vpop.f32.mrb[67].mxu0  ;;  %v4029_v29 = vpop.f32.mrb[64].mxu1 }
 0xdc0   : > { %v4030_v30 = vadd.f32 %v4029_v29, %v3940_v25  ;;  %v5645_v32 = vpop.f32.mrb[65].mxu1 }
 0xdc1   : > { %v4032_v33 = vpop.f32.mrb[66].mxu1 }
 0xdc2   : > { %v4033_v34 = vadd.f32 %v4032_v33, %v3943_v31  ;;  %v5646_v35 = vpop.f32.mrb[67].mxu1 }
 0xddc   : > { %v4141_v36 = vpop.f32.mrb[68].mxu0 }
 0xddd   : > { %v4148_v0 = vadd.f32 %v4141_v36, %v4030_v30  ;;  %v5665_v27 = vpop.f32.mrb[69].mxu0 }
 0xdde   : > { %v4144_v14 = vpop.f32.mrb[70].mxu0 }
 0xddf   : > { %v4155_v37 = vadd.f32 %v4645_v5, %v4148_v0  ;;  %v4149_v38 = vadd.f32 %v4144_v14, %v4033_v34  ;;  %v5666_v39 = vpop.f32.mrb[71].mxu0 }
 0xde1   : > { %4157 = vst [vmem:[%s214_s20] sm:$0xff] %v4155_v37  ;;  %v4156_v40 = vadd.f32 %v4645_v5, %v4149_v38 }
 0xde3   : > { %4158 = vst [vmem:[%s214_s20 + $0x8] sm:$0xff] %v4156_v40 }
 0xde4   : > { %6122 = shalt.err (!%p6119_p2)
}
 0xde5   : > { %s6123_s11 = scalar_lea.hbm %s6870_s4, 256  ;;  %s6127_s26 = scalar_lea.hbm %s6917_s3, 512 }
 0xde6   : > { %p6124_p13 = scmp.ne.s32.totalorder %s6870_s4, %s6123_s11  ;;  %p6128_p4 = scmp.lt.u32.totalorder %s6870_s4, %s6917_s3 }
 0xde7   : > { %p6129_p7 = scmp.lt.u32.totalorder %s6127_s26, %s6123_s11  ;;  %p6131_p11 = scmp.lt.u32.totalorder %s6123_s11, %s6870_s4 }
 0xde8   : > { %p6125_p6 = pnand %p6124_p13, %p6943_p0 }
 0xde9   : > { %p6130_p8 = por %p6129_p7, %p6128_p4 }
 0xdea   : > { %p6126_p10 = pneg %p6125_p6 }
 0xdeb   : > { %p6132_p1 = por %p6131_p11, %p6130_p8 }
 0xded   : > { %p6133_p3 = pnand %p6132_p1, %p6126_p10 }
 0xdef   : > { %6136 = shalt.err (!%p6133_p3)
}
 0xdf0   : > { %s6192_s18 = smov 128   ;;  %s6193_s20 = smov 8  }
 0xdf1   : > { %5677 = dma.vmem_to_hbm [thread:$0]  (%p6943_p0), %s6865_s24, 256, %s6870_s4, %s4160_s5, %s6192_s18, %s6192_s18, %s6193_s20  }
 0xdf2 PF: > { %s4188_s27 = sand.u32 1, %s6167_s12   ;;  %p6944_p5 = scmp.ne.s32.totalorder %s6922_s19, 0 }
 0xdf3   : > { %p6945_p9 = scmp.ge.s32.totalorder %s6179_s15, 2  ;;  %s4189_s28 = scalar_lea.sflag [#allocation5], %s4188_s27 }
 0xdf5   : > { %p5691_p12 = pnand %p6945_p9, %p6944_p5 }
 0xdf7   : > { %6162 = dma.done.wait (!%p5691_p12), %s4189_s28, 256  }
 0xdf8   : > { %6164 = vsyncadd (!%p5691_p12), %s4189_s28, 4294967040  ;;  %p17_p2 = scmp.ge.s32.totalorder %s6324_s6, 4   ;;  %s6946_s12 = smov %s6171_s13 }
 0xdf9   : > { %s6947_s13 = smov %s6175_s14  ;;  %s6948_s14 = smov %s6333_s9 }
 0xdfa   : > { %s6949_s15 = smov %s6324_s6  ;;  %19 = sbr.rel (!%p17_p2) target bundleno = 6 (0x6), region = 85 }
 0xe01   :  { %4194 = vsyncpa [#allocation4], 1 }
 0xe02   :  { %4196 = vsyncpa [#allocation4 + $0x1], 1 }
 0xe03   :  { %4197 = vsyncpa [#allocation7], 1 }
 0xe04   :  { %4198 = vsyncpa [#allocation5], 1 }
 0xe05   :  { %4200 = vsyncpa [#allocation5 + $0x1], 1 }

</bundles_post_ra>
